<compile_context>
chip_gen: v7x
topology: tpu7x:2x2x1
jax: 0.10.0
libtpu: 0.0.40
codegen_flags: <defaults>
</compile_context>

<pallas_src>
import math

import jax
import jax.numpy as jnp
from jax import lax
from jax.experimental import pallas as pl
from jax.experimental.pallas import tpu as pltpu

# nn.PReLU() default init (num_parameters=1, weight=0.25).
# TODO(synk): trained checkpoints have learnable (per-layer) PReLU weights; bake
# them in as compile-time constants (or SMEM scalars) when loading real weights.
PRELU_ALPHA = 0.25


def _rup(v, k):
    return (v + k - 1) // k * k


# ----------------------------- fused Pallas kernel ----------------------------
def _make_fused_kernel(H, W, nc, d, s, m, alpha):
    HW = H * W                         # 256: spatial lanes (2 lane tiles)
    OH, OW = H - 4, W - 4              # 12x12 valid region after the 5x5 conv
    OFF = 128                          # lane offset of the window (128-aligned)
    d_pad = _rup(d, 16)                # 56 -> 64   (bf16 sublane tile = 16)
    s_pad = _rup(s, 16)                # 12 -> 16
    k1 = _rup(25 * nc, 8)              # 25 -> 32   (first-conv im2col rows, f32)
    p_pad = _rup(9 * nc, 16)           # 9  -> 16   (deconv phase rows)
    offs3 = [(u - 1) * W + (v - 1) for u in range(3) for v in range(3)]
    f32, bf16 = jnp.float32, jnp.bfloat16

    def kernel(x_ref, mask_ref, w1_ref, b1_ref, w2_ref, b2_ref, wm_ref, bm_ref,
               w7_ref, b7_ref, wd_ref, bd_ref, o_ref, cv_a, cv_b):
        core = mask_ref[...] != 0.0                           # (1, HW) bool

        def finish(acc, bias, dst, rows):
            v = acc + bias                                    # (rows, HW) f32
            v = jnp.where(v >= 0.0, v, alpha * v)             # PReLU
            v = jnp.where(core, v, 0.0)                       # keep zero ring
            dst[0:rows, OFF:OFF + HW] = v.astype(bf16)        # aligned, lane-dense

        # ---- first_part: 5x5 valid conv (nc -> d) as one K=25*nc matmul ------
        acc = jnp.dot(w1_ref[...], x_ref[0], preferred_element_type=f32)
        finish(acc, b1_ref[...], cv_a, d_pad)

        # ---- shrink: 1x1 conv (d -> s) ---------------------------------------
        h = cv_a[0:d_pad, OFF:OFF + HW]                       # aligned bf16 load
        acc = jnp.dot(w2_ref[...], h, preferred_element_type=f32)
        finish(acc, b2_ref[...], cv_b, s_pad)

        # ---- mapping: m x (3x3 'same' conv s -> s); 9 taps folded into K -----
        src, dst = cv_b, cv_a
        for l in range(m):
            stacked = jnp.concatenate(
                [src[0:s_pad, OFF + o:OFF + o + HW] for o in offs3], axis=0)
            acc = jnp.dot(wm_ref[l], stacked, preferred_element_type=f32)
            finish(acc, bm_ref[l], dst, s_pad)
            src, dst = dst, src

        # ---- expand: 1x1 conv (s -> d) ---------------------------------------
        h = src[0:s_pad, OFF:OFF + HW]
        acc = jnp.dot(w7_ref[...], h, preferred_element_type=f32)
        finish(acc, b7_ref[...], dst, d_pad)

        # ---- last_part: ConvTranspose2d(9, stride 3, pad 4) as 9 phase rows --
        acc = jnp.zeros((p_pad, HW), f32)
        for t, o in enumerate(offs3):
            xs = dst[0:d_pad, OFF + o:OFF + o + HW]
            acc = acc + jnp.dot(wd_ref[t], xs, preferred_element_type=f32)
        o_ref[0] = acc + bd_ref[...]                          # phases cropped host-side

    dims = dict(HW=HW, OH=OH, OW=OW, OFF=OFF,
                d_pad=d_pad, s_pad=s_pad, k1=k1, p_pad=p_pad)
    return kernel, dims


# ------------------------------ weight packing ---------------------------------
def _prep_weights(params, nc):
    f32, bf16 = jnp.float32, jnp.bfloat16
    w1, b1 = params["w1"], params["b1"]          # (d, nc, 5, 5), (d,)
    w2, b2 = params["w2"], params["b2"]          # (s, d, 1, 1), (s,)
    w7, b7 = params["w7"], params["b7"]          # (d, s, 1, 1), (d,)
    wt, bt = params["wt"], params["bt"]          # (d, nc, 9, 9), (nc,)
    d, s, m = w1.shape[0], w2.shape[0], len(params["wm"])
    d_pad, s_pad = _rup(d, 16), _rup(s, 16)
    k1, p_pad = _rup(25 * nc, 8), _rup(9 * nc, 16)

    def pad2(a, r, c):
        return jnp.pad(a, ((0, r - a.shape[0]), (0, c - a.shape[1])))

    # first_part: columns are tap-major (t = i*5+j), channel-minor (matches im2col)
    w1k = pad2(jnp.transpose(w1, (0, 2, 3, 1)).reshape(d, 25 * nc),
               d_pad, k1).astype(f32)
    b1k = pad2(b1.reshape(d, 1), d_pad, 1).astype(f32)
    w2k = pad2(w2[:, :, 0, 0], s_pad, d_pad).astype(bf16)
    b2k = pad2(b2.reshape(s, 1), s_pad, 1).astype(f32)

    # mapping: per-tap channel block padded to s_pad so the in-kernel sublane
    # concat of (s_pad, HW) tiles stays tile aligned; column = t*s_pad + cin.
    wmk_l, bmk_l = [], []
    for w, b in zip(params["wm"], params["bm"]):
        wk = jnp.transpose(w, (0, 2, 3, 1)).reshape(s, 9, s)        # (out, tap, in)
        wk = jnp.pad(wk, ((0, s_pad - s), (0, 0), (0, s_pad - s)))
        wmk_l.append(wk.reshape(s_pad, 9 * s_pad))
        bmk_l.append(pad2(b.reshape(s, 1), s_pad, 1))
    wmk = jnp.stack(wmk_l, 0).astype(bf16)                          # (m, s_pad, 9*s_pad)
    bmk = jnp.stack(bmk_l, 0).astype(f32)                           # (m, s_pad, 1)

    w7k = pad2(w7[:, :, 0, 0], d_pad, s_pad).astype(bf16)
    b7k = pad2(b7.reshape(d, 1), d_pad, 1).astype(f32)

    # ConvTranspose2d phase decomposition: phase (ry, rx) is a 3x3 'same' conv
    # with taps Wt[:, :, ry + 6 - 3u, rx + 6 - 3v]; output row = (ry*3+rx)*nc + oc.
    taps = []
    for u in range(3):
        for v in range(3):
            rows = [wt[:, :, ry + 6 - 3 * u, rx + 6 - 3 * v].T       # (nc, d)
                    for ry in range(3) for rx in range(3)]
            taps.append(pad2(jnp.concatenate(rows, axis=0), p_pad, d_pad))
    wdk = jnp.stack(taps, 0).astype(bf16)                           # (9, p_pad, d_pad)
    bdk = pad2(jnp.tile(bt, 9).reshape(9 * nc, 1), p_pad, 1).astype(f32)
    return (w1k, b1k, w2k, b2k, wmk, bmk, w7k, b7k, wdk, bdk), (d, s, m)


# ---------------------------------- forward ------------------------------------
@jax.jit
def net_forward(params, x_nchw):
    N, nc, H, W = x_nchw.shape
    (w1k, b1k, w2k, b2k, wmk, bmk, w7k, b7k, wdk, bdk), (d, s, m) = \
        _prep_weights(params, nc)
    kernel, dims = _make_fused_kernel(H, W, nc, d, s, m, PRELU_ALPHA)
    HW, OH, OW, OFF = dims["HW"], dims["OH"], dims["OW"], dims["OFF"]
    d_pad, s_pad, k1, p_pad = dims["d_pad"], dims["s_pad"], dims["k1"], dims["p_pad"]
    CR = max(d_pad, s_pad)                       # canvas rows (channels)
    LANES = _rup(OFF + HW + W + 1, 128)          # canvas lanes (window + halo)

    # host-side im2col of the 5x5 taps: rows = tap-major/channel-minor, lanes = H*W
    x_hw = x_nchw.astype(jnp.float32).reshape(N, nc, HW)
    offs5 = [(i - 1) * W + (j - 1) for i in range(5) for j in range(5)]
    x_stack = jnp.concatenate([jnp.roll(x_hw, -o, axis=-1) for o in offs5], axis=1)
    x_stack = jnp.pad(x_stack, ((0, 0), (0, k1 - 25 * nc), (0, 0)))   # (N, k1, HW)

    # interior mask over the 256-lane window: canvas rows/cols 1..OH/OW are valid
    pos = jnp.arange(HW)
    r, c = pos // W, pos % W
    mask = (((r >= 1) & (r <= OH) & (c >= 1) & (c <= OW))
            .astype(jnp.float32).reshape(1, HW))

    def full(a):
        nd = a.ndim
        return pl.BlockSpec(a.shape, lambda n, _nd=nd: (0,) * _nd)

    o = pl.pallas_call(
        kernel,
        out_shape=jax.ShapeDtypeStruct((N, p_pad, HW), jnp.float32),
        grid_spec=pltpu.PrefetchScalarGridSpec(
            num_scalar_prefetch=0,
            grid=(N,),
            in_specs=[
                pl.BlockSpec((1, k1, HW), lambda n: (n, 0, 0)),
                full(mask),
                full(w1k), full(b1k), full(w2k), full(b2k),
                full(wmk), full(bmk), full(w7k), full(b7k),
                full(wdk), full(bdk),
            ],
            out_specs=pl.BlockSpec((1, p_pad, HW), lambda n: (n, 0, 0)),
            scratch_shapes=[pltpu.VMEM((CR, LANES), jnp.bfloat16),
                            pltpu.VMEM((CR, LANES), jnp.bfloat16)],
        ),
        compiler_params=pltpu.CompilerParams(
            dimension_semantics=("parallel",)),
    )(x_stack, mask, w1k, b1k, w2k, b2k, wmk, bmk, w7k, b7k, wdk, bdk)

    # un-scramble the 9 deconv phases: rows = (ry*3+rx)*nc + oc, lanes = r*W + c
    o9 = o[:, :9 * nc, :].reshape(N, 3, 3, nc, H, W)
    core = o9[:, :, :, :, 1:1 + OH, 1:1 + OW]             # (N, ry, rx, nc, oy, ox)
    inter = jnp.transpose(core, (0, 3, 4, 1, 5, 2))       # (N, nc, oy, ry, ox, rx)
    inter = inter.reshape(N, nc, 3 * OH, 3 * OW)
    return inter[:, :, 1:3 * OH - 1, 1:3 * OW - 1]        # (N, nc, 3*OH-2, 3*OW-2)


# ----------------------- pure-JAX reference (for checking) ---------------------
def _q(t):
    return t.astype(jnp.bfloat16).astype(jnp.float32)


def reference_forward(params, x_nchw, alpha=PRELU_ALPHA):
    """XLA reference with the same bf16 rounding points as the Pallas kernel."""
    hp = jax.lax.Precision.HIGHEST

    def conv(x, w_oihw, b, pad):
        y = lax.conv_general_dilated(
            x, jnp.transpose(w_oihw, (2, 3, 1, 0)).astype(jnp.float32),
            window_strides=(1, 1), padding=[(pad, pad), (pad, pad)],
            dimension_numbers=("NHWC", "HWIO", "NHWC"), precision=hp)
        return y + b.astype(jnp.float32)

    def prelu(v):
        return jnp.where(v >= 0, v, alpha * v)

    x = jnp.transpose(x_nchw, (0, 2, 3, 1)).astype(jnp.float32)
    a = _q(prelu(conv(x, params["w1"], params["b1"], 0)))
    a = _q(prelu(conv(a, _q(params["w2"]), params["b2"], 0)))
    for w, b in zip(params["wm"], params["bm"]):
        a = _q(prelu(conv(a, _q(w), b, 1)))
    a = _q(prelu(conv(a, _q(params["w7"]), params["b7"], 0)))

    # ConvTranspose2d(k=9, s=3, p=4) via zero insertion + flipped kernel.
    wt = _q(params["wt"])                               # (d, nc, 9, 9)
    bt = params["bt"].astype(jnp.float32)
    d, nc, kh, kw = wt.shape
    N, Hh, Ww, _ = a.shape
    stride, pad = 3, 4
    z = jnp.zeros((N, (Hh - 1) * stride + 1, (Ww - 1) * stride + 1, d), a.dtype)
    z = z.at[:, ::stride, ::stride, :].set(a)
    w_conv = jnp.transpose(wt[:, :, ::-1, ::-1], (1, 0, 2, 3))   # OIHW, O=nc
    y = conv(z, w_conv, bt, kh - 1 - pad)
    return jnp.transpose(y, (0, 3, 1, 2))


# ---------------------------------- parameters ----------------------------------
def init_params(key, n_channels=1, d=56, s=12, m=4):
    """Deterministic init (PyTorch-style weight std; small random biases)."""
    def conv_wb(kw_, kb_, cout, cin, ksz):
        std = math.sqrt(2.0 / cout / ksz / ksz)
        w = jax.random.normal(kw_, (cout, cin, ksz, ksz), jnp.float32) * std
        b = jax.random.normal(kb_, (cout,), jnp.float32) * 0.05
        return w, b

    keys = jax.random.split(key, 2 * (m + 4))
    w1, b1 = conv_wb(keys[0], keys[1], d, n_channels, 5)
    w2, b2 = conv_wb(keys[2], keys[3], s, d, 1)
    wm, bm = [], []
    for i in range(m):
        w, b = conv_wb(keys[4 + 2 * i], keys[5 + 2 * i], s, s, 3)
        wm.append(w)
        bm.append(b)
    w7, b7 = conv_wb(keys[4 + 2 * m], keys[5 + 2 * m], d, s, 1)
    std = math.sqrt(2.0 / n_channels / 9 / 9)
    wt = jax.random.normal(keys[6 + 2 * m], (d, n_channels, 9, 9), jnp.float32) * std
    bt = jax.random.normal(keys[7 + 2 * m], (n_channels,), jnp.float32) * 0.05
    return {"w1": w1, "b1": b1, "w2": w2, "b2": b2, "wm": wm, "bm": bm,
            "w7": w7, "b7": b7, "wt": wt, "bt": bt}


if __name__ == "__main__":
    key = jax.random.PRNGKey(0)
    k_x, k_p = jax.random.split(key)

    # batch=2, 1 channel, 16x16 input -> (2, 1, 34, 34) output
    x = jax.random.normal(k_x, (2, 1, 16, 16), jnp.float32)
    params = init_params(k_p, n_channels=1, d=56, s=12, m=4)

    y = jax.block_until_ready(net_forward(params, x))
    y_ref = jax.block_until_ready(reference_forward(params, x))

    assert y.shape == (2, 1, 34, 34), y.shape
    assert bool(jnp.all(jnp.isfinite(y)))
    err = float(jnp.max(jnp.abs(y - y_ref)))
    assert err < 2e-2, f"max abs err vs reference: {err}"
    print("KERNEL_OK")
</pallas_src>

<mosaic_0001>
module attributes {stable_mosaic.version = 11 : i64} {
  func.func @kernel(%arg0: i32, %arg1: memref<1x32x256xf32, #tpu.memory_space<vmem>>, %arg2: memref<1x256xf32, #tpu.memory_space<vmem>>, %arg3: memref<64x32xf32, #tpu.memory_space<vmem>>, %arg4: memref<64x1xf32, #tpu.memory_space<vmem>>, %arg5: memref<16x64xbf16, #tpu.memory_space<vmem>>, %arg6: memref<16x1xf32, #tpu.memory_space<vmem>>, %arg7: memref<4x16x144xbf16, #tpu.memory_space<vmem>>, %arg8: memref<4x16x1xf32, #tpu.memory_space<vmem>>, %arg9: memref<64x16xbf16, #tpu.memory_space<vmem>>, %arg10: memref<64x1xf32, #tpu.memory_space<vmem>>, %arg11: memref<9x16x64xbf16, #tpu.memory_space<vmem>>, %arg12: memref<16x1xf32, #tpu.memory_space<vmem>>, %arg13: memref<1x16x256xf32, #tpu.memory_space<vmem>>, %arg14: memref<64x512xbf16, #tpu.memory_space<vmem>>, %arg15: memref<64x512xbf16, #tpu.memory_space<vmem>>) attributes {dimension_semantics = [#tpu.dimension_semantics<parallel>], iteration_bounds = array<i64: 2>, scalar_prefetch = 0 : i64, scratch_operands = 2 : i64, tpu.core_type = #tpu.core_type<tc>, window_params = [{transform_indices = @transform_0, window_bounds = array<i64: 1, 32, 256>}, {pipeline_mode = #tpu.pipeline_mode<synchronous>, transform_indices = @transform_1, window_bounds = array<i64: 1, 256>}, {pipeline_mode = #tpu.pipeline_mode<synchronous>, transform_indices = @transform_2, window_bounds = array<i64: 64, 32>}, {pipeline_mode = #tpu.pipeline_mode<synchronous>, transform_indices = @transform_3, window_bounds = array<i64: 64, 1>}, {pipeline_mode = #tpu.pipeline_mode<synchronous>, transform_indices = @transform_4, window_bounds = array<i64: 16, 64>}, {pipeline_mode = #tpu.pipeline_mode<synchronous>, transform_indices = @transform_5, window_bounds = array<i64: 16, 1>}, {pipeline_mode = #tpu.pipeline_mode<synchronous>, transform_indices = @transform_6, window_bounds = array<i64: 4, 16, 144>}, {pipeline_mode = #tpu.pipeline_mode<synchronous>, transform_indices = @transform_7, window_bounds = array<i64: 4, 16, 1>}, {pipeline_mode = #tpu.pipeline_mode<synchronous>, transform_indices = @transform_8, window_bounds = array<i64: 64, 16>}, {pipeline_mode = #tpu.pipeline_mode<synchronous>, transform_indices = @transform_9, window_bounds = array<i64: 64, 1>}, {pipeline_mode = #tpu.pipeline_mode<synchronous>, transform_indices = @transform_10, window_bounds = array<i64: 9, 16, 64>}, {pipeline_mode = #tpu.pipeline_mode<synchronous>, transform_indices = @transform_11, window_bounds = array<i64: 16, 1>}, {transform_indices = @transform_12, window_bounds = array<i64: 1, 16, 256>}]} {
    %c0 = arith.constant 0 : index
    %c0_0 = arith.constant 0 : index
    %0 = vector.load %arg2[%c0, %c0_0] : memref<1x256xf32, #tpu.memory_space<vmem>>, vector<1x256xf32>
    %cst = arith.constant 0.000000e+00 : f32
    %1 = vector.broadcast %cst : f32 to vector<1x256xf32>
    %2 = arith.cmpf one, %0, %1 : vector<1x256xf32>
    %c0_1 = arith.constant 0 : index
    %c0_2 = arith.constant 0 : index
    %3 = vector.load %arg3[%c0_1, %c0_2] : memref<64x32xf32, #tpu.memory_space<vmem>>, vector<64x32xf32>
    %c0_3 = arith.constant 0 : index
    %c0_4 = arith.constant 0 : index
    %c0_5 = arith.constant 0 : index
    %4 = vector.load %arg1[%c0_3, %c0_4, %c0_5] : memref<1x32x256xf32, #tpu.memory_space<vmem>>, vector<1x32x256xf32>
    %5 = vector.shape_cast %4 : vector<1x32x256xf32> to vector<32x256xf32>
    %cst_6 = arith.constant dense<0.000000e+00> : vector<64x256xf32>
    %6 = tpu.matmul %3, %5, %cst_6 {dimension_numbers = #tpu.dot_dimension_numbers<[1], [0], [0], [1], [0, 0, 1, 1], [], []>} : vector<64x32xf32>, vector<32x256xf32>, vector<64x256xf32> -> vector<64x256xf32>
    %c0_7 = arith.constant 0 : index
    %c0_8 = arith.constant 0 : index
    %7 = vector.load %arg4[%c0_7, %c0_8] : memref<64x1xf32, #tpu.memory_space<vmem>>, vector<64x1xf32>
    %8 = vector.broadcast %7 : vector<64x1xf32> to vector<64x256xf32>
    %9 = arith.addf %6, %8 : vector<64x256xf32>
    %cst_9 = arith.constant 0.000000e+00 : f32
    %10 = vector.broadcast %cst_9 : f32 to vector<64x256xf32>
    %11 = arith.cmpf oge, %9, %10 : vector<64x256xf32>
    %cst_10 = arith.constant 2.500000e-01 : f32
    %12 = vector.broadcast %cst_10 : f32 to vector<64x256xf32>
    %13 = arith.mulf %12, %9 : vector<64x256xf32>
    %14 = arith.select %11, %9, %13 : vector<64x256xi1>, vector<64x256xf32>
    %cst_11 = arith.constant 0.000000e+00 : f32
    %15 = vector.shape_cast %2 : vector<1x256xi1> to vector<1x256xi1>
    %16 = vector.broadcast %15 : vector<1x256xi1> to vector<64x256xi1>
    %17 = vector.broadcast %cst_11 : f32 to vector<64x256xf32>
    %18 = arith.select %16, %14, %17 : vector<64x256xi1>, vector<64x256xf32>
    %19 = arith.truncf %18 : vector<64x256xf32> to vector<64x256xbf16>
    %c0_12 = arith.constant 0 : index
    %c128 = arith.constant 128 : index
    %20 = vector.load %arg14[%c0_12, %c128] : memref<64x512xbf16, #tpu.memory_space<vmem>>, vector<64x256xbf16>
    tpu.vector_store %arg14[%c0_12, %c128], %19 {strides = array<i32>} : memref<64x512xbf16, #tpu.memory_space<vmem>>, vector<64x256xbf16>,
    %c0_13 = arith.constant 0 : index
    %c128_14 = arith.constant 128 : index
    %21 = vector.load %arg14[%c0_13, %c128_14] : memref<64x512xbf16, #tpu.memory_space<vmem>>, vector<64x256xbf16>
    %c0_15 = arith.constant 0 : index
    %c0_16 = arith.constant 0 : index
    %22 = vector.load %arg5[%c0_15, %c0_16] : memref<16x64xbf16, #tpu.memory_space<vmem>>, vector<16x64xbf16>
    %cst_17 = arith.constant dense<0.000000e+00> : vector<16x256xf32>
    %23 = tpu.matmul %22, %21, %cst_17 {dimension_numbers = #tpu.dot_dimension_numbers<[1], [0], [0], [1], [0, 0, 1, 1], [], []>} : vector<16x64xbf16>, vector<64x256xbf16>, vector<16x256xf32> -> vector<16x256xf32>
    %c0_18 = arith.constant 0 : index
    %c0_19 = arith.constant 0 : index
    %24 = vector.load %arg6[%c0_18, %c0_19] : memref<16x1xf32, #tpu.memory_space<vmem>>, vector<16x1xf32>
    %25 = vector.broadcast %24 : vector<16x1xf32> to vector<16x256xf32>
    %26 = arith.addf %23, %25 : vector<16x256xf32>
    %cst_20 = arith.constant 0.000000e+00 : f32
    %27 = vector.broadcast %cst_20 : f32 to vector<16x256xf32>
    %28 = arith.cmpf oge, %26, %27 : vector<16x256xf32>
    %cst_21 = arith.constant 2.500000e-01 : f32
    %29 = vector.broadcast %cst_21 : f32 to vector<16x256xf32>
    %30 = arith.mulf %29, %26 : vector<16x256xf32>
    %31 = arith.select %28, %26, %30 : vector<16x256xi1>, vector<16x256xf32>
    %cst_22 = arith.constant 0.000000e+00 : f32
    %32 = vector.shape_cast %2 : vector<1x256xi1> to vector<1x256xi1>
    %33 = vector.broadcast %32 : vector<1x256xi1> to vector<16x256xi1>
    %34 = vector.broadcast %cst_22 : f32 to vector<16x256xf32>
    %35 = arith.select %33, %31, %34 : vector<16x256xi1>, vector<16x256xf32>
    %36 = arith.truncf %35 : vector<16x256xf32> to vector<16x256xbf16>
    %c0_23 = arith.constant 0 : index
    %c128_24 = arith.constant 128 : index
    %37 = vector.load %arg15[%c0_23, %c128_24] : memref<64x512xbf16, #tpu.memory_space<vmem>>, vector<16x256xbf16>
    tpu.vector_store %arg15[%c0_23, %c128_24], %36 {strides = array<i32>} : memref<64x512xbf16, #tpu.memory_space<vmem>>, vector<16x256xbf16>,
    %c0_25 = arith.constant 0 : index
    %c111 = arith.constant 111 : index
    %38 = vector.load %arg15[%c0_25, %c111] : memref<64x512xbf16, #tpu.memory_space<vmem>>, vector<16x256xbf16>
    %c0_26 = arith.constant 0 : index
    %c112 = arith.constant 112 : index
    %39 = vector.load %arg15[%c0_26, %c112] : memref<64x512xbf16, #tpu.memory_space<vmem>>, vector<16x256xbf16>
    %c0_27 = arith.constant 0 : index
    %c113 = arith.constant 113 : index
    %40 = vector.load %arg15[%c0_27, %c113] : memref<64x512xbf16, #tpu.memory_space<vmem>>, vector<16x256xbf16>
    %c0_28 = arith.constant 0 : index
    %c127 = arith.constant 127 : index
    %41 = vector.load %arg15[%c0_28, %c127] : memref<64x512xbf16, #tpu.memory_space<vmem>>, vector<16x256xbf16>
    %c0_29 = arith.constant 0 : index
    %c128_30 = arith.constant 128 : index
    %42 = vector.load %arg15[%c0_29, %c128_30] : memref<64x512xbf16, #tpu.memory_space<vmem>>, vector<16x256xbf16>
    %c0_31 = arith.constant 0 : index
    %c129 = arith.constant 129 : index
    %43 = vector.load %arg15[%c0_31, %c129] : memref<64x512xbf16, #tpu.memory_space<vmem>>, vector<16x256xbf16>
    %c0_32 = arith.constant 0 : index
    %c143 = arith.constant 143 : index
    %44 = vector.load %arg15[%c0_32, %c143] : memref<64x512xbf16, #tpu.memory_space<vmem>>, vector<16x256xbf16>
    %c0_33 = arith.constant 0 : index
    %c144 = arith.constant 144 : index
    %45 = vector.load %arg15[%c0_33, %c144] : memref<64x512xbf16, #tpu.memory_space<vmem>>, vector<16x256xbf16>
    %c0_34 = arith.constant 0 : index
    %c145 = arith.constant 145 : index
    %46 = vector.load %arg15[%c0_34, %c145] : memref<64x512xbf16, #tpu.memory_space<vmem>>, vector<16x256xbf16>
    %47 = tpu.concatenate %38, %39, %40, %41, %42, %43, %44, %45, %46 in 0 : vector<16x256xbf16>, vector<16x256xbf16>, vector<16x256xbf16>, vector<16x256xbf16>, vector<16x256xbf16>, vector<16x256xbf16>, vector<16x256xbf16>, vector<16x256xbf16>, vector<16x256xbf16> -> vector<144x256xbf16>
    %c0_35 = arith.constant 0 : index
    %c0_36 = arith.constant 0 : index
    %c0_37 = arith.constant 0 : index
    %48 = vector.load %arg7[%c0_35, %c0_36, %c0_37] : memref<4x16x144xbf16, #tpu.memory_space<vmem>>, vector<1x16x144xbf16>
    %49 = vector.shape_cast %48 : vector<1x16x144xbf16> to vector<16x144xbf16>
    %cst_38 = arith.constant dense<0.000000e+00> : vector<16x256xf32>
    %50 = tpu.matmul %49, %47, %cst_38 {dimension_numbers = #tpu.dot_dimension_numbers<[1], [0], [0], [1], [0, 0, 1, 1], [], []>} : vector<16x144xbf16>, vector<144x256xbf16>, vector<16x256xf32> -> vector<16x256xf32>
    %c0_39 = arith.constant 0 : index
    %c0_40 = arith.constant 0 : index
    %c0_41 = arith.constant 0 : index
    %51 = vector.load %arg8[%c0_39, %c0_40, %c0_41] : memref<4x16x1xf32, #tpu.memory_space<vmem>>, vector<1x16x1xf32>
    %52 = vector.shape_cast %51 : vector<1x16x1xf32> to vector<16x1xf32>
    %53 = vector.broadcast %52 : vector<16x1xf32> to vector<16x256xf32>
    %54 = arith.addf %50, %53 : vector<16x256xf32>
    %cst_42 = arith.constant 0.000000e+00 : f32
    %55 = vector.broadcast %cst_42 : f32 to vector<16x256xf32>
    %56 = arith.cmpf oge, %54, %55 : vector<16x256xf32>
    %cst_43 = arith.constant 2.500000e-01 : f32
    %57 = vector.broadcast %cst_43 : f32 to vector<16x256xf32>
    %58 = arith.mulf %57, %54 : vector<16x256xf32>
    %59 = arith.select %56, %54, %58 : vector<16x256xi1>, vector<16x256xf32>
    %cst_44 = arith.constant 0.000000e+00 : f32
    %60 = vector.shape_cast %2 : vector<1x256xi1> to vector<1x256xi1>
    %61 = vector.broadcast %60 : vector<1x256xi1> to vector<16x256xi1>
    %62 = vector.broadcast %cst_44 : f32 to vector<16x256xf32>
    %63 = arith.select %61, %59, %62 : vector<16x256xi1>, vector<16x256xf32>
    %64 = arith.truncf %63 : vector<16x256xf32> to vector<16x256xbf16>
    %c0_45 = arith.constant 0 : index
    %c128_46 = arith.constant 128 : index
    %65 = vector.load %arg14[%c0_45, %c128_46] : memref<64x512xbf16, #tpu.memory_space<vmem>>, vector<16x256xbf16>
    tpu.vector_store %arg14[%c0_45, %c128_46], %64 {strides = array<i32>} : memref<64x512xbf16, #tpu.memory_space<vmem>>, vector<16x256xbf16>,
    %c0_47 = arith.constant 0 : index
    %c111_48 = arith.constant 111 : index
    %66 = vector.load %arg14[%c0_47, %c111_48] : memref<64x512xbf16, #tpu.memory_space<vmem>>, vector<16x256xbf16>
    %c0_49 = arith.constant 0 : index
    %c112_50 = arith.constant 112 : index
    %67 = vector.load %arg14[%c0_49, %c112_50] : memref<64x512xbf16, #tpu.memory_space<vmem>>, vector<16x256xbf16>
    %c0_51 = arith.constant 0 : index
    %c113_52 = arith.constant 113 : index
    %68 = vector.load %arg14[%c0_51, %c113_52] : memref<64x512xbf16, #tpu.memory_space<vmem>>, vector<16x256xbf16>
    %c0_53 = arith.constant 0 : index
    %c127_54 = arith.constant 127 : index
    %69 = vector.load %arg14[%c0_53, %c127_54] : memref<64x512xbf16, #tpu.memory_space<vmem>>, vector<16x256xbf16>
    %c0_55 = arith.constant 0 : index
    %c128_56 = arith.constant 128 : index
    %70 = vector.load %arg14[%c0_55, %c128_56] : memref<64x512xbf16, #tpu.memory_space<vmem>>, vector<16x256xbf16>
    %c0_57 = arith.constant 0 : index
    %c129_58 = arith.constant 129 : index
    %71 = vector.load %arg14[%c0_57, %c129_58] : memref<64x512xbf16, #tpu.memory_space<vmem>>, vector<16x256xbf16>
    %c0_59 = arith.constant 0 : index
    %c143_60 = arith.constant 143 : index
    %72 = vector.load %arg14[%c0_59, %c143_60] : memref<64x512xbf16, #tpu.memory_space<vmem>>, vector<16x256xbf16>
    %c0_61 = arith.constant 0 : index
    %c144_62 = arith.constant 144 : index
    %73 = vector.load %arg14[%c0_61, %c144_62] : memref<64x512xbf16, #tpu.memory_space<vmem>>, vector<16x256xbf16>
    %c0_63 = arith.constant 0 : index
    %c145_64 = arith.constant 145 : index
    %74 = vector.load %arg14[%c0_63, %c145_64] : memref<64x512xbf16, #tpu.memory_space<vmem>>, vector<16x256xbf16>
    %75 = tpu.concatenate %66, %67, %68, %69, %70, %71, %72, %73, %74 in 0 : vector<16x256xbf16>, vector<16x256xbf16>, vector<16x256xbf16>, vector<16x256xbf16>, vector<16x256xbf16>, vector<16x256xbf16>, vector<16x256xbf16>, vector<16x256xbf16>, vector<16x256xbf16> -> vector<144x256xbf16>
    %c1 = arith.constant 1 : index
    %c0_65 = arith.constant 0 : index
    %c0_66 = arith.constant 0 : index
    %76 = vector.load %arg7[%c1, %c0_65, %c0_66] : memref<4x16x144xbf16, #tpu.memory_space<vmem>>, vector<1x16x144xbf16>
    %77 = vector.shape_cast %76 : vector<1x16x144xbf16> to vector<16x144xbf16>
    %cst_67 = arith.constant dense<0.000000e+00> : vector<16x256xf32>
    %78 = tpu.matmul %77, %75, %cst_67 {dimension_numbers = #tpu.dot_dimension_numbers<[1], [0], [0], [1], [0, 0, 1, 1], [], []>} : vector<16x144xbf16>, vector<144x256xbf16>, vector<16x256xf32> -> vector<16x256xf32>
    %c1_68 = arith.constant 1 : index
    %c0_69 = arith.constant 0 : index
    %c0_70 = arith.constant 0 : index
    %79 = vector.load %arg8[%c1_68, %c0_69, %c0_70] : memref<4x16x1xf32, #tpu.memory_space<vmem>>, vector<1x16x1xf32>
    %80 = vector.shape_cast %79 : vector<1x16x1xf32> to vector<16x1xf32>
    %81 = vector.broadcast %80 : vector<16x1xf32> to vector<16x256xf32>
    %82 = arith.addf %78, %81 : vector<16x256xf32>
    %cst_71 = arith.constant 0.000000e+00 : f32
    %83 = vector.broadcast %cst_71 : f32 to vector<16x256xf32>
    %84 = arith.cmpf oge, %82, %83 : vector<16x256xf32>
    %cst_72 = arith.constant 2.500000e-01 : f32
    %85 = vector.broadcast %cst_72 : f32 to vector<16x256xf32>
    %86 = arith.mulf %85, %82 : vector<16x256xf32>
    %87 = arith.select %84, %82, %86 : vector<16x256xi1>, vector<16x256xf32>
    %cst_73 = arith.constant 0.000000e+00 : f32
    %88 = vector.shape_cast %2 : vector<1x256xi1> to vector<1x256xi1>
    %89 = vector.broadcast %88 : vector<1x256xi1> to vector<16x256xi1>
    %90 = vector.broadcast %cst_73 : f32 to vector<16x256xf32>
    %91 = arith.select %89, %87, %90 : vector<16x256xi1>, vector<16x256xf32>
    %92 = arith.truncf %91 : vector<16x256xf32> to vector<16x256xbf16>
    %c0_74 = arith.constant 0 : index
    %c128_75 = arith.constant 128 : index
    %93 = vector.load %arg15[%c0_74, %c128_75] : memref<64x512xbf16, #tpu.memory_space<vmem>>, vector<16x256xbf16>
    tpu.vector_store %arg15[%c0_74, %c128_75], %92 {strides = array<i32>} : memref<64x512xbf16, #tpu.memory_space<vmem>>, vector<16x256xbf16>,
    %c0_76 = arith.constant 0 : index
    %c111_77 = arith.constant 111 : index
    %94 = vector.load %arg15[%c0_76, %c111_77] : memref<64x512xbf16, #tpu.memory_space<vmem>>, vector<16x256xbf16>
    %c0_78 = arith.constant 0 : index
    %c112_79 = arith.constant 112 : index
    %95 = vector.load %arg15[%c0_78, %c112_79] : memref<64x512xbf16, #tpu.memory_space<vmem>>, vector<16x256xbf16>
    %c0_80 = arith.constant 0 : index
    %c113_81 = arith.constant 113 : index
    %96 = vector.load %arg15[%c0_80, %c113_81] : memref<64x512xbf16, #tpu.memory_space<vmem>>, vector<16x256xbf16>
    %c0_82 = arith.constant 0 : index
    %c127_83 = arith.constant 127 : index
    %97 = vector.load %arg15[%c0_82, %c127_83] : memref<64x512xbf16, #tpu.memory_space<vmem>>, vector<16x256xbf16>
    %c0_84 = arith.constant 0 : index
    %c128_85 = arith.constant 128 : index
    %98 = vector.load %arg15[%c0_84, %c128_85] : memref<64x512xbf16, #tpu.memory_space<vmem>>, vector<16x256xbf16>
    %c0_86 = arith.constant 0 : index
    %c129_87 = arith.constant 129 : index
    %99 = vector.load %arg15[%c0_86, %c129_87] : memref<64x512xbf16, #tpu.memory_space<vmem>>, vector<16x256xbf16>
    %c0_88 = arith.constant 0 : index
    %c143_89 = arith.constant 143 : index
    %100 = vector.load %arg15[%c0_88, %c143_89] : memref<64x512xbf16, #tpu.memory_space<vmem>>, vector<16x256xbf16>
    %c0_90 = arith.constant 0 : index
    %c144_91 = arith.constant 144 : index
    %101 = vector.load %arg15[%c0_90, %c144_91] : memref<64x512xbf16, #tpu.memory_space<vmem>>, vector<16x256xbf16>
    %c0_92 = arith.constant 0 : index
    %c145_93 = arith.constant 145 : index
    %102 = vector.load %arg15[%c0_92, %c145_93] : memref<64x512xbf16, #tpu.memory_space<vmem>>, vector<16x256xbf16>
    %103 = tpu.concatenate %94, %95, %96, %97, %98, %99, %100, %101, %102 in 0 : vector<16x256xbf16>, vector<16x256xbf16>, vector<16x256xbf16>, vector<16x256xbf16>, vector<16x256xbf16>, vector<16x256xbf16>, vector<16x256xbf16>, vector<16x256xbf16>, vector<16x256xbf16> -> vector<144x256xbf16>
    %c2 = arith.constant 2 : index
    %c0_94 = arith.constant 0 : index
    %c0_95 = arith.constant 0 : index
    %104 = vector.load %arg7[%c2, %c0_94, %c0_95] : memref<4x16x144xbf16, #tpu.memory_space<vmem>>, vector<1x16x144xbf16>
    %105 = vector.shape_cast %104 : vector<1x16x144xbf16> to vector<16x144xbf16>
    %cst_96 = arith.constant dense<0.000000e+00> : vector<16x256xf32>
    %106 = tpu.matmul %105, %103, %cst_96 {dimension_numbers = #tpu.dot_dimension_numbers<[1], [0], [0], [1], [0, 0, 1, 1], [], []>} : vector<16x144xbf16>, vector<144x256xbf16>, vector<16x256xf32> -> vector<16x256xf32>
    %c2_97 = arith.constant 2 : index
    %c0_98 = arith.constant 0 : index
    %c0_99 = arith.constant 0 : index
    %107 = vector.load %arg8[%c2_97, %c0_98, %c0_99] : memref<4x16x1xf32, #tpu.memory_space<vmem>>, vector<1x16x1xf32>
    %108 = vector.shape_cast %107 : vector<1x16x1xf32> to vector<16x1xf32>
    %109 = vector.broadcast %108 : vector<16x1xf32> to vector<16x256xf32>
    %110 = arith.addf %106, %109 : vector<16x256xf32>
    %cst_100 = arith.constant 0.000000e+00 : f32
    %111 = vector.broadcast %cst_100 : f32 to vector<16x256xf32>
    %112 = arith.cmpf oge, %110, %111 : vector<16x256xf32>
    %cst_101 = arith.constant 2.500000e-01 : f32
    %113 = vector.broadcast %cst_101 : f32 to vector<16x256xf32>
    %114 = arith.mulf %113, %110 : vector<16x256xf32>
    %115 = arith.select %112, %110, %114 : vector<16x256xi1>, vector<16x256xf32>
    %cst_102 = arith.constant 0.000000e+00 : f32
    %116 = vector.shape_cast %2 : vector<1x256xi1> to vector<1x256xi1>
    %117 = vector.broadcast %116 : vector<1x256xi1> to vector<16x256xi1>
    %118 = vector.broadcast %cst_102 : f32 to vector<16x256xf32>
    %119 = arith.select %117, %115, %118 : vector<16x256xi1>, vector<16x256xf32>
    %120 = arith.truncf %119 : vector<16x256xf32> to vector<16x256xbf16>
    %c0_103 = arith.constant 0 : index
    %c128_104 = arith.constant 128 : index
    %121 = vector.load %arg14[%c0_103, %c128_104] : memref<64x512xbf16, #tpu.memory_space<vmem>>, vector<16x256xbf16>
    tpu.vector_store %arg14[%c0_103, %c128_104], %120 {strides = array<i32>} : memref<64x512xbf16, #tpu.memory_space<vmem>>, vector<16x256xbf16>,
    %c0_105 = arith.constant 0 : index
    %c111_106 = arith.constant 111 : index
    %122 = vector.load %arg14[%c0_105, %c111_106] : memref<64x512xbf16, #tpu.memory_space<vmem>>, vector<16x256xbf16>
    %c0_107 = arith.constant 0 : index
    %c112_108 = arith.constant 112 : index
    %123 = vector.load %arg14[%c0_107, %c112_108] : memref<64x512xbf16, #tpu.memory_space<vmem>>, vector<16x256xbf16>
    %c0_109 = arith.constant 0 : index
    %c113_110 = arith.constant 113 : index
    %124 = vector.load %arg14[%c0_109, %c113_110] : memref<64x512xbf16, #tpu.memory_space<vmem>>, vector<16x256xbf16>
    %c0_111 = arith.constant 0 : index
    %c127_112 = arith.constant 127 : index
    %125 = vector.load %arg14[%c0_111, %c127_112] : memref<64x512xbf16, #tpu.memory_space<vmem>>, vector<16x256xbf16>
    %c0_113 = arith.constant 0 : index
    %c128_114 = arith.constant 128 : index
    %126 = vector.load %arg14[%c0_113, %c128_114] : memref<64x512xbf16, #tpu.memory_space<vmem>>, vector<16x256xbf16>
    %c0_115 = arith.constant 0 : index
    %c129_116 = arith.constant 129 : index
    %127 = vector.load %arg14[%c0_115, %c129_116] : memref<64x512xbf16, #tpu.memory_space<vmem>>, vector<16x256xbf16>
    %c0_117 = arith.constant 0 : index
    %c143_118 = arith.constant 143 : index
    %128 = vector.load %arg14[%c0_117, %c143_118] : memref<64x512xbf16, #tpu.memory_space<vmem>>, vector<16x256xbf16>
    %c0_119 = arith.constant 0 : index
    %c144_120 = arith.constant 144 : index
    %129 = vector.load %arg14[%c0_119, %c144_120] : memref<64x512xbf16, #tpu.memory_space<vmem>>, vector<16x256xbf16>
    %c0_121 = arith.constant 0 : index
    %c145_122 = arith.constant 145 : index
    %130 = vector.load %arg14[%c0_121, %c145_122] : memref<64x512xbf16, #tpu.memory_space<vmem>>, vector<16x256xbf16>
    %131 = tpu.concatenate %122, %123, %124, %125, %126, %127, %128, %129, %130 in 0 : vector<16x256xbf16>, vector<16x256xbf16>, vector<16x256xbf16>, vector<16x256xbf16>, vector<16x256xbf16>, vector<16x256xbf16>, vector<16x256xbf16>, vector<16x256xbf16>, vector<16x256xbf16> -> vector<144x256xbf16>
    %c3 = arith.constant 3 : index
    %c0_123 = arith.constant 0 : index
    %c0_124 = arith.constant 0 : index
    %132 = vector.load %arg7[%c3, %c0_123, %c0_124] : memref<4x16x144xbf16, #tpu.memory_space<vmem>>, vector<1x16x144xbf16>
    %133 = vector.shape_cast %132 : vector<1x16x144xbf16> to vector<16x144xbf16>
    %cst_125 = arith.constant dense<0.000000e+00> : vector<16x256xf32>
    %134 = tpu.matmul %133, %131, %cst_125 {dimension_numbers = #tpu.dot_dimension_numbers<[1], [0], [0], [1], [0, 0, 1, 1], [], []>} : vector<16x144xbf16>, vector<144x256xbf16>, vector<16x256xf32> -> vector<16x256xf32>
    %c3_126 = arith.constant 3 : index
    %c0_127 = arith.constant 0 : index
    %c0_128 = arith.constant 0 : index
    %135 = vector.load %arg8[%c3_126, %c0_127, %c0_128] : memref<4x16x1xf32, #tpu.memory_space<vmem>>, vector<1x16x1xf32>
    %136 = vector.shape_cast %135 : vector<1x16x1xf32> to vector<16x1xf32>
    %137 = vector.broadcast %136 : vector<16x1xf32> to vector<16x256xf32>
    %138 = arith.addf %134, %137 : vector<16x256xf32>
    %cst_129 = arith.constant 0.000000e+00 : f32
    %139 = vector.broadcast %cst_129 : f32 to vector<16x256xf32>
    %140 = arith.cmpf oge, %138, %139 : vector<16x256xf32>
    %cst_130 = arith.constant 2.500000e-01 : f32
    %141 = vector.broadcast %cst_130 : f32 to vector<16x256xf32>
    %142 = arith.mulf %141, %138 : vector<16x256xf32>
    %143 = arith.select %140, %138, %142 : vector<16x256xi1>, vector<16x256xf32>
    %cst_131 = arith.constant 0.000000e+00 : f32
    %144 = vector.shape_cast %2 : vector<1x256xi1> to vector<1x256xi1>
    %145 = vector.broadcast %144 : vector<1x256xi1> to vector<16x256xi1>
    %146 = vector.broadcast %cst_131 : f32 to vector<16x256xf32>
    %147 = arith.select %145, %143, %146 : vector<16x256xi1>, vector<16x256xf32>
    %148 = arith.truncf %147 : vector<16x256xf32> to vector<16x256xbf16>
    %c0_132 = arith.constant 0 : index
    %c128_133 = arith.constant 128 : index
    %149 = vector.load %arg15[%c0_132, %c128_133] : memref<64x512xbf16, #tpu.memory_space<vmem>>, vector<16x256xbf16>
    tpu.vector_store %arg15[%c0_132, %c128_133], %148 {strides = array<i32>} : memref<64x512xbf16, #tpu.memory_space<vmem>>, vector<16x256xbf16>,
    %c0_134 = arith.constant 0 : index
    %c128_135 = arith.constant 128 : index
    %150 = vector.load %arg15[%c0_134, %c128_135] : memref<64x512xbf16, #tpu.memory_space<vmem>>, vector<16x256xbf16>
    %c0_136 = arith.constant 0 : index
    %c0_137 = arith.constant 0 : index
    %151 = vector.load %arg9[%c0_136, %c0_137] : memref<64x16xbf16, #tpu.memory_space<vmem>>, vector<64x16xbf16>
    %cst_138 = arith.constant dense<0.000000e+00> : vector<64x256xf32>
    %152 = tpu.matmul %151, %150, %cst_138 {dimension_numbers = #tpu.dot_dimension_numbers<[1], [0], [0], [1], [0, 0, 1, 1], [], []>} : vector<64x16xbf16>, vector<16x256xbf16>, vector<64x256xf32> -> vector<64x256xf32>
    %c0_139 = arith.constant 0 : index
    %c0_140 = arith.constant 0 : index
    %153 = vector.load %arg10[%c0_139, %c0_140] : memref<64x1xf32, #tpu.memory_space<vmem>>, vector<64x1xf32>
    %154 = vector.broadcast %153 : vector<64x1xf32> to vector<64x256xf32>
    %155 = arith.addf %152, %154 : vector<64x256xf32>
    %cst_141 = arith.constant 0.000000e+00 : f32
    %156 = vector.broadcast %cst_141 : f32 to vector<64x256xf32>
    %157 = arith.cmpf oge, %155, %156 : vector<64x256xf32>
    %cst_142 = arith.constant 2.500000e-01 : f32
    %158 = vector.broadcast %cst_142 : f32 to vector<64x256xf32>
    %159 = arith.mulf %158, %155 : vector<64x256xf32>
    %160 = arith.select %157, %155, %159 : vector<64x256xi1>, vector<64x256xf32>
    %cst_143 = arith.constant 0.000000e+00 : f32
    %161 = vector.shape_cast %2 : vector<1x256xi1> to vector<1x256xi1>
    %162 = vector.broadcast %161 : vector<1x256xi1> to vector<64x256xi1>
    %163 = vector.broadcast %cst_143 : f32 to vector<64x256xf32>
    %164 = arith.select %162, %160, %163 : vector<64x256xi1>, vector<64x256xf32>
    %165 = arith.truncf %164 : vector<64x256xf32> to vector<64x256xbf16>
    %c0_144 = arith.constant 0 : index
    %c128_145 = arith.constant 128 : index
    %166 = vector.load %arg14[%c0_144, %c128_145] : memref<64x512xbf16, #tpu.memory_space<vmem>>, vector<64x256xbf16>
    tpu.vector_store %arg14[%c0_144, %c128_145], %165 {strides = array<i32>} : memref<64x512xbf16, #tpu.memory_space<vmem>>, vector<64x256xbf16>,
    %cst_146 = arith.constant 0.000000e+00 : f32
    %167 = vector.broadcast %cst_146 : f32 to vector<16x256xf32>
    %c0_147 = arith.constant 0 : index
    %c111_148 = arith.constant 111 : index
    %168 = vector.load %arg14[%c0_147, %c111_148] : memref<64x512xbf16, #tpu.memory_space<vmem>>, vector<64x256xbf16>
    %c0_149 = arith.constant 0 : index
    %c0_150 = arith.constant 0 : index
    %c0_151 = arith.constant 0 : index
    %169 = vector.load %arg11[%c0_149, %c0_150, %c0_151] : memref<9x16x64xbf16, #tpu.memory_space<vmem>>, vector<1x16x64xbf16>
    %170 = vector.shape_cast %169 : vector<1x16x64xbf16> to vector<16x64xbf16>
    %cst_152 = arith.constant dense<0.000000e+00> : vector<16x256xf32>
    %171 = tpu.matmul %170, %168, %cst_152 {dimension_numbers = #tpu.dot_dimension_numbers<[1], [0], [0], [1], [0, 0, 1, 1], [], []>} : vector<16x64xbf16>, vector<64x256xbf16>, vector<16x256xf32> -> vector<16x256xf32>
    %172 = arith.addf %167, %171 : vector<16x256xf32>
    %c0_153 = arith.constant 0 : index
    %c112_154 = arith.constant 112 : index
    %173 = vector.load %arg14[%c0_153, %c112_154] : memref<64x512xbf16, #tpu.memory_space<vmem>>, vector<64x256xbf16>
    %c1_155 = arith.constant 1 : index
    %c0_156 = arith.constant 0 : index
    %c0_157 = arith.constant 0 : index
    %174 = vector.load %arg11[%c1_155, %c0_156, %c0_157] : memref<9x16x64xbf16, #tpu.memory_space<vmem>>, vector<1x16x64xbf16>
    %175 = vector.shape_cast %174 : vector<1x16x64xbf16> to vector<16x64xbf16>
    %cst_158 = arith.constant dense<0.000000e+00> : vector<16x256xf32>
    %176 = tpu.matmul %175, %173, %cst_158 {dimension_numbers = #tpu.dot_dimension_numbers<[1], [0], [0], [1], [0, 0, 1, 1], [], []>} : vector<16x64xbf16>, vector<64x256xbf16>, vector<16x256xf32> -> vector<16x256xf32>
    %177 = arith.addf %172, %176 : vector<16x256xf32>
    %c0_159 = arith.constant 0 : index
    %c113_160 = arith.constant 113 : index
    %178 = vector.load %arg14[%c0_159, %c113_160] : memref<64x512xbf16, #tpu.memory_space<vmem>>, vector<64x256xbf16>
    %c2_161 = arith.constant 2 : index
    %c0_162 = arith.constant 0 : index
    %c0_163 = arith.constant 0 : index
    %179 = vector.load %arg11[%c2_161, %c0_162, %c0_163] : memref<9x16x64xbf16, #tpu.memory_space<vmem>>, vector<1x16x64xbf16>
    %180 = vector.shape_cast %179 : vector<1x16x64xbf16> to vector<16x64xbf16>
    %cst_164 = arith.constant dense<0.000000e+00> : vector<16x256xf32>
    %181 = tpu.matmul %180, %178, %cst_164 {dimension_numbers = #tpu.dot_dimension_numbers<[1], [0], [0], [1], [0, 0, 1, 1], [], []>} : vector<16x64xbf16>, vector<64x256xbf16>, vector<16x256xf32> -> vector<16x256xf32>
    %182 = arith.addf %177, %181 : vector<16x256xf32>
    %c0_165 = arith.constant 0 : index
    %c127_166 = arith.constant 127 : index
    %183 = vector.load %arg14[%c0_165, %c127_166] : memref<64x512xbf16, #tpu.memory_space<vmem>>, vector<64x256xbf16>
    %c3_167 = arith.constant 3 : index
    %c0_168 = arith.constant 0 : index
    %c0_169 = arith.constant 0 : index
    %184 = vector.load %arg11[%c3_167, %c0_168, %c0_169] : memref<9x16x64xbf16, #tpu.memory_space<vmem>>, vector<1x16x64xbf16>
    %185 = vector.shape_cast %184 : vector<1x16x64xbf16> to vector<16x64xbf16>
    %cst_170 = arith.constant dense<0.000000e+00> : vector<16x256xf32>
    %186 = tpu.matmul %185, %183, %cst_170 {dimension_numbers = #tpu.dot_dimension_numbers<[1], [0], [0], [1], [0, 0, 1, 1], [], []>} : vector<16x64xbf16>, vector<64x256xbf16>, vector<16x256xf32> -> vector<16x256xf32>
    %187 = arith.addf %182, %186 : vector<16x256xf32>
    %c0_171 = arith.constant 0 : index
    %c128_172 = arith.constant 128 : index
    %188 = vector.load %arg14[%c0_171, %c128_172] : memref<64x512xbf16, #tpu.memory_space<vmem>>, vector<64x256xbf16>
    %c4 = arith.constant 4 : index
    %c0_173 = arith.constant 0 : index
    %c0_174 = arith.constant 0 : index
    %189 = vector.load %arg11[%c4, %c0_173, %c0_174] : memref<9x16x64xbf16, #tpu.memory_space<vmem>>, vector<1x16x64xbf16>
    %190 = vector.shape_cast %189 : vector<1x16x64xbf16> to vector<16x64xbf16>
    %cst_175 = arith.constant dense<0.000000e+00> : vector<16x256xf32>
    %191 = tpu.matmul %190, %188, %cst_175 {dimension_numbers = #tpu.dot_dimension_numbers<[1], [0], [0], [1], [0, 0, 1, 1], [], []>} : vector<16x64xbf16>, vector<64x256xbf16>, vector<16x256xf32> -> vector<16x256xf32>
    %192 = arith.addf %187, %191 : vector<16x256xf32>
    %c0_176 = arith.constant 0 : index
    %c129_177 = arith.constant 129 : index
    %193 = vector.load %arg14[%c0_176, %c129_177] : memref<64x512xbf16, #tpu.memory_space<vmem>>, vector<64x256xbf16>
    %c5 = arith.constant 5 : index
    %c0_178 = arith.constant 0 : index
    %c0_179 = arith.constant 0 : index
    %194 = vector.load %arg11[%c5, %c0_178, %c0_179] : memref<9x16x64xbf16, #tpu.memory_space<vmem>>, vector<1x16x64xbf16>
    %195 = vector.shape_cast %194 : vector<1x16x64xbf16> to vector<16x64xbf16>
    %cst_180 = arith.constant dense<0.000000e+00> : vector<16x256xf32>
    %196 = tpu.matmul %195, %193, %cst_180 {dimension_numbers = #tpu.dot_dimension_numbers<[1], [0], [0], [1], [0, 0, 1, 1], [], []>} : vector<16x64xbf16>, vector<64x256xbf16>, vector<16x256xf32> -> vector<16x256xf32>
    %197 = arith.addf %192, %196 : vector<16x256xf32>
    %c0_181 = arith.constant 0 : index
    %c143_182 = arith.constant 143 : index
    %198 = vector.load %arg14[%c0_181, %c143_182] : memref<64x512xbf16, #tpu.memory_space<vmem>>, vector<64x256xbf16>
    %c6 = arith.constant 6 : index
    %c0_183 = arith.constant 0 : index
    %c0_184 = arith.constant 0 : index
    %199 = vector.load %arg11[%c6, %c0_183, %c0_184] : memref<9x16x64xbf16, #tpu.memory_space<vmem>>, vector<1x16x64xbf16>
    %200 = vector.shape_cast %199 : vector<1x16x64xbf16> to vector<16x64xbf16>
    %cst_185 = arith.constant dense<0.000000e+00> : vector<16x256xf32>
    %201 = tpu.matmul %200, %198, %cst_185 {dimension_numbers = #tpu.dot_dimension_numbers<[1], [0], [0], [1], [0, 0, 1, 1], [], []>} : vector<16x64xbf16>, vector<64x256xbf16>, vector<16x256xf32> -> vector<16x256xf32>
    %202 = arith.addf %197, %201 : vector<16x256xf32>
    %c0_186 = arith.constant 0 : index
    %c144_187 = arith.constant 144 : index
    %203 = vector.load %arg14[%c0_186, %c144_187] : memref<64x512xbf16, #tpu.memory_space<vmem>>, vector<64x256xbf16>
    %c7 = arith.constant 7 : index
    %c0_188 = arith.constant 0 : index
    %c0_189 = arith.constant 0 : index
    %204 = vector.load %arg11[%c7, %c0_188, %c0_189] : memref<9x16x64xbf16, #tpu.memory_space<vmem>>, vector<1x16x64xbf16>
    %205 = vector.shape_cast %204 : vector<1x16x64xbf16> to vector<16x64xbf16>
    %cst_190 = arith.constant dense<0.000000e+00> : vector<16x256xf32>
    %206 = tpu.matmul %205, %203, %cst_190 {dimension_numbers = #tpu.dot_dimension_numbers<[1], [0], [0], [1], [0, 0, 1, 1], [], []>} : vector<16x64xbf16>, vector<64x256xbf16>, vector<16x256xf32> -> vector<16x256xf32>
    %207 = arith.addf %202, %206 : vector<16x256xf32>
    %c0_191 = arith.constant 0 : index
    %c145_192 = arith.constant 145 : index
    %208 = vector.load %arg14[%c0_191, %c145_192] : memref<64x512xbf16, #tpu.memory_space<vmem>>, vector<64x256xbf16>
    %c8 = arith.constant 8 : index
    %c0_193 = arith.constant 0 : index
    %c0_194 = arith.constant 0 : index
    %209 = vector.load %arg11[%c8, %c0_193, %c0_194] : memref<9x16x64xbf16, #tpu.memory_space<vmem>>, vector<1x16x64xbf16>
    %210 = vector.shape_cast %209 : vector<1x16x64xbf16> to vector<16x64xbf16>
    %cst_195 = arith.constant dense<0.000000e+00> : vector<16x256xf32>
    %211 = tpu.matmul %210, %208, %cst_195 {dimension_numbers = #tpu.dot_dimension_numbers<[1], [0], [0], [1], [0, 0, 1, 1], [], []>} : vector<16x64xbf16>, vector<64x256xbf16>, vector<16x256xf32> -> vector<16x256xf32>
    %212 = arith.addf %207, %211 : vector<16x256xf32>
    %c0_196 = arith.constant 0 : index
    %c0_197 = arith.constant 0 : index
    %213 = vector.load %arg12[%c0_196, %c0_197] : memref<16x1xf32, #tpu.memory_space<vmem>>, vector<16x1xf32>
    %214 = vector.broadcast %213 : vector<16x1xf32> to vector<16x256xf32>
    %215 = arith.addf %212, %214 : vector<16x256xf32>
    %c0_198 = arith.constant 0 : index
    %c0_199 = arith.constant 0 : index
    %c0_200 = arith.constant 0 : index
    %216 = vector.load %arg13[%c0_198, %c0_199, %c0_200] : memref<1x16x256xf32, #tpu.memory_space<vmem>>, vector<1x16x256xf32>
    %217 = vector.shape_cast %216 : vector<1x16x256xf32> to vector<16x256xf32>
    %218 = vector.shape_cast %215 : vector<16x256xf32> to vector<1x16x256xf32>
    tpu.vector_store %arg13[%c0_198, %c0_199, %c0_200], %218 {strides = array<i32>} : memref<1x16x256xf32, #tpu.memory_space<vmem>>, vector<1x16x256xf32>,
    return
  }
  func.func @transform_0(%arg0: i32) -> (i32, i32, i32) {
    %c0_i32 = arith.constant 0 : i32
    %c0_i32_0 = arith.constant 0 : i32
    %c0_i32_1 = arith.constant 0 : i32
    return %arg0, %c0_i32, %c0_i32_0 : i32, i32, i32
  }
  func.func @transform_1(%arg0: i32) -> (i32, i32) {
    %c0_i32 = arith.constant 0 : i32
    %c0_i32_0 = arith.constant 0 : i32
    %c0_i32_1 = arith.constant 0 : i32
    return %c0_i32, %c0_i32_0 : i32, i32
  }
  func.func @transform_2(%arg0: i32) -> (i32, i32) {
    %c0_i32 = arith.constant 0 : i32
    %c0_i32_0 = arith.constant 0 : i32
    %c0_i32_1 = arith.constant 0 : i32
    return %c0_i32, %c0_i32_0 : i32, i32
  }
  func.func @transform_3(%arg0: i32) -> (i32, i32) {
    %c0_i32 = arith.constant 0 : i32
    %c0_i32_0 = arith.constant 0 : i32
    %c0_i32_1 = arith.constant 0 : i32
    return %c0_i32, %c0_i32_0 : i32, i32
  }
  func.func @transform_4(%arg0: i32) -> (i32, i32) {
    %c0_i32 = arith.constant 0 : i32
    %c0_i32_0 = arith.constant 0 : i32
    %c0_i32_1 = arith.constant 0 : i32
    return %c0_i32, %c0_i32_0 : i32, i32
  }
  func.func @transform_5(%arg0: i32) -> (i32, i32) {
    %c0_i32 = arith.constant 0 : i32
    %c0_i32_0 = arith.constant 0 : i32
    %c0_i32_1 = arith.constant 0 : i32
    return %c0_i32, %c0_i32_0 : i32, i32
  }
  func.func @transform_6(%arg0: i32) -> (i32, i32, i32) {
    %c0_i32 = arith.constant 0 : i32
    %c0_i32_0 = arith.constant 0 : i32
    %c0_i32_1 = arith.constant 0 : i32
    %c0_i32_2 = arith.constant 0 : i32
    return %c0_i32, %c0_i32_0, %c0_i32_1 : i32, i32, i32
  }
  func.func @transform_7(%arg0: i32) -> (i32, i32, i32) {
    %c0_i32 = arith.constant 0 : i32
    %c0_i32_0 = arith.constant 0 : i32
    %c0_i32_1 = arith.constant 0 : i32
    %c0_i32_2 = arith.constant 0 : i32
    return %c0_i32, %c0_i32_0, %c0_i32_1 : i32, i32, i32
  }
  func.func @transform_8(%arg0: i32) -> (i32, i32) {
    %c0_i32 = arith.constant 0 : i32
    %c0_i32_0 = arith.constant 0 : i32
    %c0_i32_1 = arith.constant 0 : i32
    return %c0_i32, %c0_i32_0 : i32, i32
  }
  func.func @transform_9(%arg0: i32) -> (i32, i32) {
    %c0_i32 = arith.constant 0 : i32
    %c0_i32_0 = arith.constant 0 : i32
    %c0_i32_1 = arith.constant 0 : i32
    return %c0_i32, %c0_i32_0 : i32, i32
  }
  func.func @transform_10(%arg0: i32) -> (i32, i32, i32) {
    %c0_i32 = arith.constant 0 : i32
    %c0_i32_0 = arith.constant 0 : i32
    %c0_i32_1 = arith.constant 0 : i32
    %c0_i32_2 = arith.constant 0 : i32
    return %c0_i32, %c0_i32_0, %c0_i32_1 : i32, i32, i32
  }
  func.func @transform_11(%arg0: i32) -> (i32, i32) {
    %c0_i32 = arith.constant 0 : i32
    %c0_i32_0 = arith.constant 0 : i32
    %c0_i32_1 = arith.constant 0 : i32
    return %c0_i32, %c0_i32_0 : i32, i32
  }
  func.func @transform_12(%arg0: i32) -> (i32, i32, i32) {
    %c0_i32 = arith.constant 0 : i32
    %c0_i32_0 = arith.constant 0 : i32
    %c0_i32_1 = arith.constant 0 : i32
    return %arg0, %c0_i32, %c0_i32_0 : i32, i32, i32
  }
}

</mosaic_0001>

<bundles_post_ra>
// kernel: tile.7
= control target key start
LH: loop header
LB: loop body
LE: loop exit
PB: predicated region body
PF: predicated region fallthrough
CT: control target
= control target key end

     0   :  { %s20_s0 = inlined_call_operand.<no memory space> [shape: f32[], index: 0, kind: input, shape index: {}]   ;;  %s21_s1 = inlined_call_operand.vmem [shape: f32[9], index: 1, kind: output, shape index: {}]  }
   0x1   :  { %v2_v0 = vstv %s20_s0 }
   0x2   :  { %3 = vst [vmem:[%s21_s1] sm:$0x1] %v2_v0 }

// kernel: net_forward.1
= control target key start
LH: loop header
LB: loop body
LE: loop exit
PB: predicated region body
PF: predicated region fallthrough
CT: control target
= control target key end

     0   :  { %s3337_s21 = smov 0   ;;  %s4480_s0 = inlined_call_operand.vmem [shape: f32[2,32,256], index: 0, kind: input, shape index: {}]   ;;  %s4481_s1 = inlined_call_operand.vmem [shape: f32[1,256], index: 1, kind: input, shape index: {}]   ;;  %s4482_s2 = inlined_call_operand.vmem [shape: f32[64,32], index: 2, kind: input, shape index: {}]   ;;  %s4483_s3 = inlined_call_operand.vmem [shape: f32[64,1], index: 3, kind: input, shape index: {}]   ;;  %s4484_s4 = inlined_call_operand.vmem [shape: bf16[16,64], index: 4, kind: input, shape index: {}]   ;;  %s4485_s5 = inlined_call_operand.vmem [shape: f32[16,1], index: 5, kind: input, shape index: {}]   ;;  %s4486_s6 = inlined_call_operand.vmem [shape: bf16[4,16,144], index: 6, kind: input, shape index: {}]   ;;  %s4487_s7 = inlined_call_operand.vmem [shape: f32[4,16,1], index: 7, kind: input, shape index: {}]   ;;  %s4488_s8 = inlined_call_operand.vmem [shape: bf16[64,16], index: 8, kind: input, shape index: {}]   ;;  %s4489_s9 = inlined_call_operand.vmem [shape: f32[64,1], index: 9, kind: input, shape index: {}]   ;;  %s4490_s10 = inlined_call_operand.vmem [shape: bf16[9,16,64], index: 10, kind: input, shape index: {}]   ;;  %s4491_s11 = inlined_call_operand.vmem [shape: f32[16,1], index: 11, kind: input, shape index: {}]   ;;  %s4492_s12 = inlined_call_operand.vmem [shape: f32[2,16,256], index: 12, kind: output, shape index: {}]  }
   0x1 LB: > { %s3015_s22 = sadd.s32 4294967295, %s3255_s21   ;;  %p3019_p0 = scmp.ge.s32.totalorder %s3255_s21, 1  ;;  %s3255_s21 = sphi %s3337_s21, %s22_s21  }
   0x2   : > { %p362_p1 = scmp.lt.s32.totalorder %s3255_s21, 3 }
   0x4   : > { %p363_p2 = pnand %p3019_p0, %p362_p1 }
   0x5   : > { %p404_p3 = scmp.lt.s32.totalorder (!%p363_p2), %s3015_s22, 1  ;;  %v3257_v0 = vmov (!%p363_p2), 0.0   ;;  %v3258_v1 = vmov (!%p363_p2), 0   ;;  %v433_v2 = vld [vmem:[%s4483_s3] sm:$0xff] (!%p363_p2)  ;;  %v435_v3 = vld [vmem:[%s4483_s3 + $0x10] sm:$0xff] (!%p363_p2)  ;;  %v434_v4 = vld [vmem:[%s4483_s3 + $0x8] sm:$0xff] (!%p363_p2)  ;;  %v668_v32 = vlaneseq (!%p363_p2) }
   0x6   : > { %366 = sbr.rel (%p363_p2) target bundleno = 3269 (0xcc5), region = 68  ;;  %570 = vmatprep.mubr.f32.mxu0 (!%p363_p2), %v3257_v0  ;;  %3167 = vset.pattern.permute.xlu0 (!%p363_p2), %v3258_v1  ;;  %v436_v5 = vld [vmem:[%s4483_s3 + $0x18] sm:$0xff] (!%p363_p2)  ;;  %v437_v17 = vld [vmem:[%s4483_s3 + $0x20] sm:$0xff] (!%p363_p2)  ;;  %v438_v18 = vld [vmem:[%s4483_s3 + $0x28] sm:$0xff] (!%p363_p2)  ;;  %vm481_vm0 = vcmask (!%p363_p2), 261120   ;;  %s3259_s17 = smov (!%p363_p2), 127  }
   0x7   : > { %3168 = vset.pattern.permute.xlu1 (!%p363_p2), %v3258_v1  ;;  %443 = vperm.xlu0 (!%p363_p2), %3167, %v433_v2   ;;  %v439_v20 = vld [vmem:[%s4483_s3 + $0x30] sm:$0xff] (!%p363_p2)  ;;  %v440_v21 = vld [vmem:[%s4483_s3 + $0x38] sm:$0xff] (!%p363_p2)  ;;  %v417_v22 = vld [vmem:[%s4482_s2] sm:$0xff] (!%p363_p2)  ;;  %v669_v34 = vshrl.u32 (!%p363_p2), %v668_v32, 7  ;;  %s3260_s18 = smov (!%p363_p2), 126   ;;  %s3261_s19 = smov (!%p363_p2), 112  }
   0x8   : > { %453 = vperm.xlu1 (!%p363_p2), %3168, %v435_v3   ;;  %v720_v23 = vld [vmem:[%s4485_s5] sm:$0xff] (!%p363_p2)  ;;  %v721_v24 = vld [vmem:[%s4485_s5 + $0x8] sm:$0xff] (!%p363_p2)  ;;  %v419_v26 = vld [vmem:[%s4482_s2 + $0x10] sm:$0xff] (!%p363_p2)  ;;  %s3262_s20 = smov (!%p363_p2), 111   ;;  %s3263_s23 = smov (!%p363_p2), 110  }
   0x9   : > { %v418_v25 = vld [vmem:[%s4482_s2 + $0x8] sm:$0xff] (!%p363_p2)  ;;  %v420_v27 = vld [vmem:[%s4482_s2 + $0x18] sm:$0xff] (!%p363_p2)  ;;  %v421_v28 = vld [vmem:[%s4482_s2 + $0x20] sm:$0xff] (!%p363_p2)  ;;  %v670_v36 = vsub.s32 (!%p363_p2), 0, %v669_v34  ;;  %v674_v37 = vsub.s32 (!%p363_p2), 1, %v669_v34  ;;  %s3264_s24 = smov (!%p363_p2), 96  }
   0xa   : > { %v422_v29 = vld [vmem:[%s4482_s2 + $0x28] sm:$0xff] (!%p363_p2)  ;;  %v423_v30 = vld [vmem:[%s4482_s2 + $0x30] sm:$0xff] (!%p363_p2)  ;;  %v424_v31 = vld [vmem:[%s4482_s2 + $0x38] sm:$0xff] (!%p363_p2)  ;;  %s3265_s25 = smov (!%p363_p2), 95   ;;  %s3266_s26 = smov (!%p363_p2), 94  }
   0xb   : > { %448 = vperm.xlu0 (!%p363_p2), %3167, %v434_v4   ;;  %v415_v33 = vld [vmem:[%s4481_s1] sm:$0x3] (!%p363_p2)  ;;  %s3269_s28 = smov (!%p363_p2), 15   ;;  %s3270_s29 = smov (!%p363_p2), 1  }
   0xc   : > { %458 = vperm.xlu1 (!%p363_p2), %3168, %v436_v5   ;;  %vm416_vm1 = vcmp.ne.f32.partialorder (!%p363_p2), %v415_v33, 0.0 }
   0xd   : > { %s4531_s22 = smov (!%p404_p3, %s3015_s22), 1  ;;  %v667_v38 = vsel %vm416_vm1, 1, %v3258_v1 }
   0xe   : > { %s3102_s27 = sshll.u32 %s4531_s22, 6  ;;  %v3428_v43 = vrot.slane %v667_v38, %v670_v36  ;;  %v3430_v45 = vrot.slane %v667_v38, %v674_v37 }
   0xf   : > { %s408_s30 = scalar_lea.vmem %s4480_s0, %s3102_s27  ;;  %463 = vperm.xlu0 %3167, %v437_v17   ;;  %s3267_s27 = smov 17  }
  0x10   : > { %v426_v6 = vld [vmem:[%s408_s30 + $0x8] sm:$0xff]  ;;  %v428_v7 = vld [vmem:[%s408_s30 + $0x18] sm:$0xff]  ;;  %v425_v8 = vld [vmem:[%s408_s30] sm:$0xff]  ;;  %468 = vperm.xlu1 %3168, %v438_v18   ;;  %vm676_vm4 = vcmp.eq.s32.totalorder %v3428_v43, 1  ;;  %vm677_vm6 = vcmp.eq.s32.totalorder %v3430_v45, 1 }
  0x11   : > { %v3104_v9 = vpack.c.bf16 %v428_v7, %v426_v6  ;;  %v427_v10 = vld [vmem:[%s408_s30 + $0x10] sm:$0xff]  ;;  %v430_v11 = vld [vmem:[%s408_s30 + $0x28] sm:$0xff]  ;;  %v432_v12 = vld [vmem:[%s408_s30 + $0x38] sm:$0xff] }
  0x12   : > { %v3106_v13 = vpack.c.bf16 %v427_v10, %v425_v8  ;;  %v3108_v14 = vpack.c.bf16 %v432_v12, %v430_v11  ;;  %v429_v15 = vld [vmem:[%s408_s30 + $0x20] sm:$0xff]  ;;  %v431_v16 = vld [vmem:[%s408_s30 + $0x30] sm:$0xff]  ;;  %vm3437_vm10 = vmpackc.low %vm677_vm6, %vm677_vm6 }
  0x13   : > { %3105 = vmatprep.subr.bf16.mxu0 %v3104_v9  ;;  %v3110_v19 = vpack.c.bf16 %v431_v16, %v429_v15  ;;  %473 = vperm.xlu0 %3167, %v439_v20   ;;  %vm3446_vm12 = vmpackc.low %vm676_vm4, %vm676_vm4  ;;  %v4164_v43 = vld [vmem:[#allocation2 + $0x38] sm:$0xff] }
  0x14   : > { %3107 = vmatpush1.bf16.msra.mxu0 %v3106_v13  ;;  %478 = vperm.xlu1 %3168, %v440_v21   ;;  %v4166_v45 = vld [vmem:[#allocation2 + $0x18] sm:$0xff] }
  0x15   : > { %3109 = vmatprep.subr.bf16.mxu0 %v3108_v14 }
  0x17   : > { %724 = vperm.xlu0 %3167, %v720_v23  }
  0x18   : > { %3111 = vmatpush1.bf16.msra.mxu0 %v3110_v19  ;;  %729 = vperm.xlu1 %3168, %v721_v24  }
  0x1b   : > { %3024 = vmatmul.mubr.msk.f32.vlgmr.msra.gmra.mrb[0].mxu0 %vm481_vm0, %v417_v22 }
  0x1c   : > { %576 = vmatprep.mubr.f32.mxu0 %v3257_v0 }
  0x1f   : > { %3025 = vmatmul.mubr.msk.f32.gmra.mrb[2].mxu0 %vm481_vm0, %v418_v25 }
  0x20   : > { %582 = vmatprep.mubr.f32.mxu0 %v3257_v0 }
  0x23   : > { %3026 = vmatmul.mubr.msk.f32.gmra.mrb[4].mxu0 %vm481_vm0, %v419_v26 }
  0x24   : > { %588 = vmatprep.mubr.f32.mxu0 %v3257_v0 }
  0x27   : > { %3027 = vmatmul.mubr.msk.f32.gmra.mrb[6].mxu0 %vm481_vm0, %v420_v27 }
  0x28   : > { %594 = vmatprep.mubr.f32.mxu0 %v3257_v0 }
  0x2b   : > { %3028 = vmatmul.mubr.msk.f32.gmra.mrb[8].mxu0 %vm481_vm0, %v421_v28 }
  0x2c   : > { %600 = vmatprep.mubr.f32.mxu0 %v3257_v0 }
  0x2f   : > { %3029 = vmatmul.mubr.msk.f32.gmra.mrb[10].mxu0 %vm481_vm0, %v422_v29 }
  0x30   : > { %606 = vmatprep.mubr.f32.mxu0 %v3257_v0 }
  0x33   : > { %3030 = vmatmul.mubr.msk.f32.gmra.mrb[12].mxu0 %vm481_vm0, %v423_v30 }
  0x34   : > { %612 = vmatprep.mubr.f32.mxu0 %v3257_v0 }
  0x37   : > { %3031 = vmatmul.mubr.msk.f32.gmra.mrb[14].mxu0 %vm481_vm0, %v424_v31 }
  0x38   : > { %773 = vmatprep.mubr.bf16.mxu0 %v3258_v1 }
  0x86   : > { %v444_v35 = vpop.permute.xlu0 %443 }
  0x87   : > { %v454_v51 = vpop.permute.xlu1 %453 }
  0x8a   : > { %v449_v46 = vpop.permute.xlu0 %448 }
  0x8b   : > { %v459_v0 = vpop.permute.xlu1 %458 }
  0x8e   : > { %v464_v13 = vpop.permute.xlu0 %463 }
  0x8f   : > { %v469_v23 = vpop.permute.xlu1 %468 }
  0x92   : > { %v474_v33 = vpop.permute.xlu0 %473 }
  0xee   : > { %v572_v39 = vpop.f32.mrb[0].mxu0 }
  0xef   : > { %v573_v40 = vadd.f32 %v572_v39, %v444_v35  ;;  %v574_v41 = vpop.f32.mrb[1].mxu0 }
  0xf0   : > { %v575_v42 = vadd.f32 %v574_v41, %v444_v35 }
  0xf1   : > { %v635_v44 = vmul.f32 0.25, %v573_v40  ;;  %vm619_vm2 = vcmp.ge.f32.partialorder %v573_v40, 0.0 }
  0xf2   : > { %v636_v47 = vmul.f32 0.25, %v575_v42  ;;  %v578_v48 = vpop.f32.mrb[2].mxu0  ;;  %vm620_vm3 = vcmp.ge.f32.partialorder %v575_v42, 0.0 }
  0xf3   : > { %v579_v49 = vadd.f32 %v578_v48, %v449_v46  ;;  %v580_v50 = vpop.f32.mrb[3].mxu0  ;;  %v651_v53 = vsel %vm619_vm2, %v573_v40, %v635_v44  ;;  %v479_v44 = vpop.permute.xlu1 %478 }
  0xf4   : > { %v581_v52 = vadd.f32 %v580_v50, %v449_v46  ;;  %v652_v55 = vsel %vm620_vm3, %v575_v42, %v636_v47 }
  0xf5   : > { %vm621_vm5 = vcmp.ge.f32.partialorder %v579_v49, 0.0  ;;  %v637_v54 = vmul.f32 0.25, %v579_v49 }
  0xf6   : > { %vm622_vm7 = vcmp.ge.f32.partialorder %v581_v52, 0.0  ;;  %v638_v56 = vmul.f32 0.25, %v581_v52  ;;  %v584_v57 = vpop.f32.mrb[4].mxu0 }
  0xf7   : > { %v653_v58 = vsel %vm621_vm5, %v579_v49, %v637_v54  ;;  %v585_v59 = vadd.f32 %v584_v57, %v454_v51  ;;  %v586_v60 = vpop.f32.mrb[5].mxu0 }
  0xf8   : > { %v654_v61 = vsel %vm622_vm7, %v581_v52, %v638_v56  ;;  %v587_v62 = vadd.f32 %v586_v60, %v454_v51  ;;  %v3199_v12 = vpack.c.bf16 %v653_v58, %v651_v53  ;;  %v3169_v60 = vld [vmem:[%s4484_s4] sm:$0xff]  }
  0xf9   : > { %v639_v63 = vmul.f32 0.25, %v585_v59  ;;  %vm623_vm8 = vcmp.ge.f32.partialorder %v585_v59, 0.0  ;;  %v3196_v8 = vpack.c.bf16 %v654_v61, %v652_v55 }
  0xfa   : > { %v640_v2 = vmul.f32 0.25, %v587_v62  ;;  %v590_v3 = vpop.f32.mrb[6].mxu0  ;;  %vm624_vm9 = vcmp.ge.f32.partialorder %v587_v62, 0.0 }
  0xfb   : > { %v591_v4 = vadd.f32 %v590_v3, %v459_v0  ;;  %v592_v5 = vpop.f32.mrb[7].mxu0  ;;  %3197 = vmatprep.subr.msk.bf16.mxu0 %vm3437_vm10, %v3196_v8  ;;  %v655_v9 = vsel %vm623_vm8, %v585_v59, %v639_v63  ;;  %vm4493_vm8 = vcmask 523264   ;;  %v725_v63 = vpop.permute.xlu0 %724 }
  0xfc   : > { %v593_v6 = vadd.f32 %v592_v5, %v459_v0  ;;  %3200 = vmatpush1.bf16.msk.msra.mxu0 %vm3446_vm12, %v3199_v12  ;;  %v656_v14 = vsel %vm624_vm9, %v587_v62, %v640_v2  ;;  %v3468_v62 = vld [vmem:[#allocation3] sm:$0xff] }
  0xfd   : > { %vm625_vm11 = vcmp.ge.f32.partialorder %v591_v4, 0.0  ;;  %v641_v10 = vmul.f32 0.25, %v591_v4  ;;  %811 = vrot.lane.b32.xlu0 %v3468_v62, %s3259_s17  ;;  %820 = vrot.lane.b32.xlu1 %v3468_v62, %s3260_s18 }
  0xfe   : > { %vm626_vm13 = vcmp.ge.f32.partialorder %v593_v6, 0.0  ;;  %v642_v15 = vmul.f32 0.25, %v593_v6  ;;  %v596_v16 = vpop.f32.mrb[8].mxu0 }
  0xff   : > { %v657_v17 = vsel %vm625_vm11, %v591_v4, %v641_v10  ;;  %v597_v18 = vadd.f32 %v596_v16, %v464_v13  ;;  %v598_v19 = vpop.f32.mrb[9].mxu0  ;;  %v730_v4 = vpop.permute.xlu1 %729 }
 0x100   : > { %v658_v20 = vsel %vm626_vm13, %v593_v6, %v642_v15  ;;  %v599_v21 = vadd.f32 %v598_v19, %v464_v13  ;;  %v3205_v32 = vpack.c.bf16 %v657_v17, %v655_v9 }
 0x101   : > { %v643_v22 = vmul.f32 0.25, %v597_v18  ;;  %vm627_vm14 = vcmp.ge.f32.partialorder %v597_v18, 0.0  ;;  %v3202_v29 = vpack.c.bf16 %v658_v20, %v656_v14  ;;  %829 = vrot.lane.b32.xlu0 %v3468_v62, %s3261_s19 }
 0x102   : > { %v644_v24 = vmul.f32 0.25, %v599_v21  ;;  %v602_v25 = vpop.f32.mrb[10].mxu0  ;;  %vm628_vm15 = vcmp.ge.f32.partialorder %v599_v21, 0.0 }
 0x103   : > { %v603_v26 = vadd.f32 %v602_v25, %v469_v23  ;;  %v604_v27 = vpop.f32.mrb[11].mxu0  ;;  %3203 = vmatprep.subr.msk.bf16.mxu0 %vm3437_vm10, %v3202_v29  ;;  %v659_v30 = vsel %vm627_vm14, %v597_v18, %v643_v22 }
 0x104   : > { %v605_v28 = vadd.f32 %v604_v27, %v469_v23  ;;  %3206 = vmatpush1.bf16.msk.msra.mxu0 %vm3446_vm12, %v3205_v32  ;;  %v660_v34 = vsel %vm628_vm15, %v599_v21, %v644_v24  ;;  %vm817_vm15 = vcmask 1039360  }
 0x105   : > { %vm629_vm0 = vcmp.ge.f32.partialorder %v603_v26, 0.0  ;;  %v645_v31 = vmul.f32 0.25, %v603_v26 }
 0x106   : > { %vm630_vm1 = vcmp.ge.f32.partialorder %v605_v28, 0.0  ;;  %v646_v35 = vmul.f32 0.25, %v605_v28  ;;  %v608_v36 = vpop.f32.mrb[12].mxu0 }
 0x107   : > { %v661_v37 = vsel %vm629_vm0, %v603_v26, %v645_v31  ;;  %v609_v38 = vadd.f32 %v608_v36, %v474_v33  ;;  %v610_v39 = vpop.f32.mrb[13].mxu0  ;;  %v3492_v26 = vld [vmem:[#allocation3 + $0x18] sm:$0xff]  ;;  %vm826_vm0 = vcmask 1031168  }
 0x108   : > { %v662_v40 = vsel %vm630_vm1, %v605_v28, %v646_v35  ;;  %v611_v41 = vadd.f32 %v610_v39, %v474_v33  ;;  %v3211_v54 = vpack.c.bf16 %v661_v37, %v659_v30  ;;  %vm835_vm1 = vcmask 916480  }
 0x109   : > { %v647_v42 = vmul.f32 0.25, %v609_v38  ;;  %vm631_vm2 = vcmp.ge.f32.partialorder %v609_v38, 0.0  ;;  %v3208_v51 = vpack.c.bf16 %v662_v40, %v660_v34 }
 0x10a   : > { %v648_v46 = vmul.f32 0.25, %v611_v41  ;;  %v614_v47 = vpop.f32.mrb[14].mxu0  ;;  %vm632_vm3 = vcmp.ge.f32.partialorder %v611_v41, 0.0 }
 0x10b   : > { %v615_v48 = vadd.f32 %v614_v47, %v479_v44  ;;  %v616_v49 = vpop.f32.mrb[15].mxu0  ;;  %3209 = vmatprep.subr.msk.bf16.mxu0 %vm3437_vm10, %v3208_v51  ;;  %v663_v52 = vsel %vm631_vm2, %v609_v38, %v647_v42  ;;  %vm842_vm2 = vcmask 908288  }
 0x10c   : > { %v617_v50 = vadd.f32 %v616_v49, %v479_v44  ;;  %3212 = vmatpush1.bf16.msk.msra.mxu0 %vm3446_vm12, %v3211_v54  ;;  %v664_v55 = vsel %vm632_vm3, %v611_v41, %v648_v46  ;;  %vm851_vm3 = vcmask 900096  }
 0x10d   : > { %vm633_vm5 = vcmp.ge.f32.partialorder %v615_v48, 0.0  ;;  %v649_v53 = vmul.f32 0.25, %v615_v48 }
 0x10e   : > { %vm634_vm7 = vcmp.ge.f32.partialorder %v617_v50, 0.0  ;;  %v650_v56 = vmul.f32 0.25, %v617_v50 }
 0x10f   : > { %v665_v57 = vsel %vm633_vm5, %v615_v48, %v649_v53  ;;  %vm860_vm5 = vcmask 785408  }
 0x110   : > { %v666_v58 = vsel %vm634_vm7, %v617_v50, %v650_v56  ;;  %v3217_v61 = vpack.c.bf16 %v665_v57, %v663_v52  ;;  %vm869_vm7 = vcmask 777216  }
 0x111   : > { %v3214_v59 = vpack.c.bf16 %v666_v58, %v664_v55 }
 0x113   : > { %3215 = vmatprep.subr.msk.bf16.mxu0 %vm3437_vm10, %v3214_v59 }
 0x114   : > { %3218 = vmatpush1.bf16.msk.msra.mxu0 %vm3446_vm12, %v3217_v61 }
 0x117   : > { %3033 = vmatmul.mubr.msk.bf16.vlgmr.msra.gmra.mrb[16].mxu0 %vm4493_vm8, %v3169_v60 }
 0x16f   : > { %v812_v27 = vpop.permute.xlu0 %811  ;;  %v821_v28 = vpop.permute.xlu1 %820 }
 0x173   : > { %v830_v29 = vpop.permute.xlu0 %829 }
 0x1ea   : > { %v775_v0 = vpop.f32.mrb[16].mxu0 }
 0x1eb   : > { %v776_v2 = vadd.f32 %v775_v0, %v725_v63  ;;  %v777_v3 = vpop.f32.mrb[17].mxu0 }
 0x1ec   : > { %v778_v5 = vadd.f32 %v777_v3, %v725_v63  ;;  %v779_v6 = vpop.f32.mrb[18].mxu0 }
 0x1ed   : > { %vm784_vm9 = vcmp.ge.f32.partialorder %v776_v2, 0.0  ;;  %v788_v8 = vmul.f32 0.25, %v776_v2  ;;  %v780_v9 = vadd.f32 %v779_v6, %v730_v4  ;;  %v781_v10 = vpop.f32.mrb[19].mxu0 }
 0x1ee   : > { %vm785_vm11 = vcmp.ge.f32.partialorder %v778_v5, 0.0  ;;  %v789_v12 = vmul.f32 0.25, %v778_v5  ;;  %v782_v13 = vadd.f32 %v781_v10, %v730_v4  ;;  %v3170_v4 = vld [vmem:[%s4486_s6 + $0x4] ss:$8 sps:$4 sm:$0xff]  }
 0x1ef   : > { %v792_v14 = vsel %vm784_vm9, %v776_v2, %v788_v8  ;;  %vm786_vm13 = vcmp.ge.f32.partialorder %v780_v9, 0.0  ;;  %v790_v15 = vmul.f32 0.25, %v780_v9  ;;  %vm958_vm9 = vcmask 138240  }
 0x1f0   : > { %v793_v16 = vsel %vm785_vm11, %v778_v5, %v789_v12  ;;  %vm787_vm14 = vcmp.ge.f32.partialorder %v782_v13, 0.0  ;;  %v791_v17 = vmul.f32 0.25, %v782_v13  ;;  %v796_v19 = vsel %vm676_vm4, %v792_v14, 0.0  ;;  %v884_v12 = vld [vmem:[%s4487_s7 + $0x8] sm:$0xff]  ;;  %v883_v14 = vld [vmem:[%s4487_s7] sm:$0xff] }
 0x1f1   : > { %v794_v18 = vsel %vm786_vm13, %v780_v9, %v790_v15  ;;  %v797_v22 = vsel %vm677_vm6, %v793_v16, 0.0  ;;  %vm4495_vm11 = vcmask 769024   ;;  %vm4494_vm13 = vcmask 130048  }
 0x1f2   : > { %v798_v20 = vsel %vm676_vm4, %v794_v18, 0.0  ;;  %v795_v21 = vsel %vm787_vm14, %v782_v13, %v791_v17  ;;  %3036 = vmatprep.mubr.msk.bf16.mxu0 %vm4494_vm13, %v3170_v4 }
 0x1f3   : > { %v800_v23 = vpack.c.bf16 %v798_v20, %v796_v19  ;;  %v799_v24 = vsel %vm677_vm6, %v795_v21, 0.0 }
 0x1f4   : > { %v801_v25 = vpack.c.bf16 %v799_v24, %v797_v22 }
 0x1f5   : > { %822 = vrot.lane.b32.xlu1 %v800_v23, %s3260_s18  ;;  %813 = vrot.lane.b32.xlu0 %v800_v23, %s3259_s17 }
 0x1f9   : > { %838 = vrot.lane.b32.xlu1 %v800_v23, %s3262_s20  ;;  %831 = vrot.lane.b32.xlu0 %v800_v23, %s3261_s19 }
 0x1fd   : > { %815 = vrot.lane.b32.xlu1 %v801_v25, %s3259_s17  ;;  %824 = vrot.lane.b32.xlu0 %v801_v25, %s3260_s18 }
 0x201   : > { %845 = vrot.lane.b32.xlu1 %v800_v23, %s3263_s23  ;;  %854 = vrot.lane.b32.xlu0 %v800_v23, %s3264_s24 }
 0x205   : > { %833 = vrot.lane.b32.xlu1 %v801_v25, %s3261_s19  ;;  %858 = vrot.lane.b32.xlu0 %v3492_v26, %s3264_s24 }
 0x209   : > { %849 = vrot.lane.b32.xlu1 %v3492_v26, %s3263_s23  ;;  %840 = vrot.lane.b32.xlu0 %v801_v25, %s3262_s20 }
 0x20d   : > { %863 = vrot.lane.b32.xlu1 %v800_v23, %s3265_s25  ;;  %847 = vrot.lane.b32.xlu0 %v801_v25, %s3263_s23 }
 0x211   : > { %856 = vrot.lane.b32.xlu1 %v801_v25, %s3264_s24  ;;  %872 = vrot.lane.b32.xlu0 %v800_v23, %s3266_s26 }
 0x215   : > { %867 = vrot.lane.b32.xlu1 %v3492_v26, %s3265_s25  ;;  %865 = vrot.lane.b32.xlu0 %v801_v25, %s3265_s25 }
 0x219   : > { %874 = vrot.lane.b32.xlu1 %v801_v25, %s3266_s26  ;;  %876 = vrot.lane.b32.xlu0 %v3492_v26, %s3266_s26 }
 0x21d   : > { %906 = vrot.lane.b32.xlu1 %v800_v23, %s3267_s27  ;;  %908 = vrot.lane.b32.xlu0 %v801_v25, %s3267_s27 }
 0x221   : > { %904 = vrot.lane.b32.xlu1 %v3468_v62, %s3267_s27 }
 0x267   : > { %v823_v30 = vpop.permute.xlu1 %822  ;;  %v814_v31 = vpop.permute.xlu0 %813 }
 0x268   : > { %v818_v32 = vsel %vm817_vm15, %v812_v27, %v814_v31  ;;  %v827_v39 = vsel %vm826_vm0, %v821_v28, %v823_v30 }
 0x269   : > { %910 = vrot.lane.b32.xlu0 %v818_v32, %s3267_s27 }
 0x26b   : > { %v839_v33 = vpop.permute.xlu1 %838  ;;  %v832_v34 = vpop.permute.xlu0 %831 }
 0x26c   : > { %928 = vrot.lane.b32.xlu1 %v839_v33, %s3267_s27  ;;  %v836_v40 = vsel %vm835_vm1, %v830_v29, %v832_v34 }
 0x26f   : > { %v816_v35 = vpop.permute.xlu1 %815  ;;  %v825_v36 = vpop.permute.xlu0 %824 }
 0x270   : > { %914 = vrot.lane.b32.xlu1 %v816_v35, %s3267_s27  ;;  %920 = vrot.lane.b32.xlu0 %v825_v36, %s3267_s27  ;;  %v828_v47 = vsel %vm826_vm0, %v823_v30, %v825_v36  ;;  %v819_v50 = vsel %vm817_vm15, %v814_v31, %v816_v35 }
 0x273   : > { %v846_v37 = vpop.permute.xlu1 %845  ;;  %v855_v38 = vpop.permute.xlu0 %854 }
 0x274   : > { %916 = vrot.lane.b32.xlu1 %v827_v39, %s3267_s27  ;;  %922 = vrot.lane.b32.xlu0 %v836_v40, %s3267_s27 }
 0x277   : > { %v834_v41 = vpop.permute.xlu1 %833  ;;  %v859_v42 = vpop.permute.xlu0 %858 }
 0x278   : > { %926 = vrot.lane.b32.xlu1 %v834_v41, %s3267_s27  ;;  %v837_v56 = vsel %vm835_vm1, %v832_v34, %v834_v41 }
 0x27b   : > { %v850_v44 = vpop.permute.xlu1 %849  ;;  %v841_v46 = vpop.permute.xlu0 %840 }
 0x27c   : > { %918 = vrot.lane.b32.xlu1 %v828_v47, %s3267_s27  ;;  %932 = vrot.lane.b32.xlu0 %v841_v46, %s3267_s27  ;;  %v843_v53 = vsel %vm842_vm2, %v839_v33, %v841_v46 }
 0x27f   : > { %v864_v48 = vpop.permute.xlu1 %863  ;;  %v848_v49 = vpop.permute.xlu0 %847 }
 0x280   : > { %940 = vrot.lane.b32.xlu1 %v855_v38, %s3267_s27  ;;  %912 = vrot.lane.b32.xlu0 %v819_v50, %s3267_s27  ;;  %v853_v57 = vsel %vm851_vm3, %v848_v49, %v850_v44  ;;  %v852_v0 = vsel %vm851_vm3, %v846_v37, %v848_v49 }
 0x283   : > { %v857_v51 = vpop.permute.xlu1 %856  ;;  %v873_v52 = vpop.permute.xlu0 %872 }
 0x284   : > { %930 = vrot.lane.b32.xlu1 %v843_v53, %s3267_s27  ;;  %934 = vrot.lane.b32.xlu0 %v846_v37, %s3267_s27  ;;  %v861_v60 = vsel %vm860_vm5, %v855_v38, %v857_v51  ;;  %v862_v6 = vsel %vm860_vm5, %v857_v51, %v859_v42 }
 0x287   : > { %v868_v54 = vpop.permute.xlu1 %867  ;;  %v866_v55 = vpop.permute.xlu0 %865 }
 0x288   : > { %924 = vrot.lane.b32.xlu0 %v837_v56, %s3267_s27  ;;  %938 = vrot.lane.b32.xlu1 %v853_v57, %s3267_s27  ;;  %v871_v2 = vsel %vm869_vm7, %v866_v55, %v868_v54  ;;  %v870_v10 = vsel %vm869_vm7, %v864_v48, %v866_v55 }
 0x28b   : > { %v875_v58 = vpop.permute.xlu1 %874  ;;  %v877_v59 = vpop.permute.xlu0 %876 }
 0x28c   : > { %946 = vrot.lane.b32.xlu0 %v864_v48, %s3267_s27  ;;  %942 = vrot.lane.b32.xlu1 %v861_v60, %s3267_s27  ;;  %v879_v8 = vsel %vm4495_vm11, %v873_v52, %v875_v58  ;;  %v880_v13 = vsel %vm4495_vm11, %v875_v58, %v877_v59  ;;  %v3172_v58 = vld [vmem:[%s4486_s6] ss:$8 sps:$4 sm:$0xff]  }
 0x28d   : > { %v3584_v59 = vld [vmem:[#allocation2] sm:$0xff] }
 0x28f   : > { %v907_v61 = vpop.permute.xlu1 %906  ;;  %v909_v63 = vpop.permute.xlu0 %908 }
 0x290   : > { %936 = vrot.lane.b32.xlu0 %v852_v0, %s3267_s27  ;;  %950 = vrot.lane.b32.xlu1 %v871_v2, %s3267_s27  ;;  %v960_v3 = vsel %vm958_vm9, %v907_v61, %v909_v63 }
 0x291   : > { %999 = vmatprep.subr.bf16.mxu0 %v960_v3 }
 0x293   : > { %v905_v5 = vpop.permute.xlu1 %904 }
 0x294   : > { %v959_v9 = vsel %vm958_vm9, %v905_v5, %v907_v61  ;;  %944 = vrot.lane.b32.xlu0 %v862_v6, %s3267_s27  ;;  %954 = vrot.lane.b32.xlu1 %v879_v8, %s3267_s27 }
 0x295   : > { %1000 = vmatpush1.bf16.msra.mxu0 %v959_v9 }
 0x298   : > { %952 = vrot.lane.b32.xlu1 %v873_v52, %s3267_s27  ;;  %948 = vrot.lane.b32.xlu0 %v870_v10, %s3267_s27 }
 0x29c   : > { %892 = vperm.xlu1 %3168, %v884_v12   ;;  %956 = vrot.lane.b32.xlu0 %v880_v13, %s3267_s27 }
 0x2a0   : > { %887 = vperm.xlu0 %3167, %v883_v14   ;;  %1077 = vrot.lane.b32.xlu1 %v3584_v59, %s3260_s18 }
 0x2a4   : > { %1069 = vrot.lane.b32.xlu0 %v3584_v59, %s3259_s17 }
 0x2a8   : > { %1085 = vrot.lane.b32.xlu0 %v3584_v59, %s3261_s19 }
 0x2db   : > { %v911_v16 = vpop.permute.xlu0 %910 }
 0x2de   : > { %v929_v15 = vpop.permute.xlu1 %928 }
 0x2e2   : > { %v915_v17 = vpop.permute.xlu1 %914  ;;  %v921_v18 = vpop.permute.xlu0 %920 }
 0x2e6   : > { %v917_v19 = vpop.permute.xlu1 %916  ;;  %v923_v20 = vpop.permute.xlu0 %922 }
 0x2ea   : > { %v927_v21 = vpop.permute.xlu1 %926 }
 0x2ee   : > { %v919_v22 = vpop.permute.xlu1 %918  ;;  %v933_v23 = vpop.permute.xlu0 %932 }
 0x2ef   : > { %v964_v29 = vsel %vm958_vm9, %v919_v22, %v921_v18  ;;  %v963_v32 = vsel %vm958_vm9, %v917_v19, %v919_v22 }
 0x2f2   : > { %v941_v24 = vpop.permute.xlu1 %940  ;;  %v913_v25 = vpop.permute.xlu0 %912 }
 0x2f3   : > { %v962_v27 = vsel %vm958_vm9, %v913_v25, %v915_v17  ;;  %v961_v28 = vsel %vm958_vm9, %v911_v16, %v913_v25 }
 0x2f4   : > { %1001 = vmatprep.subr.bf16.mxu0 %v962_v27 }
 0x2f5   : > { %1002 = vmatpush1.bf16.msra.mxu0 %v961_v28 }
 0x2f6   : > { %v931_v30 = vpop.permute.xlu1 %930  ;;  %1003 = vmatprep.subr.bf16.mxu0 %v964_v29  ;;  %v935_v31 = vpop.permute.xlu0 %934 }
 0x2f7   : > { %v968_v37 = vsel %vm958_vm9, %v931_v30, %v933_v23  ;;  %v967_v40 = vsel %vm958_vm9, %v929_v15, %v931_v30 }
 0x2f9   : > { %1004 = vmatpush1.bf16.msra.mxu0 %v963_v32 }
 0x2fa   : > { %v939_v33 = vpop.permute.xlu1 %938  ;;  %v925_v34 = vpop.permute.xlu0 %924 }
 0x2fb   : > { %v966_v35 = vsel %vm958_vm9, %v925_v34, %v927_v21  ;;  %v965_v36 = vsel %vm958_vm9, %v923_v20, %v925_v34 }
 0x2fc   : > { %1005 = vmatprep.subr.bf16.mxu0 %v966_v35 }
 0x2fd   : > { %1006 = vmatpush1.bf16.msra.mxu0 %v965_v36 }
 0x2fe   : > { %v943_v38 = vpop.permute.xlu1 %942  ;;  %1007 = vmatprep.subr.bf16.mxu0 %v968_v37  ;;  %v947_v39 = vpop.permute.xlu0 %946 }
 0x2ff   : > { %v971_v50 = vsel %vm958_vm9, %v941_v24, %v943_v38  ;;  %v3608_v24 = vld [vmem:[#allocation2 + $0x18] sm:$0xff] }
 0x301   : > { %1008 = vmatpush1.bf16.msra.mxu0 %v967_v40 }
 0x302   : > { %v951_v41 = vpop.permute.xlu1 %950  ;;  %v937_v42 = vpop.permute.xlu0 %936 }
 0x303   : > { %v970_v44 = vsel %vm958_vm9, %v937_v42, %v939_v33  ;;  %v969_v46 = vsel %vm958_vm9, %v935_v31, %v937_v42 }
 0x304   : > { %1009 = vmatprep.subr.bf16.mxu0 %v970_v44 }
 0x305   : > { %1010 = vmatpush1.bf16.msra.mxu0 %v969_v46 }
 0x306   : > { %v945_v47 = vpop.permute.xlu0 %944  ;;  %v955_v48 = vpop.permute.xlu1 %954 }
 0x307   : > { %v972_v49 = vsel %vm958_vm9, %v943_v38, %v945_v47 }
 0x308   : > { %1011 = vmatprep.subr.bf16.mxu0 %v972_v49 }
 0x309   : > { %1012 = vmatpush1.bf16.msra.mxu0 %v971_v50 }
 0x30a   : > { %v949_v51 = vpop.permute.xlu0 %948  ;;  %v953_v54 = vpop.permute.xlu1 %952 }
 0x30b   : > { %v974_v52 = vsel %vm958_vm9, %v949_v51, %v951_v41  ;;  %v973_v53 = vsel %vm958_vm9, %v947_v39, %v949_v51  ;;  %v975_v57 = vsel %vm958_vm9, %v953_v54, %v955_v48 }
 0x30c   : > { %1013 = vmatprep.subr.bf16.mxu0 %v974_v52 }
 0x30d   : > { %1014 = vmatpush1.bf16.msra.mxu0 %v973_v53 }
 0x30e   : > { %v957_v55 = vpop.permute.xlu0 %956 }
 0x30f   : > { %v976_v56 = vsel %vm958_vm9, %v955_v48, %v957_v55 }
 0x310   : > { %1015 = vmatprep.subr.bf16.mxu0 %v976_v56 }
 0x311   : > { %1016 = vmatpush1.bf16.msra.mxu0 %v975_v57 }
 0x314   : > { %1032 = vmatmul.mubr.bf16.vlgmr.msra.gmra.mrb[20].mxu0 %v3172_v58 }
 0x31b   : > { %v893_v2 = vpop.permute.xlu1 %892 }
 0x31f   : > { %v888_v60 = vpop.permute.xlu0 %887  ;;  %v1078_v27 = vpop.permute.xlu1 %1077 }
 0x323   : > { %v1070_v25 = vpop.permute.xlu0 %1069 }
 0x327   : > { %v1086_v28 = vpop.permute.xlu0 %1085 }
 0x3e7   : > { %v1033_v61 = vpop.f32.mrb[20].mxu0 }
 0x3e8   : > { %v1034_v63 = vadd.f32 %v1033_v61, %v888_v60  ;;  %v1035_v0 = vpop.f32.mrb[21].mxu0 }
 0x3e9   : > { %v1036_v3 = vadd.f32 %v1035_v0, %v888_v60  ;;  %v1037_v4 = vpop.f32.mrb[22].mxu0 }
 0x3ea   : > { %vm1042_vm14 = vcmp.ge.f32.partialorder %v1034_v63, 0.0  ;;  %v1046_v5 = vmul.f32 0.25, %v1034_v63  ;;  %v1038_v6 = vadd.f32 %v1037_v4, %v893_v2  ;;  %v1039_v8 = vpop.f32.mrb[23].mxu0  ;;  %v3173_v4 = vld [vmem:[%s4486_s6 + $0x14] ss:$8 sps:$4 sm:$0xff]  }
 0x3eb   : > { %vm1043_vm8 = vcmp.ge.f32.partialorder %v1036_v3, 0.0  ;;  %v1047_v9 = vmul.f32 0.25, %v1036_v3  ;;  %v1040_v10 = vadd.f32 %v1039_v8, %v893_v2 }
 0x3ec   : > { %v1050_v12 = vsel %vm1042_vm14, %v1034_v63, %v1046_v5  ;;  %vm1044_vm13 = vcmp.ge.f32.partialorder %v1038_v6, 0.0  ;;  %v1048_v13 = vmul.f32 0.25, %v1038_v6 }
 0x3ed   : > { %v1051_v14 = vsel %vm1043_vm8, %v1036_v3, %v1047_v9  ;;  %vm1045_vm11 = vcmp.ge.f32.partialorder %v1040_v10, 0.0  ;;  %v1049_v15 = vmul.f32 0.25, %v1040_v10  ;;  %v1054_v17 = vsel %vm676_vm4, %v1050_v12, 0.0  ;;  %v3040_v12 = vld [vmem:[%s4487_s7 + $0x18] sm:$0xff] }
 0x3ee   : > { %v1052_v16 = vsel %vm1044_vm13, %v1038_v6, %v1048_v13  ;;  %v1055_v20 = vsel %vm677_vm6, %v1051_v14, 0.0  ;;  %vm4500_vm8 = vcmask 769024   ;;  %v3039_v14 = vld [vmem:[%s4487_s7 + $0x10] sm:$0xff] }
 0x3ef   : > { %v1056_v18 = vsel %vm676_vm4, %v1052_v16, 0.0  ;;  %v1053_v19 = vsel %vm1045_vm11, %v1040_v10, %v1049_v15  ;;  %vm4501_vm11 = vcmask 130048   ;;  %vm4502_vm13 = vmmov %vm4500_vm8 }
 0x3f0   : > { %v1058_v21 = vpack.c.bf16 %v1056_v18, %v1054_v17  ;;  %v1057_v22 = vsel %vm677_vm6, %v1053_v19, 0.0  ;;  %3043 = vmatprep.mubr.msk.bf16.mxu0 %vm4501_vm11, %v3173_v4 }
 0x3f1   : > { %v1059_v23 = vpack.c.bf16 %v1057_v22, %v1055_v20 }
 0x3f2   : > { %1079 = vrot.lane.b32.xlu1 %v1058_v21, %s3260_s18  ;;  %1071 = vrot.lane.b32.xlu0 %v1058_v21, %s3259_s17 }
 0x3f6   : > { %1093 = vrot.lane.b32.xlu1 %v1058_v21, %s3262_s20  ;;  %1087 = vrot.lane.b32.xlu0 %v1058_v21, %s3261_s19 }
 0x3fa   : > { %1073 = vrot.lane.b32.xlu1 %v1059_v23, %s3259_s17  ;;  %1081 = vrot.lane.b32.xlu0 %v1059_v23, %s3260_s18 }
 0x3fe   : > { %1099 = vrot.lane.b32.xlu1 %v1058_v21, %s3263_s23  ;;  %1107 = vrot.lane.b32.xlu0 %v1058_v21, %s3264_s24 }
 0x402   : > { %1089 = vrot.lane.b32.xlu1 %v1059_v23, %s3261_s19  ;;  %1111 = vrot.lane.b32.xlu0 %v3608_v24, %s3264_s24 }
 0x406   : > { %1103 = vrot.lane.b32.xlu1 %v3608_v24, %s3263_s23  ;;  %1095 = vrot.lane.b32.xlu0 %v1059_v23, %s3262_s20 }
 0x40a   : > { %1115 = vrot.lane.b32.xlu1 %v1058_v21, %s3265_s25  ;;  %1101 = vrot.lane.b32.xlu0 %v1059_v23, %s3263_s23 }
 0x40e   : > { %1109 = vrot.lane.b32.xlu1 %v1059_v23, %s3264_s24  ;;  %1123 = vrot.lane.b32.xlu0 %v1058_v21, %s3266_s26 }
 0x412   : > { %1119 = vrot.lane.b32.xlu1 %v3608_v24, %s3265_s25  ;;  %1117 = vrot.lane.b32.xlu0 %v1059_v23, %s3265_s25 }
 0x416   : > { %1125 = vrot.lane.b32.xlu1 %v1059_v23, %s3266_s26  ;;  %1127 = vrot.lane.b32.xlu0 %v3608_v24, %s3266_s26 }
 0x41a   : > { %1158 = vrot.lane.b32.xlu1 %v1058_v21, %s3267_s27  ;;  %1160 = vrot.lane.b32.xlu0 %v1059_v23, %s3267_s27 }
 0x41e   : > { %1156 = vrot.lane.b32.xlu1 %v3584_v59, %s3267_s27 }
 0x464   : > { %v1080_v29 = vpop.permute.xlu1 %1079  ;;  %v1072_v30 = vpop.permute.xlu0 %1071 }
 0x465   : > { %v1075_v31 = vsel %vm817_vm15, %v1070_v25, %v1072_v30  ;;  %v1083_v38 = vsel %vm826_vm0, %v1078_v27, %v1080_v29 }
 0x466   : > { %1162 = vrot.lane.b32.xlu0 %v1075_v31, %s3267_s27 }
 0x468   : > { %v1094_v32 = vpop.permute.xlu1 %1093  ;;  %v1088_v33 = vpop.permute.xlu0 %1087 }
 0x469   : > { %1180 = vrot.lane.b32.xlu1 %v1094_v32, %s3267_s27  ;;  %v1091_v39 = vsel %vm835_vm1, %v1086_v28, %v1088_v33 }
 0x46c   : > { %v1074_v34 = vpop.permute.xlu1 %1073  ;;  %v1082_v35 = vpop.permute.xlu0 %1081 }
 0x46d   : > { %1166 = vrot.lane.b32.xlu1 %v1074_v34, %s3267_s27  ;;  %1172 = vrot.lane.b32.xlu0 %v1082_v35, %s3267_s27  ;;  %v1084_v46 = vsel %vm826_vm0, %v1080_v29, %v1082_v35  ;;  %v1076_v49 = vsel %vm817_vm15, %v1072_v30, %v1074_v34 }
 0x470   : > { %v1100_v36 = vpop.permute.xlu1 %1099  ;;  %v1108_v37 = vpop.permute.xlu0 %1107 }
 0x471   : > { %1168 = vrot.lane.b32.xlu1 %v1083_v38, %s3267_s27  ;;  %1174 = vrot.lane.b32.xlu0 %v1091_v39, %s3267_s27 }
 0x474   : > { %v1090_v40 = vpop.permute.xlu1 %1089  ;;  %v1112_v41 = vpop.permute.xlu0 %1111 }
 0x475   : > { %1178 = vrot.lane.b32.xlu1 %v1090_v40, %s3267_s27  ;;  %v1092_v55 = vsel %vm835_vm1, %v1088_v33, %v1090_v40 }
 0x478   : > { %v1104_v42 = vpop.permute.xlu1 %1103  ;;  %v1096_v44 = vpop.permute.xlu0 %1095 }
 0x479   : > { %1170 = vrot.lane.b32.xlu1 %v1084_v46, %s3267_s27  ;;  %1184 = vrot.lane.b32.xlu0 %v1096_v44, %s3267_s27  ;;  %v1097_v52 = vsel %vm842_vm2, %v1094_v32, %v1096_v44 }
 0x47c   : > { %v1116_v47 = vpop.permute.xlu1 %1115  ;;  %v1102_v48 = vpop.permute.xlu0 %1101 }
 0x47d   : > { %1192 = vrot.lane.b32.xlu1 %v1108_v37, %s3267_s27  ;;  %1164 = vrot.lane.b32.xlu0 %v1076_v49, %s3267_s27  ;;  %v1106_v56 = vsel %vm851_vm3, %v1102_v48, %v1104_v42  ;;  %v1105_v0 = vsel %vm851_vm3, %v1100_v36, %v1102_v48 }
 0x480   : > { %v1110_v50 = vpop.permute.xlu1 %1109  ;;  %v1124_v51 = vpop.permute.xlu0 %1123 }
 0x481   : > { %1182 = vrot.lane.b32.xlu1 %v1097_v52, %s3267_s27  ;;  %1186 = vrot.lane.b32.xlu0 %v1100_v36, %s3267_s27  ;;  %v1113_v60 = vsel %vm860_vm5, %v1108_v37, %v1110_v50  ;;  %v1114_v6 = vsel %vm860_vm5, %v1110_v50, %v1112_v41 }
 0x484   : > { %v1120_v53 = vpop.permute.xlu1 %1119  ;;  %v1118_v54 = vpop.permute.xlu0 %1117 }
 0x485   : > { %1176 = vrot.lane.b32.xlu0 %v1092_v55, %s3267_s27  ;;  %1190 = vrot.lane.b32.xlu1 %v1106_v56, %s3267_s27  ;;  %v1122_v2 = vsel %vm869_vm7, %v1118_v54, %v1120_v53  ;;  %v1121_v10 = vsel %vm869_vm7, %v1116_v47, %v1118_v54 }
 0x488   : > { %v1126_v57 = vpop.permute.xlu1 %1125  ;;  %v1128_v58 = vpop.permute.xlu0 %1127 }
 0x489   : > { %1198 = vrot.lane.b32.xlu0 %v1116_v47, %s3267_s27  ;;  %1194 = vrot.lane.b32.xlu1 %v1113_v60, %s3267_s27  ;;  %v1129_v8 = vsel %vm4500_vm8, %v1124_v51, %v1126_v57  ;;  %v1130_v13 = vsel %vm4502_vm13, %v1126_v57, %v1128_v58  ;;  %v3175_v60 = vld [vmem:[%s4486_s6 + $0x10] ss:$8 sps:$4 sm:$0xff]  }
 0x48c   : > { %v1159_v61 = vpop.permute.xlu1 %1158  ;;  %v1161_v63 = vpop.permute.xlu0 %1160 }
 0x48d   : > { %1188 = vrot.lane.b32.xlu0 %v1105_v0, %s3267_s27  ;;  %1202 = vrot.lane.b32.xlu1 %v1122_v2, %s3267_s27  ;;  %v1211_v3 = vsel %vm958_vm9, %v1159_v61, %v1161_v63 }
 0x48e   : > { %1249 = vmatprep.subr.bf16.mxu0 %v1211_v3 }
 0x490   : > { %v1157_v5 = vpop.permute.xlu1 %1156 }
 0x491   : > { %v1210_v9 = vsel %vm958_vm9, %v1157_v5, %v1159_v61  ;;  %1196 = vrot.lane.b32.xlu0 %v1114_v6, %s3267_s27  ;;  %1206 = vrot.lane.b32.xlu1 %v1129_v8, %s3267_s27 }
 0x492   : > { %1250 = vmatpush1.bf16.msra.mxu0 %v1210_v9 }
 0x495   : > { %1204 = vrot.lane.b32.xlu1 %v1124_v51, %s3267_s27  ;;  %1200 = vrot.lane.b32.xlu0 %v1121_v10, %s3267_s27 }
 0x499   : > { %1144 = vperm.xlu1 %3168, %v3040_v12   ;;  %1208 = vrot.lane.b32.xlu0 %v1130_v13, %s3267_s27 }
 0x49d   : > { %1139 = vperm.xlu0 %3167, %v3039_v14   ;;  %1327 = vrot.lane.b32.xlu1 %v3468_v62, %s3260_s18 }
 0x4a1   : > { %1319 = vrot.lane.b32.xlu0 %v3468_v62, %s3259_s17 }
 0x4a5   : > { %1335 = vrot.lane.b32.xlu0 %v3468_v62, %s3261_s19 }
 0x4d8   : > { %v1163_v16 = vpop.permute.xlu0 %1162 }
 0x4db   : > { %v1181_v15 = vpop.permute.xlu1 %1180 }
 0x4df   : > { %v1167_v17 = vpop.permute.xlu1 %1166  ;;  %v1173_v18 = vpop.permute.xlu0 %1172 }
 0x4e3   : > { %v1169_v19 = vpop.permute.xlu1 %1168  ;;  %v1175_v20 = vpop.permute.xlu0 %1174 }
 0x4e7   : > { %v1179_v21 = vpop.permute.xlu1 %1178 }
 0x4eb   : > { %v1171_v22 = vpop.permute.xlu1 %1170  ;;  %v1185_v23 = vpop.permute.xlu0 %1184 }
 0x4ec   : > { %v1215_v30 = vsel %vm958_vm9, %v1171_v22, %v1173_v18  ;;  %v1214_v33 = vsel %vm958_vm9, %v1169_v19, %v1171_v22 }
 0x4ef   : > { %v1193_v25 = vpop.permute.xlu1 %1192  ;;  %v1165_v27 = vpop.permute.xlu0 %1164 }
 0x4f0   : > { %v1213_v28 = vsel %vm958_vm9, %v1165_v27, %v1167_v17  ;;  %v1212_v29 = vsel %vm958_vm9, %v1163_v16, %v1165_v27 }
 0x4f1   : > { %1251 = vmatprep.subr.bf16.mxu0 %v1213_v28 }
 0x4f2   : > { %1252 = vmatpush1.bf16.msra.mxu0 %v1212_v29 }
 0x4f3   : > { %v1183_v31 = vpop.permute.xlu1 %1182  ;;  %1253 = vmatprep.subr.bf16.mxu0 %v1215_v30  ;;  %v1187_v32 = vpop.permute.xlu0 %1186 }
 0x4f4   : > { %v1219_v38 = vsel %vm958_vm9, %v1183_v31, %v1185_v23  ;;  %v1218_v41 = vsel %vm958_vm9, %v1181_v15, %v1183_v31 }
 0x4f6   : > { %1254 = vmatpush1.bf16.msra.mxu0 %v1214_v33 }
 0x4f7   : > { %v1191_v34 = vpop.permute.xlu1 %1190  ;;  %v1177_v35 = vpop.permute.xlu0 %1176 }
 0x4f8   : > { %v1217_v36 = vsel %vm958_vm9, %v1177_v35, %v1179_v21  ;;  %v1216_v37 = vsel %vm958_vm9, %v1175_v20, %v1177_v35 }
 0x4f9   : > { %1255 = vmatprep.subr.bf16.mxu0 %v1217_v36 }
 0x4fa   : > { %1256 = vmatpush1.bf16.msra.mxu0 %v1216_v37 }
 0x4fb   : > { %v1195_v39 = vpop.permute.xlu1 %1194  ;;  %1257 = vmatprep.subr.bf16.mxu0 %v1219_v38  ;;  %v1199_v40 = vpop.permute.xlu0 %1198 }
 0x4fc   : > { %v1222_v51 = vsel %vm958_vm9, %v1193_v25, %v1195_v39 }
 0x4fe   : > { %1258 = vmatpush1.bf16.msra.mxu0 %v1218_v41 }
 0x4ff   : > { %v1203_v42 = vpop.permute.xlu1 %1202  ;;  %v1189_v44 = vpop.permute.xlu0 %1188 }
 0x500   : > { %v1221_v46 = vsel %vm958_vm9, %v1189_v44, %v1191_v34  ;;  %v1220_v47 = vsel %vm958_vm9, %v1187_v32, %v1189_v44 }
 0x501   : > { %1259 = vmatprep.subr.bf16.mxu0 %v1221_v46 }
 0x502   : > { %1260 = vmatpush1.bf16.msra.mxu0 %v1220_v47 }
 0x503   : > { %v1197_v48 = vpop.permute.xlu0 %1196  ;;  %v1207_v49 = vpop.permute.xlu1 %1206 }
 0x504   : > { %v1223_v50 = vsel %vm958_vm9, %v1195_v39, %v1197_v48 }
 0x505   : > { %1261 = vmatprep.subr.bf16.mxu0 %v1223_v50 }
 0x506   : > { %1262 = vmatpush1.bf16.msra.mxu0 %v1222_v51 }
 0x507   : > { %v1201_v52 = vpop.permute.xlu0 %1200  ;;  %v1205_v55 = vpop.permute.xlu1 %1204 }
 0x508   : > { %v1225_v53 = vsel %vm958_vm9, %v1201_v52, %v1203_v42  ;;  %v1224_v54 = vsel %vm958_vm9, %v1199_v40, %v1201_v52  ;;  %v1226_v58 = vsel %vm958_vm9, %v1205_v55, %v1207_v49 }
 0x509   : > { %1263 = vmatprep.subr.bf16.mxu0 %v1225_v53 }
 0x50a   : > { %1264 = vmatpush1.bf16.msra.mxu0 %v1224_v54 }
 0x50b   : > { %v1209_v56 = vpop.permute.xlu0 %1208 }
 0x50c   : > { %v1227_v57 = vsel %vm958_vm9, %v1207_v49, %v1209_v56 }
 0x50d   : > { %1265 = vmatprep.subr.bf16.mxu0 %v1227_v57 }
 0x50e   : > { %1266 = vmatpush1.bf16.msra.mxu0 %v1226_v58 }
 0x511   : > { %1282 = vmatmul.mubr.bf16.vlgmr.msra.gmra.mrb[24].mxu0 %v3175_v60 }
 0x518   : > { %v1145_v3 = vpop.permute.xlu1 %1144 }
 0x51c   : > { %v1140_v61 = vpop.permute.xlu0 %1139  ;;  %v1328_v28 = vpop.permute.xlu1 %1327 }
 0x520   : > { %v1320_v27 = vpop.permute.xlu0 %1319 }
 0x524   : > { %v1336_v29 = vpop.permute.xlu0 %1335 }
 0x5e4   : > { %v1283_v63 = vpop.f32.mrb[24].mxu0 }
 0x5e5   : > { %v1284_v0 = vadd.f32 %v1283_v63, %v1140_v61  ;;  %v1285_v2 = vpop.f32.mrb[25].mxu0 }
 0x5e6   : > { %v1286_v4 = vadd.f32 %v1285_v2, %v1140_v61  ;;  %v1287_v5 = vpop.f32.mrb[26].mxu0 }
 0x5e7   : > { %vm1292_vm14 = vcmp.ge.f32.partialorder %v1284_v0, 0.0  ;;  %v1296_v6 = vmul.f32 0.25, %v1284_v0  ;;  %v1288_v8 = vadd.f32 %v1287_v5, %v1145_v3  ;;  %v1289_v9 = vpop.f32.mrb[27].mxu0 }
 0x5e8   : > { %vm1293_vm8 = vcmp.ge.f32.partialorder %v1286_v4, 0.0  ;;  %v1297_v10 = vmul.f32 0.25, %v1286_v4  ;;  %v1290_v12 = vadd.f32 %v1289_v9, %v1145_v3  ;;  %v3176_v3 = vld [vmem:[%s4486_s6 + $0x24] ss:$8 sps:$4 sm:$0xff]  }
 0x5e9   : > { %v1300_v13 = vsel %vm1292_vm14, %v1284_v0, %v1296_v6  ;;  %vm1294_vm11 = vcmp.ge.f32.partialorder %v1288_v8, 0.0  ;;  %v1298_v14 = vmul.f32 0.25, %v1288_v8  ;;  %vm4503_vm14 = vcmask 769024  }
 0x5ea   : > { %v1301_v15 = vsel %vm1293_vm8, %v1286_v4, %v1297_v10  ;;  %vm1295_vm13 = vcmp.ge.f32.partialorder %v1290_v12, 0.0  ;;  %v1299_v16 = vmul.f32 0.25, %v1290_v12  ;;  %v1304_v18 = vsel %vm676_vm4, %v1300_v13, 0.0  ;;  %v3047_v10 = vld [vmem:[%s4487_s7 + $0x28] sm:$0xff]  ;;  %v3046_v13 = vld [vmem:[%s4487_s7 + $0x20] sm:$0xff] }
 0x5eb   : > { %v1302_v17 = vsel %vm1294_vm11, %v1288_v8, %v1298_v14  ;;  %v1305_v21 = vsel %vm677_vm6, %v1301_v15, 0.0  ;;  %vm4504_vm8 = vcmask 130048   ;;  %vm4505_vm11 = vmmov %vm4503_vm14 }
 0x5ec   : > { %v1306_v19 = vsel %vm676_vm4, %v1302_v17, 0.0  ;;  %v1303_v20 = vsel %vm1295_vm13, %v1290_v12, %v1299_v16  ;;  %3050 = vmatprep.mubr.msk.bf16.mxu0 %vm4504_vm8, %v3176_v3 }
 0x5ed   : > { %v1308_v22 = vpack.c.bf16 %v1306_v19, %v1304_v18  ;;  %v1307_v23 = vsel %vm677_vm6, %v1303_v20, 0.0 }
 0x5ee   : > { %v1309_v25 = vpack.c.bf16 %v1307_v23, %v1305_v21 }
 0x5ef   : > { %1329 = vrot.lane.b32.xlu1 %v1308_v22, %s3260_s18  ;;  %1321 = vrot.lane.b32.xlu0 %v1308_v22, %s3259_s17 }
 0x5f3   : > { %1343 = vrot.lane.b32.xlu1 %v1308_v22, %s3262_s20  ;;  %1337 = vrot.lane.b32.xlu0 %v1308_v22, %s3261_s19 }
 0x5f7   : > { %1323 = vrot.lane.b32.xlu1 %v1309_v25, %s3259_s17  ;;  %1331 = vrot.lane.b32.xlu0 %v1309_v25, %s3260_s18 }
 0x5fb   : > { %1349 = vrot.lane.b32.xlu1 %v1308_v22, %s3263_s23  ;;  %1357 = vrot.lane.b32.xlu0 %v1308_v22, %s3264_s24 }
 0x5ff   : > { %1339 = vrot.lane.b32.xlu1 %v1309_v25, %s3261_s19  ;;  %1361 = vrot.lane.b32.xlu0 %v3492_v26, %s3264_s24 }
 0x603   : > { %1353 = vrot.lane.b32.xlu1 %v3492_v26, %s3263_s23  ;;  %1345 = vrot.lane.b32.xlu0 %v1309_v25, %s3262_s20 }
 0x607   : > { %1365 = vrot.lane.b32.xlu1 %v1308_v22, %s3265_s25  ;;  %1351 = vrot.lane.b32.xlu0 %v1309_v25, %s3263_s23 }
 0x60b   : > { %1359 = vrot.lane.b32.xlu1 %v1309_v25, %s3264_s24  ;;  %1373 = vrot.lane.b32.xlu0 %v1308_v22, %s3266_s26 }
 0x60f   : > { %1369 = vrot.lane.b32.xlu1 %v3492_v26, %s3265_s25  ;;  %1367 = vrot.lane.b32.xlu0 %v1309_v25, %s3265_s25 }
 0x613   : > { %1375 = vrot.lane.b32.xlu1 %v1309_v25, %s3266_s26  ;;  %1377 = vrot.lane.b32.xlu0 %v3492_v26, %s3266_s26 }
 0x617   : > { %1408 = vrot.lane.b32.xlu1 %v1308_v22, %s3267_s27  ;;  %1410 = vrot.lane.b32.xlu0 %v1309_v25, %s3267_s27 }
 0x61b   : > { %1406 = vrot.lane.b32.xlu1 %v3468_v62, %s3267_s27 }
 0x661   : > { %v1330_v30 = vpop.permute.xlu1 %1329  ;;  %v1322_v31 = vpop.permute.xlu0 %1321 }
 0x662   : > { %v1325_v32 = vsel %vm817_vm15, %v1320_v27, %v1322_v31  ;;  %v1333_v37 = vsel %vm826_vm0, %v1328_v28, %v1330_v30 }
 0x663   : > { %1412 = vrot.lane.b32.xlu0 %v1325_v32, %s3267_s27 }
 0x665   : > { %v1344_v33 = vpop.permute.xlu1 %1343  ;;  %v1338_v34 = vpop.permute.xlu0 %1337 }
 0x666   : > { %1430 = vrot.lane.b32.xlu1 %v1344_v33, %s3267_s27  ;;  %v1341_v38 = vsel %vm835_vm1, %v1336_v29, %v1338_v34 }
 0x669   : > { %v1324_v26 = vpop.permute.xlu1 %1323  ;;  %v1332_v35 = vpop.permute.xlu0 %1331 }
 0x66a   : > { %1416 = vrot.lane.b32.xlu1 %v1324_v26, %s3267_s27  ;;  %1422 = vrot.lane.b32.xlu0 %v1332_v35, %s3267_s27  ;;  %v1334_v44 = vsel %vm826_vm0, %v1330_v30, %v1332_v35  ;;  %v1326_v48 = vsel %vm817_vm15, %v1322_v31, %v1324_v26 }
 0x66d   : > { %v1350_v62 = vpop.permute.xlu1 %1349  ;;  %v1358_v36 = vpop.permute.xlu0 %1357 }
 0x66e   : > { %1418 = vrot.lane.b32.xlu1 %v1333_v37, %s3267_s27  ;;  %1424 = vrot.lane.b32.xlu0 %v1341_v38, %s3267_s27 }
 0x671   : > { %v1340_v39 = vpop.permute.xlu1 %1339  ;;  %v1362_v40 = vpop.permute.xlu0 %1361 }
 0x672   : > { %1428 = vrot.lane.b32.xlu1 %v1340_v39, %s3267_s27  ;;  %v1342_v54 = vsel %vm835_vm1, %v1338_v34, %v1340_v39 }
 0x675   : > { %v1354_v41 = vpop.permute.xlu1 %1353  ;;  %v1346_v42 = vpop.permute.xlu0 %1345 }
 0x676   : > { %1420 = vrot.lane.b32.xlu1 %v1334_v44, %s3267_s27  ;;  %1434 = vrot.lane.b32.xlu0 %v1346_v42, %s3267_s27  ;;  %v1347_v51 = vsel %vm842_vm2, %v1344_v33, %v1346_v42 }
 0x679   : > { %v1366_v46 = vpop.permute.xlu1 %1365  ;;  %v1352_v47 = vpop.permute.xlu0 %1351 }
 0x67a   : > { %1442 = vrot.lane.b32.xlu1 %v1358_v36, %s3267_s27  ;;  %1414 = vrot.lane.b32.xlu0 %v1326_v48, %s3267_s27  ;;  %v1356_v55 = vsel %vm851_vm3, %v1352_v47, %v1354_v41  ;;  %v1355_v63 = vsel %vm851_vm3, %v1350_v62, %v1352_v47 }
 0x67d   : > { %v1360_v49 = vpop.permute.xlu1 %1359  ;;  %v1374_v50 = vpop.permute.xlu0 %1373 }
 0x67e   : > { %1432 = vrot.lane.b32.xlu1 %v1347_v51, %s3267_s27  ;;  %1436 = vrot.lane.b32.xlu0 %v1350_v62, %s3267_s27  ;;  %v1363_v58 = vsel %vm860_vm5, %v1358_v36, %v1360_v49  ;;  %v1364_v5 = vsel %vm860_vm5, %v1360_v49, %v1362_v40 }
 0x681   : > { %v1370_v52 = vpop.permute.xlu1 %1369  ;;  %v1368_v53 = vpop.permute.xlu0 %1367 }
 0x682   : > { %1426 = vrot.lane.b32.xlu0 %v1342_v54, %s3267_s27  ;;  %1440 = vrot.lane.b32.xlu1 %v1356_v55, %s3267_s27  ;;  %v1372_v0 = vsel %vm869_vm7, %v1368_v53, %v1370_v52  ;;  %v1371_v9 = vsel %vm869_vm7, %v1366_v46, %v1368_v53 }
 0x685   : > { %v1376_v56 = vpop.permute.xlu1 %1375  ;;  %v1378_v57 = vpop.permute.xlu0 %1377 }
 0x686   : > { %1448 = vrot.lane.b32.xlu0 %v1366_v46, %s3267_s27  ;;  %1444 = vrot.lane.b32.xlu1 %v1363_v58, %s3267_s27  ;;  %v1379_v6 = vsel %vm4503_vm14, %v1374_v50, %v1376_v56  ;;  %v1380_v12 = vsel %vm4505_vm11, %v1376_v56, %v1378_v57  ;;  %v3178_v56 = vld [vmem:[%s4486_s6 + $0x20] ss:$8 sps:$4 sm:$0xff]  }
 0x689   : > { %v1409_v60 = vpop.permute.xlu1 %1408  ;;  %v1411_v61 = vpop.permute.xlu0 %1410 }
 0x68a   : > { %1438 = vrot.lane.b32.xlu0 %v1355_v63, %s3267_s27  ;;  %1452 = vrot.lane.b32.xlu1 %v1372_v0, %s3267_s27  ;;  %v1461_v2 = vsel %vm958_vm9, %v1409_v60, %v1411_v61 }
 0x68b   : > { %1499 = vmatprep.subr.bf16.mxu0 %v1461_v2 }
 0x68d   : > { %v1407_v4 = vpop.permute.xlu1 %1406 }
 0x68e   : > { %v1460_v8 = vsel %vm958_vm9, %v1407_v4, %v1409_v60  ;;  %1446 = vrot.lane.b32.xlu0 %v1364_v5, %s3267_s27  ;;  %1456 = vrot.lane.b32.xlu1 %v1379_v6, %s3267_s27 }
 0x68f   : > { %1500 = vmatpush1.bf16.msra.mxu0 %v1460_v8 }
 0x692   : > { %1454 = vrot.lane.b32.xlu1 %v1374_v50, %s3267_s27  ;;  %1450 = vrot.lane.b32.xlu0 %v1371_v9, %s3267_s27 }
 0x696   : > { %1394 = vperm.xlu1 %3168, %v3047_v10   ;;  %1458 = vrot.lane.b32.xlu0 %v1380_v12, %s3267_s27 }
 0x69a   : > { %1389 = vperm.xlu0 %3167, %v3046_v13   ;;  %1577 = vrot.lane.b32.xlu1 %v3584_v59, %s3260_s18 }
 0x69e   : > { %1569 = vrot.lane.b32.xlu0 %v3584_v59, %s3259_s17 }
 0x6a2   : > { %1585 = vrot.lane.b32.xlu0 %v3584_v59, %s3261_s19 }
 0x6d5   : > { %v1413_v15 = vpop.permute.xlu0 %1412 }
 0x6d8   : > { %v1431_v14 = vpop.permute.xlu1 %1430 }
 0x6dc   : > { %v1417_v16 = vpop.permute.xlu1 %1416  ;;  %v1423_v17 = vpop.permute.xlu0 %1422 }
 0x6e0   : > { %v1419_v18 = vpop.permute.xlu1 %1418  ;;  %v1425_v19 = vpop.permute.xlu0 %1424 }
 0x6e4   : > { %v1429_v20 = vpop.permute.xlu1 %1428 }
 0x6e8   : > { %v1421_v21 = vpop.permute.xlu1 %1420  ;;  %v1435_v22 = vpop.permute.xlu0 %1434 }
 0x6e9   : > { %v1465_v29 = vsel %vm958_vm9, %v1421_v21, %v1423_v17  ;;  %v1464_v32 = vsel %vm958_vm9, %v1419_v18, %v1421_v21 }
 0x6ec   : > { %v1443_v23 = vpop.permute.xlu1 %1442  ;;  %v1415_v25 = vpop.permute.xlu0 %1414 }
 0x6ed   : > { %v1463_v27 = vsel %vm958_vm9, %v1415_v25, %v1417_v16  ;;  %v1462_v28 = vsel %vm958_vm9, %v1413_v15, %v1415_v25 }
 0x6ee   : > { %1501 = vmatprep.subr.bf16.mxu0 %v1463_v27 }
 0x6ef   : > { %1502 = vmatpush1.bf16.msra.mxu0 %v1462_v28 }
 0x6f0   : > { %v1433_v30 = vpop.permute.xlu1 %1432  ;;  %1503 = vmatprep.subr.bf16.mxu0 %v1465_v29  ;;  %v1437_v31 = vpop.permute.xlu0 %1436 }
 0x6f1   : > { %v1469_v62 = vsel %vm958_vm9, %v1433_v30, %v1435_v22  ;;  %v1468_v38 = vsel %vm958_vm9, %v1431_v14, %v1433_v30 }
 0x6f3   : > { %1504 = vmatpush1.bf16.msra.mxu0 %v1464_v32 }
 0x6f4   : > { %v1441_v33 = vpop.permute.xlu1 %1440  ;;  %v1427_v34 = vpop.permute.xlu0 %1426 }
 0x6f5   : > { %v1467_v26 = vsel %vm958_vm9, %v1427_v34, %v1429_v20  ;;  %v1466_v35 = vsel %vm958_vm9, %v1425_v19, %v1427_v34 }
 0x6f6   : > { %1505 = vmatprep.subr.bf16.mxu0 %v1467_v26 }
 0x6f7   : > { %1506 = vmatpush1.bf16.msra.mxu0 %v1466_v35 }
 0x6f8   : > { %v1445_v36 = vpop.permute.xlu1 %1444  ;;  %1507 = vmatprep.subr.bf16.mxu0 %v1469_v62  ;;  %v1449_v37 = vpop.permute.xlu0 %1448 }
 0x6f9   : > { %v1472_v48 = vsel %vm958_vm9, %v1443_v23, %v1445_v36 }
 0x6fb   : > { %1508 = vmatpush1.bf16.msra.mxu0 %v1468_v38 }
 0x6fc   : > { %v1453_v39 = vpop.permute.xlu1 %1452  ;;  %v1439_v40 = vpop.permute.xlu0 %1438 }
 0x6fd   : > { %v1471_v41 = vsel %vm958_vm9, %v1439_v40, %v1441_v33  ;;  %v1470_v42 = vsel %vm958_vm9, %v1437_v31, %v1439_v40 }
 0x6fe   : > { %1509 = vmatprep.subr.bf16.mxu0 %v1471_v41 }
 0x6ff   : > { %1510 = vmatpush1.bf16.msra.mxu0 %v1470_v42 }
 0x700   : > { %v1447_v44 = vpop.permute.xlu0 %1446  ;;  %v1457_v46 = vpop.permute.xlu1 %1456 }
 0x701   : > { %v1473_v47 = vsel %vm958_vm9, %v1445_v36, %v1447_v44 }
 0x702   : > { %1511 = vmatprep.subr.bf16.mxu0 %v1473_v47 }
 0x703   : > { %1512 = vmatpush1.bf16.msra.mxu0 %v1472_v48 }
 0x704   : > { %v1451_v49 = vpop.permute.xlu0 %1450  ;;  %v1455_v52 = vpop.permute.xlu1 %1454 }
 0x705   : > { %v1475_v50 = vsel %vm958_vm9, %v1451_v49, %v1453_v39  ;;  %v1474_v51 = vsel %vm958_vm9, %v1449_v37, %v1451_v49  ;;  %v1476_v55 = vsel %vm958_vm9, %v1455_v52, %v1457_v46 }
 0x706   : > { %1513 = vmatprep.subr.bf16.mxu0 %v1475_v50 }
 0x707   : > { %1514 = vmatpush1.bf16.msra.mxu0 %v1474_v51 }
 0x708   : > { %v1459_v53 = vpop.permute.xlu0 %1458 }
 0x709   : > { %v1477_v54 = vsel %vm958_vm9, %v1457_v46, %v1459_v53 }
 0x70a   : > { %1515 = vmatprep.subr.bf16.mxu0 %v1477_v54 }
 0x70b   : > { %1516 = vmatpush1.bf16.msra.mxu0 %v1476_v55 }
 0x70e   : > { %1532 = vmatmul.mubr.bf16.vlgmr.msra.gmra.mrb[28].mxu0 %v3178_v56 }
 0x70f   : > { %1934 = vmatprep.mubr.bf16.mxu0 %v3258_v1 }
 0x715   : > { %v1395_v63 = vpop.permute.xlu1 %1394 }
 0x719   : > { %v1390_v57 = vpop.permute.xlu0 %1389  ;;  %v1578_v23 = vpop.permute.xlu1 %1577 }
 0x71d   : > { %v1570_v22 = vpop.permute.xlu0 %1569 }
 0x721   : > { %v1586_v25 = vpop.permute.xlu0 %1585 }
 0x7e1   : > { %v1533_v58 = vpop.f32.mrb[28].mxu0 }
 0x7e2   : > { %v1534_v60 = vadd.f32 %v1533_v58, %v1390_v57  ;;  %v1535_v61 = vpop.f32.mrb[29].mxu0 }
 0x7e3   : > { %v1536_v0 = vadd.f32 %v1535_v61, %v1390_v57  ;;  %v1537_v2 = vpop.f32.mrb[30].mxu0 }
 0x7e4   : > { %vm1542_vm13 = vcmp.ge.f32.partialorder %v1534_v60, 0.0  ;;  %v1546_v3 = vmul.f32 0.25, %v1534_v60  ;;  %v1538_v4 = vadd.f32 %v1537_v2, %v1395_v63  ;;  %v1539_v5 = vpop.f32.mrb[31].mxu0 }
 0x7e5   : > { %vm1543_vm14 = vcmp.ge.f32.partialorder %v1536_v0, 0.0  ;;  %v1547_v6 = vmul.f32 0.25, %v1536_v0  ;;  %v1540_v8 = vadd.f32 %v1539_v5, %v1395_v63 }
 0x7e6   : > { %v1550_v9 = vsel %vm1542_vm13, %v1534_v60, %v1546_v3  ;;  %vm1544_vm8 = vcmp.ge.f32.partialorder %v1538_v4, 0.0  ;;  %v1548_v10 = vmul.f32 0.25, %v1538_v4  ;;  %v3181_v60 = vld [vmem:[%s4486_s6 + $0x34] ss:$8 sps:$4 sm:$0xff]   ;;  %vm4507_vm13 = vcmask 130048  }
 0x7e7   : > { %v1551_v12 = vsel %vm1543_vm14, %v1536_v0, %v1547_v6  ;;  %vm1545_vm11 = vcmp.ge.f32.partialorder %v1540_v8, 0.0  ;;  %v1549_v13 = vmul.f32 0.25, %v1540_v8  ;;  %v1554_v15 = vsel %vm676_vm4, %v1550_v9, 0.0  ;;  %3057 = vmatprep.mubr.msk.bf16.mxu1 %vm4507_vm13, %v3181_v60  ;;  %v1823_v6 = vld [vmem:[%s4489_s9 + $0x8] sm:$0xff]  ;;  %v1825_v9 = vld [vmem:[%s4489_s9 + $0x18] sm:$0xff]  ;;  %v3952_v60 = vld [vmem:[#allocation2 + $0x20] sm:$0xff] }
 0x7e8   : > { %v1552_v14 = vsel %vm1544_vm8, %v1538_v4, %v1548_v10  ;;  %v1555_v18 = vsel %vm677_vm6, %v1551_v12, 0.0  ;;  %v3054_v4 = vld [vmem:[%s4487_s7 + $0x38] sm:$0xff]  ;;  %v1822_v10 = vld [vmem:[%s4489_s9] sm:$0xff]  ;;  %v1827_v12 = vld [vmem:[%s4489_s9 + $0x28] sm:$0xff] }
 0x7e9   : > { %v1556_v16 = vsel %vm676_vm4, %v1552_v14, 0.0  ;;  %v1553_v17 = vsel %vm1545_vm11, %v1540_v8, %v1549_v13  ;;  %v3053_v8 = vld [vmem:[%s4487_s7 + $0x30] sm:$0xff]  ;;  %v1829_v14 = vld [vmem:[%s4489_s9 + $0x38] sm:$0xff]  ;;  %vm4509_vm11 = vmmov %vm4507_vm13 }
 0x7ea   : > { %v1558_v19 = vpack.c.bf16 %v1556_v16, %v1554_v15  ;;  %v1557_v20 = vsel %vm677_vm6, %v1553_v17, 0.0  ;;  %v1824_v13 = vld [vmem:[%s4489_s9 + $0x10] sm:$0xff]  ;;  %v1826_v15 = vld [vmem:[%s4489_s9 + $0x20] sm:$0xff] }
 0x7eb   : > { %v1559_v21 = vpack.c.bf16 %v1557_v20, %v1555_v18  ;;  %v1828_v16 = vld [vmem:[%s4489_s9 + $0x30] sm:$0xff] }
 0x7ec   : > { %1579 = vrot.lane.b32.xlu1 %v1558_v19, %s3260_s18  ;;  %1571 = vrot.lane.b32.xlu0 %v1558_v19, %s3259_s17 }
 0x7f0   : > { %1593 = vrot.lane.b32.xlu1 %v1558_v19, %s3262_s20  ;;  %1587 = vrot.lane.b32.xlu0 %v1558_v19, %s3261_s19 }
 0x7f4   : > { %1573 = vrot.lane.b32.xlu1 %v1559_v21, %s3259_s17  ;;  %1581 = vrot.lane.b32.xlu0 %v1559_v21, %s3260_s18  ;;  %s3268_s18 = smov 16  }
 0x7f8   : > { %1599 = vrot.lane.b32.xlu1 %v1558_v19, %s3263_s23  ;;  %1607 = vrot.lane.b32.xlu0 %v1558_v19, %s3264_s24 }
 0x7fc   : > { %1589 = vrot.lane.b32.xlu1 %v1559_v21, %s3261_s19  ;;  %1611 = vrot.lane.b32.xlu0 %v3608_v24, %s3264_s24 }
 0x800   : > { %1603 = vrot.lane.b32.xlu1 %v3608_v24, %s3263_s23  ;;  %1595 = vrot.lane.b32.xlu0 %v1559_v21, %s3262_s20 }
 0x804   : > { %1615 = vrot.lane.b32.xlu1 %v1558_v19, %s3265_s25  ;;  %1601 = vrot.lane.b32.xlu0 %v1559_v21, %s3263_s23 }
 0x808   : > { %1609 = vrot.lane.b32.xlu1 %v1559_v21, %s3264_s24  ;;  %1623 = vrot.lane.b32.xlu0 %v1558_v19, %s3266_s26 }
 0x80c   : > { %1619 = vrot.lane.b32.xlu1 %v3608_v24, %s3265_s25  ;;  %1617 = vrot.lane.b32.xlu0 %v1559_v21, %s3265_s25  ;;  %s3103_s25 = sshll.u32 %s4531_s22, 5 }
 0x80d   : > { %s413_s13 = scalar_lea.vmem %s4492_s12, %s3103_s25 }
 0x810   : > { %1625 = vrot.lane.b32.xlu1 %v1559_v21, %s3266_s26  ;;  %1627 = vrot.lane.b32.xlu0 %v3608_v24, %s3266_s26 }
 0x814   : > { %1658 = vrot.lane.b32.xlu1 %v1558_v19, %s3267_s27  ;;  %1660 = vrot.lane.b32.xlu0 %v1559_v21, %s3267_s27 }
 0x818   : > { %1656 = vrot.lane.b32.xlu1 %v3584_v59, %s3267_s27 }
 0x85e   : > { %v1580_v27 = vpop.permute.xlu1 %1579  ;;  %v1572_v28 = vpop.permute.xlu0 %1571 }
 0x85f   : > { %v1575_v29 = vsel %vm817_vm15, %v1570_v22, %v1572_v28  ;;  %v1583_v34 = vsel %vm826_vm0, %v1578_v23, %v1580_v27 }
 0x860   : > { %1662 = vrot.lane.b32.xlu0 %v1575_v29, %s3267_s27 }
 0x862   : > { %v1594_v30 = vpop.permute.xlu1 %1593  ;;  %v1588_v31 = vpop.permute.xlu0 %1587 }
 0x863   : > { %1680 = vrot.lane.b32.xlu1 %v1594_v30, %s3267_s27  ;;  %v1591_v26 = vsel %vm835_vm1, %v1586_v25, %v1588_v31 }
 0x866   : > { %v1574_v24 = vpop.permute.xlu1 %1573  ;;  %v1582_v32 = vpop.permute.xlu0 %1581 }
 0x867   : > { %1666 = vrot.lane.b32.xlu1 %v1574_v24, %s3267_s27  ;;  %1672 = vrot.lane.b32.xlu0 %v1582_v32, %s3267_s27  ;;  %v1584_v38 = vsel %vm826_vm0, %v1580_v27, %v1582_v32  ;;  %v1576_v41 = vsel %vm817_vm15, %v1572_v28, %v1574_v24  ;;  %vm4506_vm0 = vcmask 769024  }
 0x86a   : > { %v1600_v59 = vpop.permute.xlu1 %1599  ;;  %v1608_v33 = vpop.permute.xlu0 %1607 }
 0x86b   : > { %1668 = vrot.lane.b32.xlu1 %v1583_v34, %s3267_s27  ;;  %1674 = vrot.lane.b32.xlu0 %v1591_v26, %s3267_s27 }
 0x86e   : > { %v1590_v35 = vpop.permute.xlu1 %1589  ;;  %v1612_v62 = vpop.permute.xlu0 %1611 }
 0x86f   : > { %1678 = vrot.lane.b32.xlu1 %v1590_v35, %s3267_s27  ;;  %v1592_v49 = vsel %vm835_vm1, %v1588_v31, %v1590_v35 }
 0x872   : > { %v1604_v36 = vpop.permute.xlu1 %1603  ;;  %v1596_v37 = vpop.permute.xlu0 %1595 }
 0x873   : > { %1670 = vrot.lane.b32.xlu1 %v1584_v38, %s3267_s27  ;;  %1684 = vrot.lane.b32.xlu0 %v1596_v37, %s3267_s27  ;;  %v1597_v46 = vsel %vm842_vm2, %v1594_v30, %v1596_v37 }
 0x876   : > { %v1616_v39 = vpop.permute.xlu1 %1615  ;;  %v1602_v40 = vpop.permute.xlu0 %1601 }
 0x877   : > { %1692 = vrot.lane.b32.xlu1 %v1608_v33, %s3267_s27  ;;  %1664 = vrot.lane.b32.xlu0 %v1576_v41, %s3267_s27  ;;  %v1606_v50 = vsel %vm851_vm3, %v1602_v40, %v1604_v36  ;;  %v1605_v56 = vsel %vm851_vm3, %v1600_v59, %v1602_v40  ;;  %vm4508_vm3 = vmmov %vm4506_vm0 }
 0x87a   : > { %v1610_v42 = vpop.permute.xlu1 %1609  ;;  %v1624_v44 = vpop.permute.xlu0 %1623 }
 0x87b   : > { %1682 = vrot.lane.b32.xlu1 %v1597_v46, %s3267_s27  ;;  %1686 = vrot.lane.b32.xlu0 %v1600_v59, %s3267_s27  ;;  %v1613_v53 = vsel %vm860_vm5, %v1608_v33, %v1610_v42  ;;  %v1614_v63 = vsel %vm860_vm5, %v1610_v42, %v1612_v62 }
 0x87e   : > { %v1620_v47 = vpop.permute.xlu1 %1619  ;;  %v1618_v48 = vpop.permute.xlu0 %1617 }
 0x87f   : > { %1676 = vrot.lane.b32.xlu0 %v1592_v49, %s3267_s27  ;;  %1690 = vrot.lane.b32.xlu1 %v1606_v50, %s3267_s27  ;;  %v1622_v57 = vsel %vm869_vm7, %v1618_v48, %v1620_v47  ;;  %v1621_v3 = vsel %vm869_vm7, %v1616_v39, %v1618_v48 }
 0x882   : > { %v1626_v51 = vpop.permute.xlu1 %1625  ;;  %v1628_v52 = vpop.permute.xlu0 %1627 }
 0x883   : > { %1698 = vrot.lane.b32.xlu0 %v1616_v39, %s3267_s27  ;;  %1694 = vrot.lane.b32.xlu1 %v1613_v53, %s3267_s27  ;;  %v1629_v0 = vsel %vm4506_vm0, %v1624_v44, %v1626_v51  ;;  %v1630_v5 = vsel %vm4508_vm3, %v1626_v51, %v1628_v52  ;;  %vm4510_vm0 = vmmov %vm4509_vm11 }
 0x884   : > { %vm4511_vm13 = vmmov %vm4510_vm0 }
 0x885   : > { %vm4512_vm3 = vmmov %vm4510_vm0 }
 0x886   : > { %v1659_v54 = vpop.permute.xlu1 %1658  ;;  %v1661_v55 = vpop.permute.xlu0 %1660 }
 0x887   : > { %1688 = vrot.lane.b32.xlu0 %v1605_v56, %s3267_s27  ;;  %1702 = vrot.lane.b32.xlu1 %v1622_v57, %s3267_s27  ;;  %v1711_v58 = vsel %vm958_vm9, %v1659_v54, %v1661_v55  ;;  %v3179_v57 = vld [vmem:[%s4486_s6 + $0x30] ss:$8 sps:$4 sm:$0xff]  }
 0x888   : > { %1749 = vmatprep.subr.bf16.mxu1 %v1711_v58  ;;  %v3950_v58 = vld [vmem:[#allocation2] sm:$0xff] }
 0x88a   : > { %v1657_v61 = vpop.permute.xlu1 %1656 }
 0x88b   : > { %1696 = vrot.lane.b32.xlu0 %v1614_v63, %s3267_s27  ;;  %1706 = vrot.lane.b32.xlu1 %v1629_v0, %s3267_s27  ;;  %v1710_v2 = vsel %vm958_vm9, %v1657_v61, %v1659_v54  ;;  %v3958_v61 = vld [vmem:[#allocation2 + $0x40] sm:$0xff] }
 0x88c   : > { %1750 = vmatpush1.bf16.msra.mxu1 %v1710_v2 }
 0x88f   : > { %1704 = vrot.lane.b32.xlu1 %v1624_v44, %s3267_s27  ;;  %1700 = vrot.lane.b32.xlu0 %v1621_v3, %s3267_s27 }
 0x893   : > { %1644 = vperm.xlu1 %3168, %v3054_v4   ;;  %1708 = vrot.lane.b32.xlu0 %v1630_v5, %s3267_s27 }
 0x897   : > { %1837 = vperm.xlu1 %3168, %v1823_v6   ;;  %1639 = vperm.xlu0 %3167, %v3053_v8  }
 0x89b   : > { %1847 = vperm.xlu1 %3168, %v1825_v9   ;;  %1832 = vperm.xlu0 %3167, %v1822_v10  }
 0x89f   : > { %1857 = vperm.xlu1 %3168, %v1827_v12   ;;  %1842 = vperm.xlu0 %3167, %v1824_v13  }
 0x8a3   : > { %1867 = vperm.xlu1 %3168, %v1829_v14   ;;  %1852 = vperm.xlu0 %3167, %v1826_v15  }
 0x8a7   : > { %1862 = vperm.xlu0 %3167, %v1828_v16   ;;  %2095 = vrot.lane.b32.xlu1 %v3952_v60, %s3268_s18 }
 0x8ab   : > { %2089 = vrot.lane.b32.xlu0 %v3950_v58, %s3268_s18 }
 0x8af   : > { %2101 = vrot.lane.b32.xlu0 %v3958_v61, %s3268_s18 }
 0x8b3   : > { %2181 = vrot.lane.b32.xlu0 %v3950_v58, %s3267_s27 }
 0x8b7   : > { %2193 = vrot.lane.b32.xlu0 %v3958_v61, %s3267_s27 }
 0x8bb   : > { %2275 = vrot.lane.b32.xlu0 %v3950_v58, %s3269_s28 }
 0x8bf   : > { %2287 = vrot.lane.b32.xlu0 %v3958_v61, %s3269_s28 }
 0x8d2   : > { %v1663_v18 = vpop.permute.xlu0 %1662 }
 0x8d5   : > { %v1681_v17 = vpop.permute.xlu1 %1680 }
 0x8d9   : > { %v1667_v19 = vpop.permute.xlu1 %1666  ;;  %v1673_v20 = vpop.permute.xlu0 %1672 }
 0x8dd   : > { %v1669_v21 = vpop.permute.xlu1 %1668  ;;  %v1675_v22 = vpop.permute.xlu0 %1674 }
 0x8e1   : > { %v1679_v23 = vpop.permute.xlu1 %1678 }
 0x8e5   : > { %v1671_v25 = vpop.permute.xlu1 %1670  ;;  %v1685_v27 = vpop.permute.xlu0 %1684 }
 0x8e6   : > { %v1715_v24 = vsel %vm958_vm9, %v1671_v25, %v1673_v20  ;;  %v1714_v33 = vsel %vm958_vm9, %v1669_v21, %v1671_v25  ;;  %v3182_v21 = vld [vmem:[%s4488_s8] sm:$0xff]   ;;  %v3184_v25 = vld [vmem:[%s4488_s8 + $0x10] sm:$0xff]  }
 0x8e9   : > { %v1693_v28 = vpop.permute.xlu1 %1692  ;;  %v1665_v29 = vpop.permute.xlu0 %1664 }
 0x8ea   : > { %v1713_v30 = vsel %vm958_vm9, %v1665_v29, %v1667_v19  ;;  %v1712_v31 = vsel %vm958_vm9, %v1663_v18, %v1665_v29 }
 0x8eb   : > { %1751 = vmatprep.subr.bf16.mxu1 %v1713_v30 }
 0x8ec   : > { %1752 = vmatpush1.bf16.msra.mxu1 %v1712_v31 }
 0x8ed   : > { %v1683_v32 = vpop.permute.xlu1 %1682  ;;  %1753 = vmatprep.subr.bf16.mxu1 %v1715_v24  ;;  %v1687_v59 = vpop.permute.xlu0 %1686 }
 0x8ee   : > { %v1719_v36 = vsel %vm958_vm9, %v1683_v32, %v1685_v27  ;;  %v1718_v39 = vsel %vm958_vm9, %v1681_v17, %v1683_v32  ;;  %v3185_v27 = vld [vmem:[%s4488_s8 + $0x18] sm:$0xff]  }
 0x8f0   : > { %1754 = vmatpush1.bf16.msra.mxu1 %v1714_v33 }
 0x8f1   : > { %v1691_v34 = vpop.permute.xlu1 %1690  ;;  %v1677_v26 = vpop.permute.xlu0 %1676 }
 0x8f2   : > { %v1717_v35 = vsel %vm958_vm9, %v1677_v26, %v1679_v23  ;;  %v1716_v62 = vsel %vm958_vm9, %v1675_v22, %v1677_v26  ;;  %v3183_v23 = vld [vmem:[%s4488_s8 + $0x8] sm:$0xff]  }
 0x8f3   : > { %1755 = vmatprep.subr.bf16.mxu1 %v1717_v35 }
 0x8f4   : > { %1756 = vmatpush1.bf16.msra.mxu1 %v1716_v62 }
 0x8f5   : > { %v1695_v37 = vpop.permute.xlu1 %1694  ;;  %1757 = vmatprep.subr.bf16.mxu1 %v1719_v36  ;;  %v1699_v38 = vpop.permute.xlu0 %1698 }
 0x8f6   : > { %v1722_v49 = vsel %vm958_vm9, %v1693_v28, %v1695_v37  ;;  %v3989_v28 = vld [vmem:[#allocation2 + $0x60] sm:$0xff] }
 0x8f7   : > { %2107 = vrot.lane.b32.xlu1 %v3989_v28, %s3268_s18 }
 0x8f8   : > { %1758 = vmatpush1.bf16.msra.mxu1 %v1718_v39 }
 0x8f9   : > { %v1703_v40 = vpop.permute.xlu1 %1702  ;;  %v1689_v41 = vpop.permute.xlu0 %1688 }
 0x8fa   : > { %v1721_v42 = vsel %vm958_vm9, %v1689_v41, %v1691_v34  ;;  %v1720_v44 = vsel %vm958_vm9, %v1687_v59, %v1689_v41 }
 0x8fb   : > { %1759 = vmatprep.subr.bf16.mxu1 %v1721_v42  ;;  %2187 = vrot.lane.b32.xlu1 %v3952_v60, %s3267_s27 }
 0x8fc   : > { %1760 = vmatpush1.bf16.msra.mxu1 %v1720_v44 }
 0x8fd   : > { %v1697_v46 = vpop.permute.xlu0 %1696  ;;  %v1707_v47 = vpop.permute.xlu1 %1706 }
 0x8fe   : > { %v1723_v48 = vsel %vm958_vm9, %v1695_v37, %v1697_v46 }
 0x8ff   : > { %1761 = vmatprep.subr.bf16.mxu1 %v1723_v48  ;;  %2199 = vrot.lane.b32.xlu1 %v3989_v28, %s3267_s27 }
 0x900   : > { %1762 = vmatpush1.bf16.msra.mxu1 %v1722_v49 }
 0x901   : > { %v1701_v50 = vpop.permute.xlu0 %1700  ;;  %v1705_v53 = vpop.permute.xlu1 %1704 }
 0x902   : > { %v1725_v51 = vsel %vm958_vm9, %v1701_v50, %v1703_v40  ;;  %v1724_v52 = vsel %vm958_vm9, %v1699_v38, %v1701_v50  ;;  %v1726_v56 = vsel %vm958_vm9, %v1705_v53, %v1707_v47 }
 0x903   : > { %1763 = vmatprep.subr.bf16.mxu1 %v1725_v51  ;;  %2281 = vrot.lane.b32.xlu1 %v3952_v60, %s3269_s28 }
 0x904   : > { %1764 = vmatpush1.bf16.msra.mxu1 %v1724_v52 }
 0x905   : > { %v1709_v54 = vpop.permute.xlu0 %1708 }
 0x906   : > { %v1727_v55 = vsel %vm958_vm9, %v1707_v47, %v1709_v54 }
 0x907   : > { %1765 = vmatprep.subr.bf16.mxu1 %v1727_v55 }
 0x908   : > { %1766 = vmatpush1.bf16.msra.mxu1 %v1726_v56 }
 0x90b   : > { %1782 = vmatmul.mubr.bf16.vlgmr.msra.gmra.mrb[0].mxu1 %v3179_v57 }
 0x90c   : > { %2165 = vmatprep.mubr.bf16.mxu1 %v3258_v1 }
 0x912   : > { %v1645_v4 = vpop.permute.xlu1 %1644 }
 0x916   : > { %v1640_v63 = vpop.permute.xlu0 %1639  ;;  %v1838_v32 = vpop.permute.xlu1 %1837 }
 0x91a   : > { %v1833_v29 = vpop.permute.xlu0 %1832  ;;  %v1848_v54 = vpop.permute.xlu1 %1847 }
 0x91e   : > { %v1843_v42 = vpop.permute.xlu0 %1842 }
 0x9de   : > { %v1783_v0 = vpop.f32.mrb[0].mxu1 }
 0x9df   : > { %v1784_v2 = vadd.f32 %v1783_v0, %v1640_v63  ;;  %v1785_v3 = vpop.f32.mrb[1].mxu1 }
 0x9e0   : > { %v1786_v5 = vadd.f32 %v1785_v3, %v1640_v63  ;;  %v1787_v6 = vpop.f32.mrb[2].mxu1 }
 0x9e1   : > { %vm1792_vm5 = vcmp.ge.f32.partialorder %v1784_v2, 0.0  ;;  %v1796_v8 = vmul.f32 0.25, %v1784_v2  ;;  %v1788_v9 = vadd.f32 %v1787_v6, %v1645_v4  ;;  %v1789_v10 = vpop.f32.mrb[3].mxu1 }
 0x9e2   : > { %vm1793_vm7 = vcmp.ge.f32.partialorder %v1786_v5, 0.0  ;;  %v1797_v12 = vmul.f32 0.25, %v1786_v5  ;;  %v1790_v13 = vadd.f32 %v1789_v10, %v1645_v4 }
 0x9e3   : > { %v1800_v14 = vsel %vm1792_vm5, %v1784_v2, %v1796_v8  ;;  %vm1794_vm14 = vcmp.ge.f32.partialorder %v1788_v9, 0.0  ;;  %v1798_v15 = vmul.f32 0.25, %v1788_v9 }
 0x9e4   : > { %v1801_v16 = vsel %vm1793_vm7, %v1786_v5, %v1797_v12  ;;  %vm1795_vm8 = vcmp.ge.f32.partialorder %v1790_v13, 0.0  ;;  %v1799_v17 = vmul.f32 0.25, %v1790_v13  ;;  %v1853_v12 = vpop.permute.xlu0 %1852 }
 0x9e5   : > { %v1802_v18 = vsel %vm1794_vm14, %v1788_v9, %v1798_v15 }
 0x9e6   : > { %v1803_v19 = vsel %vm1795_vm8, %v1790_v13, %v1799_v17  ;;  %v3223_v22 = vpack.c.bf16 %v1802_v18, %v1800_v14 }
 0x9e7   : > { %v3220_v20 = vpack.c.bf16 %v1803_v19, %v1801_v16 }
 0x9e9   : > { %3221 = vmatprep.subr.msk.bf16.mxu0 %vm3437_vm10, %v3220_v20 }
 0x9ea   : > { %3224 = vmatpush1.bf16.msk.msra.mxu0 %vm3446_vm12, %v3223_v22  ;;  %v1858_v22 = vpop.permute.xlu1 %1857 }
 0x9ed   : > { %3062 = vmatmul.mubr.msk.bf16.vlgmr.msra.gmra.mrb[32].mxu0 %vm4509_vm11, %v3182_v21 }
 0x9ee   : > { %1944 = vmatprep.mubr.bf16.mxu0 %v3258_v1 }
 0x9f5   : > { %3063 = vmatmul.mubr.msk.bf16.gmra.mrb[36].mxu0 %vm4510_vm0, %v3183_v23 }
 0x9f6   : > { %1954 = vmatprep.mubr.bf16.mxu0 %v3258_v1 }
 0x9fd   : > { %3064 = vmatmul.mubr.msk.bf16.gmra.mrb[40].mxu0 %vm4511_vm13, %v3184_v25 }
 0x9fe   : > { %1964 = vmatprep.mubr.bf16.mxu0 %v3258_v1 }
 0xa05   : > { %3065 = vmatmul.mubr.msk.bf16.gmra.mrb[44].mxu0 %vm4512_vm3, %v3185_v27 }
 0xac0   : > { %v1936_v30 = vpop.f32.mrb[32].mxu0 }
 0xac1   : > { %v1937_v31 = vadd.f32 %v1936_v30, %v1833_v29  ;;  %v1938_v24 = vpop.f32.mrb[33].mxu0 }
 0xac2   : > { %v1939_v59 = vadd.f32 %v1938_v24, %v1833_v29  ;;  %v1940_v33 = vpop.f32.mrb[34].mxu0 }
 0xac3   : > { %vm1975_vm5 = vcmp.ge.f32.partialorder %v1937_v31, 0.0  ;;  %v1991_v34 = vmul.f32 0.25, %v1937_v31  ;;  %v1941_v26 = vadd.f32 %v1940_v33, %v1838_v32  ;;  %v1942_v35 = vpop.f32.mrb[35].mxu0 }
 0xac4   : > { %vm1976_vm7 = vcmp.ge.f32.partialorder %v1939_v59, 0.0  ;;  %v1992_v62 = vmul.f32 0.25, %v1939_v59  ;;  %v1943_v36 = vadd.f32 %v1942_v35, %v1838_v32 }
 0xac5   : > { %v4003_v37 = vsel %vm1975_vm5, %v1937_v31, %v1991_v34  ;;  %vm1977_vm14 = vcmp.ge.f32.partialorder %v1941_v26, 0.0  ;;  %v1993_v38 = vmul.f32 0.25, %v1941_v26 }
 0xac6   : > { %v4005_v39 = vsel %vm1976_vm7, %v1939_v59, %v1992_v62  ;;  %vm1978_vm8 = vcmp.ge.f32.partialorder %v1943_v36, 0.0  ;;  %v1994_v40 = vmul.f32 0.25, %v1943_v36  ;;  %v2023_v44 = vsel %vm676_vm4, %v4003_v37, 0.0  ;;  %v1863_v62 = vpop.permute.xlu0 %1862 }
 0xac7   : > { %v4007_v41 = vsel %vm1977_vm14, %v1941_v26, %v1993_v38  ;;  %v2024_v49 = vsel %vm677_vm6, %v4005_v39, 0.0 }
 0xac8   : > { %v2025_v46 = vsel %vm676_vm4, %v4007_v41, 0.0  ;;  %v4015_v47 = vsel %vm1978_vm8, %v1943_v36, %v1994_v40  ;;  %v1946_v48 = vpop.f32.mrb[36].mxu0 }
 0xac9   : > { %v4020_v50 = vpack.c.bf16 %v2025_v46, %v2023_v44  ;;  %v2026_v51 = vsel %vm677_vm6, %v4015_v47, 0.0  ;;  %v1947_v52 = vadd.f32 %v1946_v48, %v1843_v42  ;;  %v1948_v53 = vpop.f32.mrb[37].mxu0 }
 0xaca   : > { %v4025_v55 = vpack.c.bf16 %v2026_v51, %v2024_v49  ;;  %v1949_v56 = vadd.f32 %v1948_v53, %v1843_v42  ;;  %v1950_v57 = vpop.f32.mrb[38].mxu0 }
 0xacb   : > { %vm1979_vm11 = vcmp.ge.f32.partialorder %v1947_v52, 0.0  ;;  %v1995_v63 = vmul.f32 0.25, %v1947_v52  ;;  %v1951_v0 = vadd.f32 %v1950_v57, %v1848_v54  ;;  %v1952_v2 = vpop.f32.mrb[39].mxu0  ;;  %2091 = vrot.lane.b32.xlu0 %v4020_v50, %s3268_s18 }
 0xacc   : > { %vm1980_vm0 = vcmp.ge.f32.partialorder %v1949_v56, 0.0  ;;  %v1996_v3 = vmul.f32 0.25, %v1949_v56  ;;  %v1953_v4 = vadd.f32 %v1952_v2, %v1848_v54  ;;  %2093 = vrot.lane.b32.xlu1 %v4025_v55, %s3268_s18 }
 0xacd   : > { %v4031_v5 = vsel %vm1979_vm11, %v1947_v52, %v1995_v63  ;;  %vm1981_vm13 = vcmp.ge.f32.partialorder %v1951_v0, 0.0  ;;  %v1997_v6 = vmul.f32 0.25, %v1951_v0  ;;  %v1868_v52 = vpop.permute.xlu1 %1867 }
 0xace   : > { %v4033_v8 = vsel %vm1980_vm0, %v1949_v56, %v1996_v3  ;;  %vm1982_vm3 = vcmp.ge.f32.partialorder %v1953_v4, 0.0  ;;  %v1998_v9 = vmul.f32 0.25, %v1953_v4  ;;  %v2027_v13 = vsel %vm676_vm4, %v4031_v5, 0.0 }
 0xacf   : > { %v4035_v10 = vsel %vm1981_vm13, %v1951_v0, %v1997_v6  ;;  %2183 = vrot.lane.b32.xlu0 %v4020_v50, %s3267_s27  ;;  %v2028_v17 = vsel %vm677_vm6, %v4033_v8, 0.0 }
 0xad0   : > { %v2029_v14 = vsel %vm676_vm4, %v4035_v10, 0.0  ;;  %v4045_v15 = vsel %vm1982_vm3, %v1953_v4, %v1998_v9  ;;  %v1956_v16 = vpop.f32.mrb[40].mxu0  ;;  %2185 = vrot.lane.b32.xlu1 %v4025_v55, %s3267_s27 }
 0xad1   : > { %v4052_v18 = vpack.c.bf16 %v2029_v14, %v2027_v13  ;;  %v2030_v19 = vsel %vm677_vm6, %v4045_v15, 0.0  ;;  %v1957_v20 = vadd.f32 %v1956_v16, %v1853_v12  ;;  %v1958_v21 = vpop.f32.mrb[41].mxu0 }
 0xad2   : > { %v4057_v23 = vpack.c.bf16 %v2030_v19, %v2028_v17  ;;  %v1959_v25 = vadd.f32 %v1958_v21, %v1853_v12  ;;  %v1960_v27 = vpop.f32.mrb[42].mxu0 }
 0xad3   : > { %vm1983_vm5 = vcmp.ge.f32.partialorder %v1957_v20, 0.0  ;;  %v1999_v29 = vmul.f32 0.25, %v1957_v20  ;;  %v1961_v30 = vadd.f32 %v1960_v27, %v1858_v22  ;;  %v1962_v31 = vpop.f32.mrb[43].mxu0  ;;  %2277 = vrot.lane.b32.xlu0 %v4020_v50, %s3269_s28 }
 0xad4   : > { %vm1984_vm7 = vcmp.ge.f32.partialorder %v1959_v25, 0.0  ;;  %v2000_v24 = vmul.f32 0.25, %v1959_v25  ;;  %v1963_v32 = vadd.f32 %v1962_v31, %v1858_v22  ;;  %2279 = vrot.lane.b32.xlu1 %v4025_v55, %s3269_s28 }
 0xad5   : > { %v4063_v59 = vsel %vm1983_vm5, %v1957_v20, %v1999_v29  ;;  %vm1985_vm14 = vcmp.ge.f32.partialorder %v1961_v30, 0.0  ;;  %v2001_v33 = vmul.f32 0.25, %v1961_v30 }
 0xad6   : > { %v4065_v34 = vsel %vm1984_vm7, %v1959_v25, %v2000_v24  ;;  %vm1986_vm8 = vcmp.ge.f32.partialorder %v1963_v32, 0.0  ;;  %v2002_v26 = vmul.f32 0.25, %v1963_v32  ;;  %v2031_v36 = vsel %vm676_vm4, %v4063_v59, 0.0  ;;  %v4187_v25 = vld [vmem:[#allocation2 + $0x78] sm:$0xff] }
 0xad7   : > { %v4067_v35 = vsel %vm1985_vm14, %v1961_v30, %v2001_v33  ;;  %2099 = vrot.lane.b32.xlu0 %v4057_v23, %s3268_s18  ;;  %v2032_v44 = vsel %vm677_vm6, %v4065_v34, 0.0 }
 0xad8   : > { %v2033_v38 = vsel %vm676_vm4, %v4067_v35, 0.0  ;;  %v4077_v40 = vsel %vm1986_vm8, %v1963_v32, %v2002_v26  ;;  %v1966_v42 = vpop.f32.mrb[44].mxu0  ;;  %2097 = vrot.lane.b32.xlu1 %v4052_v18, %s3268_s18 }
 0xad9   : > { %v4084_v46 = vpack.c.bf16 %v2033_v38, %v2031_v36  ;;  %v2034_v48 = vsel %vm677_vm6, %v4077_v40, 0.0  ;;  %v1967_v49 = vadd.f32 %v1966_v42, %v1863_v62  ;;  %v1968_v51 = vpop.f32.mrb[45].mxu0 }
 0xada   : > { %v4089_v53 = vpack.c.bf16 %v2034_v48, %v2032_v44  ;;  %v1969_v54 = vadd.f32 %v1968_v51, %v1863_v62  ;;  %v1970_v56 = vpop.f32.mrb[46].mxu0 }
 0xadb   : > { %vm1987_vm11 = vcmp.ge.f32.partialorder %v1967_v49, 0.0  ;;  %v2003_v57 = vmul.f32 0.25, %v1967_v49  ;;  %v1971_v63 = vadd.f32 %v1970_v56, %v1868_v52  ;;  %v1972_v0 = vpop.f32.mrb[47].mxu0  ;;  %2191 = vrot.lane.b32.xlu0 %v4057_v23, %s3267_s27 }
 0xadc   : > { %vm1988_vm0 = vcmp.ge.f32.partialorder %v1969_v54, 0.0  ;;  %v2004_v2 = vmul.f32 0.25, %v1969_v54  ;;  %v1973_v3 = vadd.f32 %v1972_v0, %v1868_v52  ;;  %2189 = vrot.lane.b32.xlu1 %v4052_v18, %s3267_s27 }
 0xadd   : > { %v4095_v4 = vsel %vm1987_vm11, %v1967_v49, %v2003_v57  ;;  %vm1989_vm13 = vcmp.ge.f32.partialorder %v1971_v63, 0.0  ;;  %v2005_v6 = vmul.f32 0.25, %v1971_v63 }
 0xade   : > { %v4097_v9 = vsel %vm1988_vm0, %v1969_v54, %v2004_v2  ;;  %vm1990_vm3 = vcmp.ge.f32.partialorder %v1973_v3, 0.0  ;;  %v2006_v12 = vmul.f32 0.25, %v1973_v3  ;;  %v2035_v14 = vsel %vm676_vm4, %v4095_v4, 0.0 }
 0xadf   : > { %v4099_v13 = vsel %vm1989_vm13, %v1971_v63, %v2005_v6  ;;  %2285 = vrot.lane.b32.xlu0 %v4057_v23, %s3269_s28  ;;  %v2036_v19 = vsel %vm677_vm6, %v4097_v9, 0.0  ;;  %vm4521_vm13 = vcmask 523264  }
 0xae0   : > { %v2037_v16 = vsel %vm676_vm4, %v4099_v13, 0.0  ;;  %v4109_v17 = vsel %vm1990_vm3, %v1973_v3, %v2006_v12  ;;  %2283 = vrot.lane.b32.xlu1 %v4052_v18, %s3269_s28  ;;  %vm4513_vm4 = vcmask 130048   ;;  %vm2299_vm3 = vcmask 121856  }
 0xae1   : > { %v4116_v20 = vpack.c.bf16 %v2037_v16, %v2035_v14  ;;  %v2038_v21 = vsel %vm677_vm6, %v4109_v17, 0.0  ;;  %vm4514_vm6 = vmmov %vm4513_vm4 }
 0xae2   : > { %v4121_v22 = vpack.c.bf16 %v2038_v21, %v2036_v19  ;;  %vm4515_vm5 = vmmov %vm4513_vm4 }
 0xae3   : > { %2103 = vrot.lane.b32.xlu0 %v4084_v46, %s3268_s18  ;;  %vm4516_vm7 = vmmov %vm4513_vm4 }
 0xae4   : > { %2105 = vrot.lane.b32.xlu1 %v4089_v53, %s3268_s18  ;;  %vm4517_vm14 = vmmov %vm4513_vm4 }
 0xae5   : > { %vm4518_vm8 = vmmov %vm4513_vm4 }
 0xae6   : > { %vm4519_vm11 = vmmov %vm4513_vm4 }
 0xae7   : > { %2195 = vrot.lane.b32.xlu0 %v4084_v46, %s3267_s27  ;;  %vm4520_vm0 = vmmov %vm4513_vm4 }
 0xae8   : > { %2197 = vrot.lane.b32.xlu1 %v4089_v53, %s3267_s27 }
 0xaeb   : > { %2289 = vrot.lane.b32.xlu0 %v4084_v46, %s3269_s28 }
 0xaec   : > { %2291 = vrot.lane.b32.xlu1 %v4089_v53, %s3269_s28 }
 0xaef   : > { %2111 = vrot.lane.b32.xlu0 %v4121_v22, %s3268_s18 }
 0xaf0   : > { %2109 = vrot.lane.b32.xlu1 %v4116_v20, %s3268_s18 }
 0xaf3   : > { %2376 = vrot.lane.b32.xlu0 %v4020_v50, %s3270_s29 }
 0xaf4   : > { %2293 = vrot.lane.b32.xlu1 %v3989_v28, %s3269_s28 }
 0xaf7   : > { %2374 = vrot.lane.b32.xlu0 %v3950_v58, %s3270_s29  ;;  %v2090_v58 = vpop.permute.xlu0 %2089 }
 0xaf8   : > { %2201 = vrot.lane.b32.xlu1 %v4116_v20, %s3267_s27 }
 0xafb   : > { %2384 = vrot.lane.b32.xlu0 %v4057_v23, %s3270_s29 }
 0xafc   : > { %2295 = vrot.lane.b32.xlu1 %v4116_v20, %s3269_s28 }
 0xaff   : > { %2203 = vrot.lane.b32.xlu0 %v4121_v22, %s3267_s27  ;;  %s3271_s27 = smov 113  }
 0xb00   : > { %2378 = vrot.lane.b32.xlu1 %v4025_v55, %s3270_s29 }
 0xb03   : > { %2388 = vrot.lane.b32.xlu0 %v4084_v46, %s3270_s29 }
 0xb04   : > { %2382 = vrot.lane.b32.xlu1 %v4052_v18, %s3270_s29 }
 0xb07   : > { %2386 = vrot.lane.b32.xlu0 %v3958_v61, %s3270_s29  ;;  %v2096_v61 = vpop.permute.xlu1 %2095 }
 0xb08   : > { %2380 = vrot.lane.b32.xlu1 %v3952_v60, %s3270_s29  ;;  %v4177_v60 = vpop.permute.xlu0 %2101 }
 0xb0b   : > { %2557 = vrot.lane.b32.xlu0 %v4025_v55, %s3259_s17  ;;  %v4191_v29 = vpop.permute.xlu1 %2107 }
 0xb0c   : > { %2390 = vrot.lane.b32.xlu1 %v4089_v53, %s3270_s29  ;;  %v4189_v27 = vpop.permute.xlu0 %2181 }
 0xb0f   : > { %2297 = vrot.lane.b32.xlu0 %v4121_v22, %s3269_s28  ;;  %v4203_v31 = vpop.permute.xlu1 %2187 }
 0xb10   : > { %2394 = vrot.lane.b32.xlu1 %v4116_v20, %s3270_s29  ;;  %v4199_v30 = vpop.permute.xlu0 %2193 }
 0xb13   : > { %2555 = vrot.lane.b32.xlu0 %v4020_v50, %s3259_s17  ;;  %v4211_v32 = vpop.permute.xlu1 %2199 }
 0xb14   : > { %2392 = vrot.lane.b32.xlu1 %v3989_v28, %s3270_s29  ;;  %v4181_v28 = vld [vmem:[#allocation2 + $0x58] sm:$0xff]  ;;  %v4209_v24 = vpop.permute.xlu0 %2275 }
 0xb17   : > { %2565 = vrot.lane.b32.xlu0 %v4164_v43, %s3259_s17  ;;  %v4223_v26 = vpop.permute.xlu1 %2281 }
 0xb18   : > { %2559 = vrot.lane.b32.xlu1 %v4166_v45, %s3259_s17  ;;  %v4219_v33 = vpop.permute.xlu0 %2287 }
 0xb1b   : > { %2569 = vrot.lane.b32.xlu0 %v4089_v53, %s3259_s17 }
 0xb1c   : > { %2563 = vrot.lane.b32.xlu1 %v4057_v23, %s3259_s17 }
 0xb1f   : > { %2396 = vrot.lane.b32.xlu0 %v4121_v22, %s3270_s29 }
 0xb20   : > { %2561 = vrot.lane.b32.xlu1 %v4052_v18, %s3259_s17 }
 0xb23   : > { %2567 = vrot.lane.b32.xlu0 %v4084_v46, %s3259_s17 }
 0xb24   : > { %2571 = vrot.lane.b32.xlu1 %v4181_v28, %s3259_s17 }
 0xb27   : > { %2577 = vrot.lane.b32.xlu0 %v4187_v25, %s3259_s17 }
 0xb28   : > { %2573 = vrot.lane.b32.xlu1 %v4116_v20, %s3259_s17 }
 0xb2b   : > { %2655 = vrot.lane.b32.xlu0 %v4025_v55, %s3271_s27 }
 0xb2c   : > { %2657 = vrot.lane.b32.xlu1 %v4166_v45, %s3271_s27 }
 0xb2f   : > { %2653 = vrot.lane.b32.xlu0 %v4020_v50, %s3271_s27 }
 0xb30   : > { %2661 = vrot.lane.b32.xlu1 %v4057_v23, %s3271_s27 }
 0xb33   : > { %2663 = vrot.lane.b32.xlu0 %v4164_v43, %s3271_s27 }
 0xb34   : > { %2659 = vrot.lane.b32.xlu1 %v4052_v18, %s3271_s27 }
 0xb37   : > { %2667 = vrot.lane.b32.xlu0 %v4089_v53, %s3271_s27 }
 0xb38   : > { %2669 = vrot.lane.b32.xlu1 %v4181_v28, %s3271_s27 }
 0xb3b   : > { %2665 = vrot.lane.b32.xlu0 %v4084_v46, %s3271_s27 }
 0xb3c   : > { %2671 = vrot.lane.b32.xlu1 %v4116_v20, %s3271_s27 }
 0xb3d   : > { %v2092_v62 = vpop.permute.xlu0 %2091 }
 0xb3e   : > { %v2094_v36 = vpop.permute.xlu1 %2093  ;;  %v2114_v42 = vsel %vm4514_vm6, %v2090_v58, %v2092_v62 }
 0xb3f   : > { %2675 = vrot.lane.b32.xlu0 %v4187_v25, %s3271_s27  ;;  %v2115_v38 = vsel %vm4513_vm4, %v2092_v62, %v2094_v36  ;;  %vm2398_vm4 = vcmask 7168  }
 0xb40   : > { %2575 = vrot.lane.b32.xlu1 %v4121_v22, %s3259_s17  ;;  %2133 = vmatprep.subr.bf16.mxu1 %v2115_v38 }
 0xb41   : > { %2134 = vmatpush1.bf16.msra.mxu1 %v2114_v42  ;;  %v2184_v44 = vpop.permute.xlu0 %2183 }
 0xb42   : > { %v2186_v48 = vpop.permute.xlu1 %2185 }
 0xb43   : > { %2754 = vrot.lane.b32.xlu0 %v4025_v55, %s3261_s19  ;;  %v2206_v38 = vsel %vm958_vm9, %v2184_v44, %v2186_v48 }
 0xb44   : > { %2756 = vrot.lane.b32.xlu1 %v4166_v45, %s3261_s19 }
 0xb45   : > { %v4239_v49 = vpop.permute.xlu0 %2277 }
 0xb46   : > { %v4241_v51 = vpop.permute.xlu1 %2279 }
 0xb47   : > { %2752 = vrot.lane.b32.xlu0 %v4020_v50, %s3261_s19 }
 0xb48   : > { %2760 = vrot.lane.b32.xlu1 %v4057_v23, %s3261_s19 }
 0xb49   : > { %v2100_v52 = vpop.permute.xlu0 %2099 }
 0xb4a   : > { %v2098_v54 = vpop.permute.xlu1 %2097 }
 0xb4b   : > { %v2116_v56 = vsel %vm4515_vm5, %v2096_v61, %v2098_v54  ;;  %2762 = vrot.lane.b32.xlu0 %v4164_v43, %s3261_s19  ;;  %v2117_v57 = vsel %vm4516_vm7, %v2098_v54, %v2100_v52 }
 0xb4c   : > { %2758 = vrot.lane.b32.xlu1 %v4052_v18, %s3261_s19  ;;  %2135 = vmatprep.subr.bf16.mxu1 %v2117_v57  ;;  %v2941_v57 = vld [vmem:[%s4491_s11 + $0x8] sm:$0xff] }
 0xb4d   : > { %2136 = vmatpush1.bf16.msra.mxu1 %v2116_v56  ;;  %v2192_v63 = vpop.permute.xlu0 %2191  ;;  %v2301_v56 = vsel %vm2299_vm3, %v4239_v49, %v4241_v51 }
 0xb4e   : > { %v2190_v0 = vpop.permute.xlu1 %2189 }
 0xb4f   : > { %2766 = vrot.lane.b32.xlu0 %v4089_v53, %s3261_s19 }
 0xb50   : > { %2673 = vrot.lane.b32.xlu1 %v4121_v22, %s3271_s27 }
 0xb51   : > { %v4257_v2 = vpop.permute.xlu0 %2285 }
 0xb52   : > { %v4259_v3 = vpop.permute.xlu1 %2283 }
 0xb53   : > { %2764 = vrot.lane.b32.xlu0 %v4084_v46, %s3261_s19 }
 0xb54   : > { %2768 = vrot.lane.b32.xlu1 %v4181_v28, %s3261_s19 }
 0xb55   : > { %v2104_v6 = vpop.permute.xlu0 %2103 }
 0xb56   : > { %v2106_v12 = vpop.permute.xlu1 %2105  ;;  %v2118_v16 = vsel %vm4518_vm8, %v4177_v60, %v2104_v6 }
 0xb57   : > { %2774 = vrot.lane.b32.xlu0 %v4187_v25, %s3261_s19  ;;  %v2119_v14 = vsel %vm4517_vm14, %v2104_v6, %v2106_v12  ;;  %v2302_v6 = vsel %vm2299_vm3, %v4223_v26, %v4259_v3 }
 0xb58   : > { %2770 = vrot.lane.b32.xlu1 %v4116_v20, %s3261_s19  ;;  %2137 = vmatprep.subr.bf16.mxu1 %v2119_v14 }
 0xb59   : > { %2138 = vmatpush1.bf16.msra.mxu1 %v2118_v16  ;;  %v2196_v19 = vpop.permute.xlu0 %2195 }
 0xb5a   : > { %v2198_v21 = vpop.permute.xlu1 %2197  ;;  %v2209_v52 = vsel %vm958_vm9, %v4199_v30, %v2196_v19 }
 0xb5b   : > { %2852 = vrot.lane.b32.xlu0 %v4025_v55, %s3262_s20 }
 0xb5c   : > { %2854 = vrot.lane.b32.xlu1 %v4166_v45, %s3262_s20 }
 0xb5d   : > { %v4276_v58 = vpop.permute.xlu0 %2289 }
 0xb5e   : > { %v4278_v61 = vpop.permute.xlu1 %2291 }
 0xb5f   : > { %2850 = vrot.lane.b32.xlu0 %v4020_v50, %s3262_s20  ;;  %v3186_v50 = vld [vmem:[%s4490_s10 + $0x8] sm:$0xff]  }
 0xb60   : > { %2772 = vrot.lane.b32.xlu1 %v4121_v22, %s3261_s19 }
 0xb61   : > { %v2112_v60 = vpop.permute.xlu0 %2111 }
 0xb62   : > { %v2110_v62 = vpop.permute.xlu1 %2109 }
 0xb63   : > { %v2120_v36 = vsel %vm4519_vm11, %v4191_v29, %v2110_v62  ;;  %2860 = vrot.lane.b32.xlu0 %v4164_v43, %s3262_s20  ;;  %v2121_v55 = vsel %vm4520_vm0, %v2110_v62, %v2112_v60  ;;  %v2205_v43 = vsel %vm958_vm9, %v4189_v27, %v2184_v44  ;;  %v2208_v29 = vsel %vm958_vm9, %v2190_v0, %v2192_v63 }
 0xb64   : > { %2858 = vrot.lane.b32.xlu1 %v4057_v23, %s3262_s20  ;;  %2139 = vmatprep.subr.bf16.mxu1 %v2121_v55  ;;  %v2210_v27 = vsel %vm958_vm9, %v2196_v19, %v2198_v21 }
 0xb65   : > { %2140 = vmatpush1.bf16.msra.mxu1 %v2120_v36  ;;  %v4294_v45 = vpop.permute.xlu0 %2376 }
 0xb66   : > { %v4297_v42 = vpop.permute.xlu1 %2293  ;;  %2224 = vmatprep.subr.bf16.mxu1 %v2206_v38 }
 0xb67   : > { %2864 = vrot.lane.b32.xlu0 %v4089_v53, %s3262_s20  ;;  %v2207_v53 = vsel %vm958_vm9, %v4203_v31, %v2190_v0  ;;  %v2303_v0 = vsel %vm2299_vm3, %v4259_v3, %v4257_v2  ;;  %v2304_v2 = vsel %vm2299_vm3, %v4219_v33, %v4276_v58  ;;  %v3188_v3 = vld [vmem:[%s4490_s10 + $0x10] sm:$0xff]  }
 0xb68   : > { %2856 = vrot.lane.b32.xlu1 %v4052_v18, %s3262_s20  ;;  %3069 = vmatmul.mubr.msk.bf16.vlgmr.msra.gmra.mrb[4].mxu1 %vm4521_vm13, %v3186_v50 }
 0xb69   : > { %2225 = vmatpush1.bf16.msra.mxu1 %v2205_v43  ;;  %v4306_v23 = vpop.permute.xlu0 %2374  ;;  %2256 = vmatprep.mubr.bf16.mxu1 %v3258_v1 }
 0xb6a   : > { %v2202_v48 = vpop.permute.xlu1 %2201  ;;  %2226 = vmatprep.subr.bf16.mxu1 %v2208_v29 }
 0xb6b   : > { %2862 = vrot.lane.b32.xlu0 %v4084_v46, %s3262_s20  ;;  %v2940_v46 = vld [vmem:[%s4491_s11] sm:$0xff] }
 0xb6c   : > { %2866 = vrot.lane.b32.xlu1 %v4181_v28, %s3262_s20 }
 0xb6d   : > { %2227 = vmatpush1.bf16.msra.mxu1 %v2207_v53  ;;  %v2385_v18 = vpop.permute.xlu0 %2384  ;;  %v3189_v53 = vld [vmem:[%s4490_s10 + $0x18] sm:$0xff]  }
 0xb6e   : > { %v2296_v44 = vpop.permute.xlu1 %2295  ;;  %2228 = vmatprep.subr.bf16.mxu1 %v2210_v27 }
 0xb6f   : > { %2872 = vrot.lane.b32.xlu0 %v4187_v25, %s3262_s20  ;;  %v2211_v25 = vsel %vm958_vm9, %v4211_v32, %v2202_v48  ;;  %v2306_v26 = vsel %vm2299_vm3, %v4297_v42, %v2296_v44 }
 0xb70   : > { %2870 = vrot.lane.b32.xlu1 %v4121_v22, %s3262_s20  ;;  %v3187_v22 = vld [vmem:[%s4490_s10] sm:$0xff]  }
 0xb71   : > { %2229 = vmatpush1.bf16.msra.mxu1 %v2209_v52  ;;  %v2204_v28 = vpop.permute.xlu0 %2203  ;;  %v3229_v52 = vpack.c.bf16 %v4007_v41, %v4003_v37 }
 0xb72   : > { %v2379_v31 = vpop.permute.xlu1 %2378  ;;  %v2212_v54 = vsel %vm958_vm9, %v2202_v48, %v2204_v28  ;;  %vm4522_vm9 = vmmov %vm4521_vm13 }
 0xb73   : > { %2944 = vperm.xlu0 %3167, %v2940_v46   ;;  %2230 = vmatprep.subr.bf16.mxu1 %v2212_v54  ;;  %vm4523_vm6 = vmmov %vm4522_vm9 }
 0xb74   : > { %2868 = vrot.lane.b32.xlu1 %v4116_v20, %s3262_s20  ;;  %v2300_v20 = vsel %vm2299_vm3, %v4209_v24, %v4239_v49  ;;  %v2305_v24 = vsel %vm2299_vm3, %v4276_v58, %v4278_v61  ;;  %v2400_v61 = vsel %vm2398_vm4, %v4294_v45, %v2379_v31  ;;  %v2399_v58 = vsel %vm2398_vm4, %v4306_v23, %v4294_v45  ;;  %vm4524_vm5 = vmmov %vm4523_vm6 }
 0xb75   : > { %2231 = vmatpush1.bf16.msra.mxu1 %v2211_v25  ;;  %v2389_v30 = vpop.permute.xlu0 %2388  ;;  %v3232_v31 = vpack.c.bf16 %v4045_v15, %v4033_v8  ;;  %v3241_v8 = vpack.c.bf16 %v4067_v35, %v4063_v59  ;;  %vm4526_vm7 = vmmov %vm4524_vm5 }
 0xb76   : > { %v2383_v63 = vpop.permute.xlu1 %2382  ;;  %2319 = vmatprep.subr.bf16.mxu1 %v2301_v56  ;;  %vm4528_vm14 = vmmov %vm4524_vm5 }
 0xb77   : > { %v2402_v62 = vsel %vm2398_vm4, %v2383_v63, %v2385_v18 }
 0xb78   : > { %2949 = vperm.xlu1 %3168, %v2941_v57   ;;  %3071 = vmatmul.mubr.msk.bf16.vlgmr.msra.gmra.mrb[4].mxu1 %vm4522_vm9, %v3187_v22 }
 0xb79   : > { %2320 = vmatpush1.bf16.msra.mxu1 %v2300_v20  ;;  %v2387_v32 = vpop.permute.xlu0 %2386  ;;  %2351 = vmatprep.mubr.bf16.mxu1 %v3258_v1 }
 0xb7a   : > { %v2381_v51 = vpop.permute.xlu1 %2380  ;;  %2321 = vmatprep.subr.bf16.mxu1 %v2303_v0  ;;  %v2403_v45 = vsel %vm2398_vm4, %v2387_v32, %v2389_v30  ;;  %v3191_v32 = vld [vmem:[%s4490_s10 + $0x28] sm:$0xff]  }
 0xb7b   : > { %v2401_v55 = vsel %vm2398_vm4, %v2381_v51, %v2383_v63 }
 0xb7d   : > { %2322 = vmatpush1.bf16.msra.mxu1 %v2302_v6  ;;  %v4351_v12 = vpop.permute.xlu0 %2557 }
 0xb7e   : > { %v2391_v49 = vpop.permute.xlu1 %2390  ;;  %2323 = vmatprep.subr.bf16.mxu1 %v2305_v24 }
 0xb7f   : > { %v2404_v38 = vsel %vm2398_vm4, %v2389_v30, %v2391_v49 }
 0xb81   : > { %2324 = vmatpush1.bf16.msra.mxu1 %v2304_v2  ;;  %v2298_v14 = vpop.permute.xlu0 %2297 }
 0xb82   : > { %v2395_v16 = vpop.permute.xlu1 %2394  ;;  %v2307_v19 = vsel %vm2299_vm3, %v2296_v44, %v2298_v14  ;;  %v3226_v44 = vpack.c.bf16 %v4015_v47, %v4005_v39  ;;  %v3235_v39 = vpack.c.bf16 %v4035_v10, %v4031_v5  ;;  %v3238_v47 = vpack.c.bf16 %v4077_v40, %v4065_v34  ;;  %v3190_v10 = vld [vmem:[%s4490_s10 + $0x20] sm:$0xff]  }
 0xb83   : > { %2325 = vmatprep.subr.bf16.mxu1 %v2307_v19  ;;  %v3244_v5 = vpack.c.bf16 %v4109_v17, %v4097_v9  ;;  %v3247_v34 = vpack.c.bf16 %v4099_v13, %v4095_v4 }
 0xb85   : > { %2326 = vmatpush1.bf16.msra.mxu1 %v2306_v26  ;;  %v2556_v21 = vpop.permute.xlu0 %2555 }
 0xb86   : > { %v2393_v33 = vpop.permute.xlu1 %2392  ;;  %2418 = vmatprep.subr.bf16.mxu1 %v2400_v61  ;;  %v2579_v7 = vsel %vm817_vm15, %v2556_v21, %v4351_v12 }
 0xb87   : > { %v2405_v48 = vsel %vm2398_vm4, %v2393_v33, %v2395_v16 }
 0xb88   : > { %3075 = vmatmul.mubr.msk.bf16.vlgmr.msra.gmra.mrb[4].mxu1 %vm4523_vm6, %v3188_v3 }
 0xb89   : > { %2419 = vmatpush1.bf16.msra.mxu1 %v2399_v58  ;;  %v2566_v60 = vpop.permute.xlu0 %2565  ;;  %2450 = vmatprep.mubr.bf16.mxu1 %v3258_v1 }
 0xb8a   : > { %v2560_v36 = vpop.permute.xlu1 %2559  ;;  %2420 = vmatprep.subr.bf16.mxu1 %v2402_v62 }
 0xb8b   : > { %v2580_v35 = vsel %vm817_vm15, %v4351_v12, %v2560_v36 }
 0xb8d   : > { %2421 = vmatpush1.bf16.msra.mxu1 %v2401_v55  ;;  %v2570_v50 = vpop.permute.xlu0 %2569 }
 0xb8e   : > { %v2564_v42 = vpop.permute.xlu1 %2563  ;;  %2422 = vmatprep.subr.bf16.mxu1 %v2404_v38 }
 0xb8f   : > { %v2582_v17 = vsel %vm817_vm15, %v2564_v42, %v2566_v60  ;;  %v3192_v60 = vld [vmem:[%s4490_s10 + $0x30] sm:$0xff]  }
 0xb91   : > { %2423 = vmatpush1.bf16.msra.mxu1 %v2403_v45  ;;  %v2397_v43 = vpop.permute.xlu0 %2396 }
 0xb92   : > { %v2562_v23 = vpop.permute.xlu1 %2561  ;;  %v2406_v29 = vsel %vm2398_vm4, %v2395_v16, %v2397_v43 }
 0xb93   : > { %2424 = vmatprep.subr.bf16.mxu1 %v2406_v29  ;;  %v2581_v11 = vsel %vm817_vm15, %v2562_v23, %v2564_v42 }
 0xb95   : > { %2425 = vmatpush1.bf16.msra.mxu1 %v2405_v48  ;;  %v2568_v18 = vpop.permute.xlu0 %2567 }
 0xb96   : > { %v2572_v27 = vpop.permute.xlu1 %2571  ;;  %3227 = vmatprep.subr.msk.bf16.mxu1 %vm3437_vm10, %v3226_v44  ;;  %v2583_v30 = vsel %vm817_vm15, %v2568_v18, %v2570_v50 }
 0xb97   : > { %v2584_v25 = vsel %vm817_vm15, %v2570_v50, %v2572_v27 }
 0xb98   : > { %3079 = vmatmul.mubr.msk.bf16.vlgmr.msra.gmra.mrb[4].mxu1 %vm4524_vm5, %v3189_v53 }
 0xb99   : > { %3230 = vmatpush1.bf16.msk.msra.mxu1 %vm3446_vm12, %v3229_v52  ;;  %v2578_v46 = vpop.permute.xlu0 %2577  ;;  %2508 = vmatprep.mubr.bf16.mxu1 %v3258_v1 }
 0xb9a   : > { %v2574_v28 = vpop.permute.xlu1 %2573  ;;  %3233 = vmatprep.subr.msk.bf16.mxu1 %vm3437_vm10, %v3232_v31 }
 0xb9d   : > { %3236 = vmatpush1.bf16.msk.msra.mxu1 %vm3446_vm12, %v3235_v39  ;;  %v2656_v37 = vpop.permute.xlu0 %2655 }
 0xb9e   : > { %v2658_v41 = vpop.permute.xlu1 %2657  ;;  %3239 = vmatprep.subr.msk.bf16.mxu1 %vm3437_vm10, %v3238_v47 }
 0xba1   : > { %3242 = vmatpush1.bf16.msk.msra.mxu1 %vm3446_vm12, %v3241_v8  ;;  %v2654_v15 = vpop.permute.xlu0 %2653 }
 0xba2   : > { %v2662_v54 = vpop.permute.xlu1 %2661  ;;  %3245 = vmatprep.subr.msk.bf16.mxu1 %vm3437_vm10, %v3244_v5  ;;  %vm4525_vm10 = vmmov %vm4524_vm5 }
 0xba5   : > { %3248 = vmatpush1.bf16.msk.msra.mxu1 %vm3446_vm12, %v3247_v34  ;;  %v2664_v59 = vpop.permute.xlu0 %2663  ;;  %vm2677_vm12 = vcmask 924672  }
 0xba6   : > { %v2660_v40 = vpop.permute.xlu1 %2659  ;;  %2598 = vmatprep.subr.bf16.mxu1 %v2580_v35  ;;  %v2679_v51 = vsel %vm2677_vm12, %v2656_v37, %v2658_v41  ;;  %v2678_v12 = vsel %vm2677_vm12, %v2654_v15, %v2656_v37  ;;  %v2681_v49 = vsel %vm2677_vm12, %v2662_v54, %v2664_v59 }
 0xba7   : > { %v2680_v14 = vsel %vm2677_vm12, %v2660_v40, %v2662_v54 }
 0xba8   : > { %3083 = vmatmul.mubr.msk.bf16.vlgmr.msra.gmra.mrb[4].mxu1 %vm4525_vm10, %v3190_v10 }
 0xba9   : > { %2599 = vmatpush1.bf16.msra.mxu1 %v2579_v7  ;;  %v2668_v9 = vpop.permute.xlu0 %2667  ;;  %2630 = vmatprep.mubr.bf16.mxu1 %v3258_v1 }
 0xbaa   : > { %v2670_v4 = vpop.permute.xlu1 %2669  ;;  %2600 = vmatprep.subr.bf16.mxu1 %v2582_v17 }
 0xbab   : > { %v2683_v19 = vsel %vm2677_vm12, %v2668_v9, %v2670_v4 }
 0xbad   : > { %2601 = vmatpush1.bf16.msra.mxu1 %v2581_v11  ;;  %v2666_v13 = vpop.permute.xlu0 %2665 }
 0xbae   : > { %v2672_v22 = vpop.permute.xlu1 %2671  ;;  %2602 = vmatprep.subr.bf16.mxu1 %v2584_v25  ;;  %v2682_v3 = vsel %vm2677_vm12, %v2666_v13, %v2668_v9  ;;  %v3194_v9 = vld [vmem:[%s4490_s10 + $0x40] sm:$0xff]  }
 0xbb1   : > { %2603 = vmatpush1.bf16.msra.mxu1 %v2583_v30  ;;  %v2676_v56 = vpop.permute.xlu0 %2675 }
 0xbb2   : > { %v2576_v57 = vpop.permute.xlu1 %2575 }
 0xbb3   : > { %v2585_v63 = vsel %vm817_vm15, %v2574_v28, %v2576_v57  ;;  %v2586_v20 = vsel %vm817_vm15, %v2576_v57, %v2578_v46  ;;  %vm4527_vm15 = vmmov %vm4524_vm5  ;;  %v3193_v46 = vld [vmem:[%s4490_s10 + $0x38] sm:$0xff]  }
 0xbb4   : > { %2604 = vmatprep.subr.bf16.mxu1 %v2586_v20 }
 0xbb5   : > { %2605 = vmatpush1.bf16.msra.mxu1 %v2585_v63  ;;  %v2755_v0 = vpop.permute.xlu0 %2754 }
 0xbb6   : > { %v2757_v6 = vpop.permute.xlu1 %2756  ;;  %2697 = vmatprep.subr.bf16.mxu1 %v2679_v51 }
 0xbb7   : > { %v2777_v36 = vsel %vm835_vm1, %v2755_v0, %v2757_v6 }
 0xbb8   : > { %3087 = vmatmul.mubr.msk.bf16.vlgmr.msra.gmra.mrb[4].mxu1 %vm4526_vm7, %v3191_v32 }
 0xbb9   : > { %2698 = vmatpush1.bf16.msra.mxu1 %v2678_v12  ;;  %v2753_v24 = vpop.permute.xlu0 %2752  ;;  %2729 = vmatprep.mubr.bf16.mxu1 %v3258_v1 }
 0xbba   : > { %v2761_v2 = vpop.permute.xlu1 %2760  ;;  %2699 = vmatprep.subr.bf16.mxu1 %v2681_v49  ;;  %v2776_v50 = vsel %vm835_vm1, %v2753_v24, %v2755_v0 }
 0xbbd   : > { %2700 = vmatpush1.bf16.msra.mxu1 %v2680_v14  ;;  %v2763_v16 = vpop.permute.xlu0 %2762 }
 0xbbe   : > { %v2759_v26 = vpop.permute.xlu1 %2758  ;;  %2701 = vmatprep.subr.bf16.mxu1 %v2683_v19  ;;  %v2779_v42 = vsel %vm835_vm1, %v2761_v2, %v2763_v16 }
 0xbbf   : > { %v2778_v43 = vsel %vm835_vm1, %v2759_v26, %v2761_v2 }
 0xbc1   : > { %2702 = vmatpush1.bf16.msra.mxu1 %v2682_v3  ;;  %v2767_v21 = vpop.permute.xlu0 %2766 }
 0xbc2   : > { %v2674_v61 = vpop.permute.xlu1 %2673 }
 0xbc3   : > { %v2684_v33 = vsel %vm2677_vm12, %v2672_v22, %v2674_v61  ;;  %v2685_v58 = vsel %vm2677_vm12, %v2674_v61, %v2676_v56 }
 0xbc4   : > { %2703 = vmatprep.subr.bf16.mxu1 %v2685_v58 }
 0xbc5   : > { %2704 = vmatpush1.bf16.msra.mxu1 %v2684_v33  ;;  %v2765_v62 = vpop.permute.xlu0 %2764 }
 0xbc6   : > { %v2769_v55 = vpop.permute.xlu1 %2768  ;;  %2795 = vmatprep.subr.bf16.mxu1 %v2777_v36  ;;  %v2780_v53 = vsel %vm835_vm1, %v2765_v62, %v2767_v21 }
 0xbc7   : > { %v2781_v29 = vsel %vm835_vm1, %v2767_v21, %v2769_v55 }
 0xbc8   : > { %3091 = vmatmul.mubr.msk.bf16.vlgmr.msra.gmra.mrb[4].mxu1 %vm4527_vm15, %v3192_v60 }
 0xbc9   : > { %2796 = vmatpush1.bf16.msra.mxu1 %v2776_v50  ;;  %v2775_v38 = vpop.permute.xlu0 %2774  ;;  %2827 = vmatprep.mubr.bf16.mxu1 %v3258_v1 }
 0xbca   : > { %v2771_v45 = vpop.permute.xlu1 %2770  ;;  %2797 = vmatprep.subr.bf16.mxu1 %v2779_v42 }
 0xbcd   : > { %2798 = vmatpush1.bf16.msra.mxu1 %v2778_v43  ;;  %v2853_v23 = vpop.permute.xlu0 %2852 }
 0xbce   : > { %v2855_v48 = vpop.permute.xlu1 %2854  ;;  %2799 = vmatprep.subr.bf16.mxu1 %v2781_v29 }
 0xbcf   : > { %v2875_v31 = vsel %vm842_vm2, %v2853_v23, %v2855_v48 }
 0xbd1   : > { %2800 = vmatpush1.bf16.msra.mxu1 %v2780_v53  ;;  %v2851_v18 = vpop.permute.xlu0 %2850 }
 0xbd2   : > { %v2773_v27 = vpop.permute.xlu1 %2772  ;;  %v2874_v37 = vsel %vm842_vm2, %v2851_v18, %v2853_v23 }
 0xbd3   : > { %v2782_v44 = vsel %vm835_vm1, %v2771_v45, %v2773_v27  ;;  %v2783_v52 = vsel %vm835_vm1, %v2773_v27, %v2775_v38  ;;  %vm4529_vm1 = vmmov %vm4524_vm5 }
 0xbd4   : > { %2801 = vmatprep.subr.bf16.mxu1 %v2783_v52 }
 0xbd5   : > { %2802 = vmatpush1.bf16.msra.mxu1 %v2782_v44  ;;  %v2861_v28 = vpop.permute.xlu0 %2860 }
 0xbd6   : > { %v2859_v39 = vpop.permute.xlu1 %2858  ;;  %2893 = vmatprep.subr.bf16.mxu1 %v2875_v31 }
 0xbd7   : > { %v2877_v47 = vsel %vm842_vm2, %v2859_v39, %v2861_v28 }
 0xbd8   : > { %3095 = vmatmul.mubr.msk.bf16.vlgmr.msra.gmra.mrb[4].mxu1 %vm4528_vm14, %v3193_v46 }
 0xbd9   : > { %2894 = vmatpush1.bf16.msra.mxu1 %v2874_v37  ;;  %v2865_v41 = vpop.permute.xlu0 %2864  ;;  %2925 = vmatprep.mubr.bf16.mxu1 %v3258_v1 }
 0xbda   : > { %v2857_v8 = vpop.permute.xlu1 %2856  ;;  %2895 = vmatprep.subr.bf16.mxu1 %v2877_v47 }
 0xbdb   : > { %v2876_v15 = vsel %vm842_vm2, %v2857_v8, %v2859_v39 }
 0xbdd   : > { %2896 = vmatpush1.bf16.msra.mxu1 %v2876_v15  ;;  %v2863_v54 = vpop.permute.xlu0 %2862 }
 0xbde   : > { %v2867_v5 = vpop.permute.xlu1 %2866  ;;  %v2878_v34 = vsel %vm842_vm2, %v2863_v54, %v2865_v41 }
 0xbdf   : > { %v2879_v10 = vsel %vm842_vm2, %v2865_v41, %v2867_v5 }
 0xbe0   : > { %2897 = vmatprep.subr.bf16.mxu1 %v2879_v10 }
 0xbe1   : > { %2898 = vmatpush1.bf16.msra.mxu1 %v2878_v34  ;;  %v2873_v59 = vpop.permute.xlu0 %2872 }
 0xbe2   : > { %v2871_v35 = vpop.permute.xlu1 %2870 }
 0xbe3   : > { %v2881_v40 = vsel %vm842_vm2, %v2871_v35, %v2873_v59 }
 0xbe4   : > { %2899 = vmatprep.subr.bf16.mxu1 %v2881_v40 }
 0xbe6   : > { %v2869_v1 = vpop.permute.xlu1 %2868 }
 0xbe7   : > { %v2880_v7 = vsel %vm842_vm2, %v2869_v1, %v2871_v35 }
 0xbe8   : > { %2900 = vmatpush1.bf16.msra.mxu1 %v2880_v7 }
 0xbeb   : > { %3099 = vmatmul.mubr.msk.bf16.vlgmr.msra.gmra.mrb[4].mxu1 %vm4529_vm1, %v3194_v9 }
 0xbf2   : > { %v2945_v17 = vpop.permute.xlu0 %2944 }
 0xbf7   : > { %v2950_v25 = vpop.permute.xlu1 %2949 }
 0xcbe   : > { %v2927_v4 = vpop.f32.mrb[4].mxu1 }
 0xcbf   : > { %v2952_v11 = vadd.f32 %v2945_v17, %v2927_v4  ;;  %v2929_v13 = vpop.f32.mrb[5].mxu1 }
 0xcc0   : > { %v2953_v22 = vadd.f32 %v2945_v17, %v2929_v13  ;;  %v2931_v30 = vpop.f32.mrb[6].mxu1 }
 0xcc1   : > { %2956 = vst [vmem:[%s413_s13] sm:$0xff] %v2952_v11  ;;  %v2954_v56 = vadd.f32 %v2950_v25, %v2931_v30  ;;  %v2933_v57 = vpop.f32.mrb[7].mxu1 }
 0xcc2   : > { %2957 = vst [vmem:[%s413_s13 + $0x8] sm:$0xff] %v2953_v22  ;;  %v2955_v63 = vadd.f32 %v2950_v25, %v2933_v57 }
 0xcc3   : > { %2958 = vst [vmem:[%s413_s13 + $0x10] sm:$0xff] %v2954_v56 }
 0xcc4   : > { %2959 = vst [vmem:[%s413_s13 + $0x18] sm:$0xff] %v2955_v63 }
 0xcc5 PF: > { %s22_s21 = sadd.s32 1, %s3255_s21  }
 0xcc6   : > { %p19_p4 = scmp.ge.s32.totalorder %s22_s21, 4  }
 0xcc8   :  { %21 = sbr.rel (!%p19_p4) target bundleno = 1 (0x1), region = 112 }

</bundles_post_ra>
